<compile_context>
chip_gen: v7x
topology: tpu7x:2x2x1
jax: 0.10.0
libtpu: 0.0.40
codegen_flags: <defaults>
</compile_context>

<pallas_src>
import functools

import jax
import jax.numpy as jnp
from jax import lax
from jax.experimental import pallas as pl
from jax.experimental.pallas import tpu as pltpu


def _round_up(x, m):
    return ((x + m - 1) // m) * m


# ----------------------------- Pallas kernel --------------------------------

def _bottleneck_kernel(x_ref, r_ref, w1_ref, s1_ref, b1_ref,
                       w2_ref, s2_ref, b2_ref,
                       w3_ref, s3_ref, b3_ref,
                       o_ref, a1p_ref, a2_ref, *, H, W, d):
    """Fully fused Bottleneck (stride=1, downsample=None) for one image.

    Grid = (N, Op // tn).  At j == 0 the conv1->bn1->relu->conv2->bn2->relu
    chain is computed once per image into VMEM scratch (a2_ref); every j then
    produces one lane-dense Cout tile of conv3 + bn3 + residual + relu.
    """
    j = pl.program_id(1)
    Cp = x_ref.shape[-1]          # padded input channels
    Wp = a2_ref.shape[-1]         # padded "width" channels

    @pl.when(j == 0)
    def _():
        # ---- conv1 (1x1) + bn1 + relu (MXU matmul, f32 accumulate) --------
        x2d = x_ref[0].reshape(H * W, Cp)
        a1 = jnp.dot(x2d, w1_ref[...], preferred_element_type=jnp.float32)
        a1 = jnp.maximum(a1 * s1_ref[...] + b1_ref[...], 0.0)

        # Zero-padded conv1 activation kept entirely in VMEM (halo = d).
        a1p_ref[...] = jnp.zeros_like(a1p_ref)
        a1p_ref[d:H + d, d:W + d, :] = a1.reshape(H, W, Wp).astype(a1p_ref.dtype)

        # ---- conv2 (3x3, dilation d) as 9 accumulating MXU matmuls --------
        acc = jnp.zeros((H * W, Wp), jnp.float32)
        for kh in range(3):
            for kw in range(3):
                patch = a1p_ref[kh * d:kh * d + H, kw * d:kw * d + W, :]
                acc = acc + jnp.dot(patch.reshape(H * W, Wp), w2_ref[kh, kw],
                                    preferred_element_type=jnp.float32)
        a2 = jnp.maximum(acc * s2_ref[...] + b2_ref[...], 0.0)
        a2_ref[...] = a2.astype(a2_ref.dtype)

    # ---- conv3 (1x1) + bn3 + residual + relu for one lane-dense Cout tile --
    tn = o_ref.shape[-1]
    out = jnp.dot(a2_ref[...], w3_ref[...], preferred_element_type=jnp.float32)
    out = out * s3_ref[...] + b3_ref[...]
    out = out + r_ref[0].reshape(H * W, tn).astype(jnp.float32)
    out = jnp.maximum(out, 0.0)
    o_ref[0] = out.reshape(H, W, tn).astype(o_ref.dtype)


# ------------------------------- JAX wrapper ---------------------------------

def _fold_bn(gamma, beta, mean, var, eps=1e-5):
    scale = gamma / jnp.sqrt(var + eps)
    bias = beta - mean * scale
    return scale, bias


def bottleneck_forward(x_nchw, params, stride=1, dilation=1,
                       compute_dtype=jnp.bfloat16, eps=1e-5):
    """Pallas implementation of Bottleneck.forward (downsample=None, eval BN)."""
    assert stride == 1, "only stride=1 (downsample=None) is supported"
    N, Cin, H, W = x_nchw.shape
    w1, w2, w3 = params["w1"], params["w2"], params["w3"]
    width = w1.shape[0]
    Cout = w3.shape[0]
    assert Cin == Cout, "downsample=None requires inplanes == planes*expansion"
    d = int(dilation)

    # ---- pad channels to the 128-lane width (lane-dense MXU / stores) ------
    LANE = 128
    Cp = _round_up(Cin, LANE)
    Wp = _round_up(width, LANE)
    Op = _round_up(Cout, LANE)          # == Cp because Cin == Cout

    x = jnp.transpose(x_nchw, (0, 2, 3, 1))                        # NHWC
    xp = jnp.pad(x, ((0, 0), (0, 0), (0, 0), (0, Cp - Cin)))
    xp = xp.astype(compute_dtype)

    # Weights as (K, Cout) matmul operands, zero-padded to lane multiples.
    w1m = jnp.transpose(w1[:, :, 0, 0], (1, 0))                    # (Cin, width)
    w1m = jnp.pad(w1m, ((0, Cp - Cin), (0, Wp - width))).astype(compute_dtype)
    w2m = jnp.transpose(w2, (2, 3, 1, 0))                          # (3,3,in,out)
    w2m = jnp.pad(w2m, ((0, 0), (0, 0),
                        (0, Wp - width), (0, Wp - width))).astype(compute_dtype)
    w3m = jnp.transpose(w3[:, :, 0, 0], (1, 0))                    # (width, Cout)
    w3m = jnp.pad(w3m, ((0, Wp - width), (0, Op - Cout))).astype(compute_dtype)

    def fold_pad(bn, c, cp):
        s, b = _fold_bn(*bn, eps=eps)
        s = jnp.pad(s, (0, cp - c)).reshape(1, cp).astype(jnp.float32)
        b = jnp.pad(b, (0, cp - c)).reshape(1, cp).astype(jnp.float32)
        return s, b

    s1, b1 = fold_pad(params["bn1"], width, Wp)
    s2, b2 = fold_pad(params["bn2"], width, Wp)
    s3, b3 = fold_pad(params["bn3"], Cout, Op)

    # Cout tile: lane-dense multiple of 128 (256 matches v6e/v7x MXU geometry).
    tn = 256 if Op % 256 == 0 else 128
    grid = (N, Op // tn)

    kernel = functools.partial(_bottleneck_kernel, H=H, W=W, d=d)

    out = pl.pallas_call(
        kernel,
        out_shape=jax.ShapeDtypeStruct((N, H, W, Op), x_nchw.dtype),
        grid=grid,
        in_specs=[
            pl.BlockSpec((1, H, W, Cp), lambda n, j: (n, 0, 0, 0)),    # x (conv1)
            pl.BlockSpec((1, H, W, tn), lambda n, j: (n, 0, 0, j)),    # x (residual tile)
            pl.BlockSpec((Cp, Wp), lambda n, j: (0, 0)),               # w1
            pl.BlockSpec((1, Wp), lambda n, j: (0, 0)),                # bn1 scale
            pl.BlockSpec((1, Wp), lambda n, j: (0, 0)),                # bn1 bias
            pl.BlockSpec((3, 3, Wp, Wp), lambda n, j: (0, 0, 0, 0)),   # w2
            pl.BlockSpec((1, Wp), lambda n, j: (0, 0)),                # bn2 scale
            pl.BlockSpec((1, Wp), lambda n, j: (0, 0)),                # bn2 bias
            pl.BlockSpec((Wp, tn), lambda n, j: (0, j)),               # w3 Cout tile
            pl.BlockSpec((1, tn), lambda n, j: (0, j)),                # bn3 scale tile
            pl.BlockSpec((1, tn), lambda n, j: (0, j)),                # bn3 bias tile
        ],
        out_specs=pl.BlockSpec((1, H, W, tn), lambda n, j: (n, 0, 0, j)),
        scratch_shapes=[
            pltpu.VMEM((H + 2 * d, W + 2 * d, Wp), compute_dtype),     # padded conv1 act
            pltpu.VMEM((H * W, Wp), compute_dtype),                    # conv2 act (post bn2/relu)
        ],
        compiler_params=pltpu.CompilerParams(
            dimension_semantics=("parallel", "arbitrary"),
            vmem_limit_bytes=32 * 1024 * 1024,
        ),
    )(xp, xp, w1m, s1, b1, w2m, s2, b2, w3m, s3, b3)

    out = out[..., :Cout]                                            # drop channel padding
    return jnp.transpose(out, (0, 3, 1, 2))                          # back to NCHW


# --------------------------- pure-JAX reference ------------------------------

def reference_forward(x, params, stride=1, dilation=1, eps=1e-5):
    def conv(x, w, stride=1, padding=0, dil=1):
        return lax.conv_general_dilated(
            x, w, (stride, stride), [(padding, padding)] * 2,
            rhs_dilation=(dil, dil),
            dimension_numbers=("NCHW", "OIHW", "NCHW"))

    def bn(x, p):
        g, b, m, v = p
        inv = g / jnp.sqrt(v + eps)
        return x * inv[None, :, None, None] + (b - m * inv)[None, :, None, None]

    out = jnp.maximum(bn(conv(x, params["w1"]), params["bn1"]), 0.0)
    out = jnp.maximum(bn(conv(out, params["w2"], stride, dilation, dilation),
                         params["bn2"]), 0.0)
    out = bn(conv(out, params["w3"]), params["bn3"])
    out = out + x                                        # downsample is None
    return jnp.maximum(out, 0.0)


# --------------------------------- main --------------------------------------

if __name__ == "__main__":
    key = jax.random.PRNGKey(0)
    ks = jax.random.split(key, 8)

    # Small Bottleneck: inplanes = planes * expansion so the default
    # (downsample=None, stride=1) residual path is valid.
    N, H, W = 2, 16, 16
    planes, expansion, groups, base_width = 4, 4, 1, 64
    width = int(planes * (base_width / 64.0)) * groups   # 4
    inplanes = planes * expansion                        # 16
    Cout = planes * expansion                            # 16

    def bn_params(k, c):
        k1, k2, k3, k4 = jax.random.split(k, 4)
        gamma = 1.0 + 0.1 * jax.random.normal(k1, (c,), jnp.float32)
        beta = 0.1 * jax.random.normal(k2, (c,), jnp.float32)
        mean = 0.1 * jax.random.normal(k3, (c,), jnp.float32)
        var = 0.5 + jax.random.uniform(k4, (c,), jnp.float32)
        return (gamma, beta, mean, var)

    params = {
        "w1": 0.1 * jax.random.normal(ks[0], (width, inplanes, 1, 1), jnp.float32),
        "w2": 0.1 * jax.random.normal(ks[1], (width, width, 3, 3), jnp.float32),
        "w3": 0.1 * jax.random.normal(ks[2], (Cout, width, 1, 1), jnp.float32),
        "bn1": bn_params(ks[3], width),
        "bn2": bn_params(ks[4], width),
        "bn3": bn_params(ks[5], Cout),
    }

    x = jax.random.normal(ks[6], (N, inplanes, H, W), jnp.float32)

    ref = jax.block_until_ready(reference_forward(x, params))

    # f32 compute path: tight numerical check vs the XLA reference.
    out_f32 = jax.block_until_ready(
        bottleneck_forward(x, params, compute_dtype=jnp.float32))
    assert out_f32.shape == ref.shape == (N, Cout, H, W), (out_f32.shape, ref.shape)
    if not jnp.allclose(out_f32, ref, rtol=1e-4, atol=1e-4):
        raise AssertionError("f32 Pallas Bottleneck mismatch vs JAX reference")

    # bf16 MXU path (default, ~2x MXU throughput): loose numerical check.
    out_bf16 = jax.block_until_ready(
        bottleneck_forward(x, params, compute_dtype=jnp.bfloat16))
    assert out_bf16.shape == ref.shape
    if not jnp.allclose(out_bf16, ref, rtol=5e-2, atol=1e-1):
        raise AssertionError("bf16 Pallas Bottleneck mismatch vs JAX reference")

    print("KERNEL_OK")
</pallas_src>

<mosaic_0001>
module attributes {stable_mosaic.version = 11 : i64} {
  func.func @_bottleneck_kernel(%arg0: i32, %arg1: i32, %arg2: memref<1x16x16x128xf32, #tpu.memory_space<vmem>>, %arg3: memref<1x16x16x128xf32, #tpu.memory_space<vmem>>, %arg4: memref<128x128xf32, #tpu.memory_space<vmem>>, %arg5: memref<1x128xf32, #tpu.memory_space<vmem>>, %arg6: memref<1x128xf32, #tpu.memory_space<vmem>>, %arg7: memref<3x3x128x128xf32, #tpu.memory_space<vmem>>, %arg8: memref<1x128xf32, #tpu.memory_space<vmem>>, %arg9: memref<1x128xf32, #tpu.memory_space<vmem>>, %arg10: memref<128x128xf32, #tpu.memory_space<vmem>>, %arg11: memref<1x128xf32, #tpu.memory_space<vmem>>, %arg12: memref<1x128xf32, #tpu.memory_space<vmem>>, %arg13: memref<1x16x16x128xf32, #tpu.memory_space<vmem>>, %arg14: memref<18x18x128xf32, #tpu.memory_space<vmem>>, %arg15: memref<256x128xf32, #tpu.memory_space<vmem>>) attributes {dimension_semantics = [#tpu.dimension_semantics<parallel>, #tpu.dimension_semantics<arbitrary>], iteration_bounds = array<i64: 2, 1>, scalar_prefetch = 0 : i64, scratch_operands = 2 : i64, tpu.core_type = #tpu.core_type<tc>, window_params = [{transform_indices = @transform_0, window_bounds = array<i64: 1, 16, 16, 128>}, {transform_indices = @transform_1, window_bounds = array<i64: 1, 16, 16, 128>}, {pipeline_mode = #tpu.pipeline_mode<synchronous>, transform_indices = @transform_2, window_bounds = array<i64: 128, 128>}, {pipeline_mode = #tpu.pipeline_mode<synchronous>, transform_indices = @transform_3, window_bounds = array<i64: 1, 128>}, {pipeline_mode = #tpu.pipeline_mode<synchronous>, transform_indices = @transform_4, window_bounds = array<i64: 1, 128>}, {pipeline_mode = #tpu.pipeline_mode<synchronous>, transform_indices = @transform_5, window_bounds = array<i64: 3, 3, 128, 128>}, {pipeline_mode = #tpu.pipeline_mode<synchronous>, transform_indices = @transform_6, window_bounds = array<i64: 1, 128>}, {pipeline_mode = #tpu.pipeline_mode<synchronous>, transform_indices = @transform_7, window_bounds = array<i64: 1, 128>}, {transform_indices = @transform_8, window_bounds = array<i64: 128, 128>}, {transform_indices = @transform_9, window_bounds = array<i64: 1, 128>}, {transform_indices = @transform_10, window_bounds = array<i64: 1, 128>}, {transform_indices = @transform_11, window_bounds = array<i64: 1, 16, 16, 128>}]} {
    %c0_i32 = arith.constant 0 : i32
    %0 = arith.cmpi eq, %arg1, %c0_i32 : i32
    %1 = arith.extui %0 : i1 to i32
    %c0_i32_0 = arith.constant 0 : i32
    %2 = arith.cmpi ne, %1, %c0_i32_0 : i32
    scf.if %2 {
      %c0_17 = arith.constant 0 : index
      %c0_18 = arith.constant 0 : index
      %c0_19 = arith.constant 0 : index
      %c0_20 = arith.constant 0 : index
      %22 = vector.load %arg2[%c0_17, %c0_18, %c0_19, %c0_20] : memref<1x16x16x128xf32, #tpu.memory_space<vmem>>, vector<1x16x16x128xf32>
      %23 = vector.shape_cast %22 : vector<1x16x16x128xf32> to vector<16x16x128xf32>
      %24 = vector.shape_cast %23 : vector<16x16x128xf32> to vector<256x128xf32>
      %c0_21 = arith.constant 0 : index
      %c0_22 = arith.constant 0 : index
      %25 = vector.load %arg4[%c0_21, %c0_22] : memref<128x128xf32, #tpu.memory_space<vmem>>, vector<128x128xf32>
      %cst_23 = arith.constant dense<0.000000e+00> : vector<256x128xf32>
      %26 = tpu.matmul %24, %25, %cst_23 {dimension_numbers = #tpu.dot_dimension_numbers<[1], [0], [0], [1], [0, 0, 1, 1], [], []>} : vector<256x128xf32>, vector<128x128xf32>, vector<256x128xf32> -> vector<256x128xf32>
      %c0_24 = arith.constant 0 : index
      %c0_25 = arith.constant 0 : index
      %27 = vector.load %arg5[%c0_24, %c0_25] : memref<1x128xf32, #tpu.memory_space<vmem>>, vector<1x128xf32>
      %28 = vector.broadcast %27 : vector<1x128xf32> to vector<256x128xf32>
      %29 = arith.mulf %26, %28 : vector<256x128xf32>
      %c0_26 = arith.constant 0 : index
      %c0_27 = arith.constant 0 : index
      %30 = vector.load %arg6[%c0_26, %c0_27] : memref<1x128xf32, #tpu.memory_space<vmem>>, vector<1x128xf32>
      %31 = vector.broadcast %30 : vector<1x128xf32> to vector<256x128xf32>
      %32 = arith.addf %29, %31 : vector<256x128xf32>
      %cst_28 = arith.constant 0.000000e+00 : f32
      %33 = vector.broadcast %cst_28 : f32 to vector<256x128xf32>
      %34 = arith.maximumf %32, %33 : vector<256x128xf32>
      %cst_29 = arith.constant 0.000000e+00 : f32
      %35 = vector.broadcast %cst_29 : f32 to vector<18x18x128xf32>
      %c0_30 = arith.constant 0 : index
      %c0_31 = arith.constant 0 : index
      %c0_32 = arith.constant 0 : index
      %36 = vector.load %arg14[%c0_30, %c0_31, %c0_32] : memref<18x18x128xf32, #tpu.memory_space<vmem>>, vector<18x18x128xf32>
      tpu.vector_store %arg14[%c0_30, %c0_31, %c0_32], %35 {strides = array<i32>} : memref<18x18x128xf32, #tpu.memory_space<vmem>>, vector<18x18x128xf32>,
      %37 = vector.shape_cast %34 : vector<256x128xf32> to vector<16x16x128xf32>
      %c1 = arith.constant 1 : index
      %c1_33 = arith.constant 1 : index
      %c0_34 = arith.constant 0 : index
      %38 = vector.load %arg14[%c1, %c1_33, %c0_34] : memref<18x18x128xf32, #tpu.memory_space<vmem>>, vector<16x16x128xf32>
      tpu.vector_store %arg14[%c1, %c1_33, %c0_34], %37 {strides = array<i32>} : memref<18x18x128xf32, #tpu.memory_space<vmem>>, vector<16x16x128xf32>,
      %cst_35 = arith.constant 0.000000e+00 : f32
      %39 = vector.broadcast %cst_35 : f32 to vector<256x128xf32>
      %c0_36 = arith.constant 0 : index
      %c0_37 = arith.constant 0 : index
      %c0_38 = arith.constant 0 : index
      %40 = vector.load %arg14[%c0_36, %c0_37, %c0_38] : memref<18x18x128xf32, #tpu.memory_space<vmem>>, vector<16x16x128xf32>
      %41 = vector.shape_cast %40 : vector<16x16x128xf32> to vector<256x128xf32>
      %c0_39 = arith.constant 0 : index
      %c0_40 = arith.constant 0 : index
      %c0_41 = arith.constant 0 : index
      %c0_42 = arith.constant 0 : index
      %42 = vector.load %arg7[%c0_39, %c0_40, %c0_41, %c0_42] : memref<3x3x128x128xf32, #tpu.memory_space<vmem>>, vector<1x1x128x128xf32>
      %43 = vector.shape_cast %42 : vector<1x1x128x128xf32> to vector<128x128xf32>
      %cst_43 = arith.constant dense<0.000000e+00> : vector<256x128xf32>
      %44 = tpu.matmul %41, %43, %cst_43 {dimension_numbers = #tpu.dot_dimension_numbers<[1], [0], [0], [1], [0, 0, 1, 1], [], []>} : vector<256x128xf32>, vector<128x128xf32>, vector<256x128xf32> -> vector<256x128xf32>
      %45 = arith.addf %39, %44 : vector<256x128xf32>
      %c0_44 = arith.constant 0 : index
      %c1_45 = arith.constant 1 : index
      %c0_46 = arith.constant 0 : index
      %46 = vector.load %arg14[%c0_44, %c1_45, %c0_46] : memref<18x18x128xf32, #tpu.memory_space<vmem>>, vector<16x16x128xf32>
      %47 = vector.shape_cast %46 : vector<16x16x128xf32> to vector<256x128xf32>
      %c0_47 = arith.constant 0 : index
      %c1_48 = arith.constant 1 : index
      %c0_49 = arith.constant 0 : index
      %c0_50 = arith.constant 0 : index
      %48 = vector.load %arg7[%c0_47, %c1_48, %c0_49, %c0_50] : memref<3x3x128x128xf32, #tpu.memory_space<vmem>>, vector<1x1x128x128xf32>
      %49 = vector.shape_cast %48 : vector<1x1x128x128xf32> to vector<128x128xf32>
      %cst_51 = arith.constant dense<0.000000e+00> : vector<256x128xf32>
      %50 = tpu.matmul %47, %49, %cst_51 {dimension_numbers = #tpu.dot_dimension_numbers<[1], [0], [0], [1], [0, 0, 1, 1], [], []>} : vector<256x128xf32>, vector<128x128xf32>, vector<256x128xf32> -> vector<256x128xf32>
      %51 = arith.addf %45, %50 : vector<256x128xf32>
      %c0_52 = arith.constant 0 : index
      %c2 = arith.constant 2 : index
      %c0_53 = arith.constant 0 : index
      %52 = vector.load %arg14[%c0_52, %c2, %c0_53] : memref<18x18x128xf32, #tpu.memory_space<vmem>>, vector<16x16x128xf32>
      %53 = vector.shape_cast %52 : vector<16x16x128xf32> to vector<256x128xf32>
      %c0_54 = arith.constant 0 : index
      %c2_55 = arith.constant 2 : index
      %c0_56 = arith.constant 0 : index
      %c0_57 = arith.constant 0 : index
      %54 = vector.load %arg7[%c0_54, %c2_55, %c0_56, %c0_57] : memref<3x3x128x128xf32, #tpu.memory_space<vmem>>, vector<1x1x128x128xf32>
      %55 = vector.shape_cast %54 : vector<1x1x128x128xf32> to vector<128x128xf32>
      %cst_58 = arith.constant dense<0.000000e+00> : vector<256x128xf32>
      %56 = tpu.matmul %53, %55, %cst_58 {dimension_numbers = #tpu.dot_dimension_numbers<[1], [0], [0], [1], [0, 0, 1, 1], [], []>} : vector<256x128xf32>, vector<128x128xf32>, vector<256x128xf32> -> vector<256x128xf32>
      %57 = arith.addf %51, %56 : vector<256x128xf32>
      %c1_59 = arith.constant 1 : index
      %c0_60 = arith.constant 0 : index
      %c0_61 = arith.constant 0 : index
      %58 = vector.load %arg14[%c1_59, %c0_60, %c0_61] : memref<18x18x128xf32, #tpu.memory_space<vmem>>, vector<16x16x128xf32>
      %59 = vector.shape_cast %58 : vector<16x16x128xf32> to vector<256x128xf32>
      %c1_62 = arith.constant 1 : index
      %c0_63 = arith.constant 0 : index
      %c0_64 = arith.constant 0 : index
      %c0_65 = arith.constant 0 : index
      %60 = vector.load %arg7[%c1_62, %c0_63, %c0_64, %c0_65] : memref<3x3x128x128xf32, #tpu.memory_space<vmem>>, vector<1x1x128x128xf32>
      %61 = vector.shape_cast %60 : vector<1x1x128x128xf32> to vector<128x128xf32>
      %cst_66 = arith.constant dense<0.000000e+00> : vector<256x128xf32>
      %62 = tpu.matmul %59, %61, %cst_66 {dimension_numbers = #tpu.dot_dimension_numbers<[1], [0], [0], [1], [0, 0, 1, 1], [], []>} : vector<256x128xf32>, vector<128x128xf32>, vector<256x128xf32> -> vector<256x128xf32>
      %63 = arith.addf %57, %62 : vector<256x128xf32>
      %c1_67 = arith.constant 1 : index
      %c1_68 = arith.constant 1 : index
      %c0_69 = arith.constant 0 : index
      %64 = vector.load %arg14[%c1_67, %c1_68, %c0_69] : memref<18x18x128xf32, #tpu.memory_space<vmem>>, vector<16x16x128xf32>
      %65 = vector.shape_cast %64 : vector<16x16x128xf32> to vector<256x128xf32>
      %c1_70 = arith.constant 1 : index
      %c1_71 = arith.constant 1 : index
      %c0_72 = arith.constant 0 : index
      %c0_73 = arith.constant 0 : index
      %66 = vector.load %arg7[%c1_70, %c1_71, %c0_72, %c0_73] : memref<3x3x128x128xf32, #tpu.memory_space<vmem>>, vector<1x1x128x128xf32>
      %67 = vector.shape_cast %66 : vector<1x1x128x128xf32> to vector<128x128xf32>
      %cst_74 = arith.constant dense<0.000000e+00> : vector<256x128xf32>
      %68 = tpu.matmul %65, %67, %cst_74 {dimension_numbers = #tpu.dot_dimension_numbers<[1], [0], [0], [1], [0, 0, 1, 1], [], []>} : vector<256x128xf32>, vector<128x128xf32>, vector<256x128xf32> -> vector<256x128xf32>
      %69 = arith.addf %63, %68 : vector<256x128xf32>
      %c1_75 = arith.constant 1 : index
      %c2_76 = arith.constant 2 : index
      %c0_77 = arith.constant 0 : index
      %70 = vector.load %arg14[%c1_75, %c2_76, %c0_77] : memref<18x18x128xf32, #tpu.memory_space<vmem>>, vector<16x16x128xf32>
      %71 = vector.shape_cast %70 : vector<16x16x128xf32> to vector<256x128xf32>
      %c1_78 = arith.constant 1 : index
      %c2_79 = arith.constant 2 : index
      %c0_80 = arith.constant 0 : index
      %c0_81 = arith.constant 0 : index
      %72 = vector.load %arg7[%c1_78, %c2_79, %c0_80, %c0_81] : memref<3x3x128x128xf32, #tpu.memory_space<vmem>>, vector<1x1x128x128xf32>
      %73 = vector.shape_cast %72 : vector<1x1x128x128xf32> to vector<128x128xf32>
      %cst_82 = arith.constant dense<0.000000e+00> : vector<256x128xf32>
      %74 = tpu.matmul %71, %73, %cst_82 {dimension_numbers = #tpu.dot_dimension_numbers<[1], [0], [0], [1], [0, 0, 1, 1], [], []>} : vector<256x128xf32>, vector<128x128xf32>, vector<256x128xf32> -> vector<256x128xf32>
      %75 = arith.addf %69, %74 : vector<256x128xf32>
      %c2_83 = arith.constant 2 : index
      %c0_84 = arith.constant 0 : index
      %c0_85 = arith.constant 0 : index
      %76 = vector.load %arg14[%c2_83, %c0_84, %c0_85] : memref<18x18x128xf32, #tpu.memory_space<vmem>>, vector<16x16x128xf32>
      %77 = vector.shape_cast %76 : vector<16x16x128xf32> to vector<256x128xf32>
      %c2_86 = arith.constant 2 : index
      %c0_87 = arith.constant 0 : index
      %c0_88 = arith.constant 0 : index
      %c0_89 = arith.constant 0 : index
      %78 = vector.load %arg7[%c2_86, %c0_87, %c0_88, %c0_89] : memref<3x3x128x128xf32, #tpu.memory_space<vmem>>, vector<1x1x128x128xf32>
      %79 = vector.shape_cast %78 : vector<1x1x128x128xf32> to vector<128x128xf32>
      %cst_90 = arith.constant dense<0.000000e+00> : vector<256x128xf32>
      %80 = tpu.matmul %77, %79, %cst_90 {dimension_numbers = #tpu.dot_dimension_numbers<[1], [0], [0], [1], [0, 0, 1, 1], [], []>} : vector<256x128xf32>, vector<128x128xf32>, vector<256x128xf32> -> vector<256x128xf32>
      %81 = arith.addf %75, %80 : vector<256x128xf32>
      %c2_91 = arith.constant 2 : index
      %c1_92 = arith.constant 1 : index
      %c0_93 = arith.constant 0 : index
      %82 = vector.load %arg14[%c2_91, %c1_92, %c0_93] : memref<18x18x128xf32, #tpu.memory_space<vmem>>, vector<16x16x128xf32>
      %83 = vector.shape_cast %82 : vector<16x16x128xf32> to vector<256x128xf32>
      %c2_94 = arith.constant 2 : index
      %c1_95 = arith.constant 1 : index
      %c0_96 = arith.constant 0 : index
      %c0_97 = arith.constant 0 : index
      %84 = vector.load %arg7[%c2_94, %c1_95, %c0_96, %c0_97] : memref<3x3x128x128xf32, #tpu.memory_space<vmem>>, vector<1x1x128x128xf32>
      %85 = vector.shape_cast %84 : vector<1x1x128x128xf32> to vector<128x128xf32>
      %cst_98 = arith.constant dense<0.000000e+00> : vector<256x128xf32>
      %86 = tpu.matmul %83, %85, %cst_98 {dimension_numbers = #tpu.dot_dimension_numbers<[1], [0], [0], [1], [0, 0, 1, 1], [], []>} : vector<256x128xf32>, vector<128x128xf32>, vector<256x128xf32> -> vector<256x128xf32>
      %87 = arith.addf %81, %86 : vector<256x128xf32>
      %c2_99 = arith.constant 2 : index
      %c2_100 = arith.constant 2 : index
      %c0_101 = arith.constant 0 : index
      %88 = vector.load %arg14[%c2_99, %c2_100, %c0_101] : memref<18x18x128xf32, #tpu.memory_space<vmem>>, vector<16x16x128xf32>
      %89 = vector.shape_cast %88 : vector<16x16x128xf32> to vector<256x128xf32>
      %c2_102 = arith.constant 2 : index
      %c2_103 = arith.constant 2 : index
      %c0_104 = arith.constant 0 : index
      %c0_105 = arith.constant 0 : index
      %90 = vector.load %arg7[%c2_102, %c2_103, %c0_104, %c0_105] : memref<3x3x128x128xf32, #tpu.memory_space<vmem>>, vector<1x1x128x128xf32>
      %91 = vector.shape_cast %90 : vector<1x1x128x128xf32> to vector<128x128xf32>
      %cst_106 = arith.constant dense<0.000000e+00> : vector<256x128xf32>
      %92 = tpu.matmul %89, %91, %cst_106 {dimension_numbers = #tpu.dot_dimension_numbers<[1], [0], [0], [1], [0, 0, 1, 1], [], []>} : vector<256x128xf32>, vector<128x128xf32>, vector<256x128xf32> -> vector<256x128xf32>
      %93 = arith.addf %87, %92 : vector<256x128xf32>
      %c0_107 = arith.constant 0 : index
      %c0_108 = arith.constant 0 : index
      %94 = vector.load %arg8[%c0_107, %c0_108] : memref<1x128xf32, #tpu.memory_space<vmem>>, vector<1x128xf32>
      %95 = vector.broadcast %94 : vector<1x128xf32> to vector<256x128xf32>
      %96 = arith.mulf %93, %95 : vector<256x128xf32>
      %c0_109 = arith.constant 0 : index
      %c0_110 = arith.constant 0 : index
      %97 = vector.load %arg9[%c0_109, %c0_110] : memref<1x128xf32, #tpu.memory_space<vmem>>, vector<1x128xf32>
      %98 = vector.broadcast %97 : vector<1x128xf32> to vector<256x128xf32>
      %99 = arith.addf %96, %98 : vector<256x128xf32>
      %cst_111 = arith.constant 0.000000e+00 : f32
      %100 = vector.broadcast %cst_111 : f32 to vector<256x128xf32>
      %101 = arith.maximumf %99, %100 : vector<256x128xf32>
      %c0_112 = arith.constant 0 : index
      %c0_113 = arith.constant 0 : index
      %102 = vector.load %arg15[%c0_112, %c0_113] : memref<256x128xf32, #tpu.memory_space<vmem>>, vector<256x128xf32>
      tpu.vector_store %arg15[%c0_112, %c0_113], %101 {strides = array<i32>} : memref<256x128xf32, #tpu.memory_space<vmem>>, vector<256x128xf32>,
    } else {
    }
    %c0 = arith.constant 0 : index
    %c0_1 = arith.constant 0 : index
    %3 = vector.load %arg15[%c0, %c0_1] : memref<256x128xf32, #tpu.memory_space<vmem>>, vector<256x128xf32>
    %c0_2 = arith.constant 0 : index
    %c0_3 = arith.constant 0 : index
    %4 = vector.load %arg10[%c0_2, %c0_3] : memref<128x128xf32, #tpu.memory_space<vmem>>, vector<128x128xf32>
    %cst = arith.constant dense<0.000000e+00> : vector<256x128xf32>
    %5 = tpu.matmul %3, %4, %cst {dimension_numbers = #tpu.dot_dimension_numbers<[1], [0], [0], [1], [0, 0, 1, 1], [], []>} : vector<256x128xf32>, vector<128x128xf32>, vector<256x128xf32> -> vector<256x128xf32>
    %c0_4 = arith.constant 0 : index
    %c0_5 = arith.constant 0 : index
    %6 = vector.load %arg11[%c0_4, %c0_5] : memref<1x128xf32, #tpu.memory_space<vmem>>, vector<1x128xf32>
    %7 = vector.broadcast %6 : vector<1x128xf32> to vector<256x128xf32>
    %8 = arith.mulf %5, %7 : vector<256x128xf32>
    %c0_6 = arith.constant 0 : index
    %c0_7 = arith.constant 0 : index
    %9 = vector.load %arg12[%c0_6, %c0_7] : memref<1x128xf32, #tpu.memory_space<vmem>>, vector<1x128xf32>
    %10 = vector.broadcast %9 : vector<1x128xf32> to vector<256x128xf32>
    %11 = arith.addf %8, %10 : vector<256x128xf32>
    %c0_8 = arith.constant 0 : index
    %c0_9 = arith.constant 0 : index
    %c0_10 = arith.constant 0 : index
    %c0_11 = arith.constant 0 : index
    %12 = vector.load %arg3[%c0_8, %c0_9, %c0_10, %c0_11] : memref<1x16x16x128xf32, #tpu.memory_space<vmem>>, vector<1x16x16x128xf32>
    %13 = vector.shape_cast %12 : vector<1x16x16x128xf32> to vector<16x16x128xf32>
    %14 = vector.shape_cast %13 : vector<16x16x128xf32> to vector<256x128xf32>
    %15 = arith.addf %11, %14 : vector<256x128xf32>
    %cst_12 = arith.constant 0.000000e+00 : f32
    %16 = vector.broadcast %cst_12 : f32 to vector<256x128xf32>
    %17 = arith.maximumf %15, %16 : vector<256x128xf32>
    %18 = vector.shape_cast %17 : vector<256x128xf32> to vector<16x16x128xf32>
    %c0_13 = arith.constant 0 : index
    %c0_14 = arith.constant 0 : index
    %c0_15 = arith.constant 0 : index
    %c0_16 = arith.constant 0 : index
    %19 = vector.load %arg13[%c0_13, %c0_14, %c0_15, %c0_16] : memref<1x16x16x128xf32, #tpu.memory_space<vmem>>, vector<1x16x16x128xf32>
    %20 = vector.shape_cast %19 : vector<1x16x16x128xf32> to vector<16x16x128xf32>
    %21 = vector.shape_cast %18 : vector<16x16x128xf32> to vector<1x16x16x128xf32>
    tpu.vector_store %arg13[%c0_13, %c0_14, %c0_15, %c0_16], %21 {strides = array<i32>} : memref<1x16x16x128xf32, #tpu.memory_space<vmem>>, vector<1x16x16x128xf32>,
    return
  }
  func.func @transform_0(%arg0: i32, %arg1: i32) -> (i32, i32, i32, i32) {
    %c0_i32 = arith.constant 0 : i32
    %c0_i32_0 = arith.constant 0 : i32
    %c0_i32_1 = arith.constant 0 : i32
    %c0_i32_2 = arith.constant 0 : i32
    return %arg0, %c0_i32, %c0_i32_0, %c0_i32_1 : i32, i32, i32, i32
  }
  func.func @transform_1(%arg0: i32, %arg1: i32) -> (i32, i32, i32, i32) {
    %c0_i32 = arith.constant 0 : i32
    %c0_i32_0 = arith.constant 0 : i32
    %c0_i32_1 = arith.constant 0 : i32
    return %arg0, %c0_i32, %c0_i32_0, %arg1 : i32, i32, i32, i32
  }
  func.func @transform_2(%arg0: i32, %arg1: i32) -> (i32, i32) {
    %c0_i32 = arith.constant 0 : i32
    %c0_i32_0 = arith.constant 0 : i32
    %c0_i32_1 = arith.constant 0 : i32
    return %c0_i32, %c0_i32_0 : i32, i32
  }
  func.func @transform_3(%arg0: i32, %arg1: i32) -> (i32, i32) {
    %c0_i32 = arith.constant 0 : i32
    %c0_i32_0 = arith.constant 0 : i32
    %c0_i32_1 = arith.constant 0 : i32
    return %c0_i32, %c0_i32_0 : i32, i32
  }
  func.func @transform_4(%arg0: i32, %arg1: i32) -> (i32, i32) {
    %c0_i32 = arith.constant 0 : i32
    %c0_i32_0 = arith.constant 0 : i32
    %c0_i32_1 = arith.constant 0 : i32
    return %c0_i32, %c0_i32_0 : i32, i32
  }
  func.func @transform_5(%arg0: i32, %arg1: i32) -> (i32, i32, i32, i32) {
    %c0_i32 = arith.constant 0 : i32
    %c0_i32_0 = arith.constant 0 : i32
    %c0_i32_1 = arith.constant 0 : i32
    %c0_i32_2 = arith.constant 0 : i32
    %c0_i32_3 = arith.constant 0 : i32
    return %c0_i32, %c0_i32_0, %c0_i32_1, %c0_i32_2 : i32, i32, i32, i32
  }
  func.func @transform_6(%arg0: i32, %arg1: i32) -> (i32, i32) {
    %c0_i32 = arith.constant 0 : i32
    %c0_i32_0 = arith.constant 0 : i32
    %c0_i32_1 = arith.constant 0 : i32
    return %c0_i32, %c0_i32_0 : i32, i32
  }
  func.func @transform_7(%arg0: i32, %arg1: i32) -> (i32, i32) {
    %c0_i32 = arith.constant 0 : i32
    %c0_i32_0 = arith.constant 0 : i32
    %c0_i32_1 = arith.constant 0 : i32
    return %c0_i32, %c0_i32_0 : i32, i32
  }
  func.func @transform_8(%arg0: i32, %arg1: i32) -> (i32, i32) {
    %c0_i32 = arith.constant 0 : i32
    %c0_i32_0 = arith.constant 0 : i32
    return %c0_i32, %arg1 : i32, i32
  }
  func.func @transform_9(%arg0: i32, %arg1: i32) -> (i32, i32) {
    %c0_i32 = arith.constant 0 : i32
    %c0_i32_0 = arith.constant 0 : i32
    return %c0_i32, %arg1 : i32, i32
  }
  func.func @transform_10(%arg0: i32, %arg1: i32) -> (i32, i32) {
    %c0_i32 = arith.constant 0 : i32
    %c0_i32_0 = arith.constant 0 : i32
    return %c0_i32, %arg1 : i32, i32
  }
  func.func @transform_11(%arg0: i32, %arg1: i32) -> (i32, i32, i32, i32) {
    %c0_i32 = arith.constant 0 : i32
    %c0_i32_0 = arith.constant 0 : i32
    %c0_i32_1 = arith.constant 0 : i32
    return %arg0, %c0_i32, %c0_i32_0, %arg1 : i32, i32, i32, i32
  }
}

</mosaic_0001>

<bundles_post_ra>
// kernel: tpu_custom_call.1
= control target key start
LH: loop header
LB: loop body
LE: loop exit
PB: predicated region body
PF: predicated region fallthrough
CT: control target
= control target key end

     0   :  { %s8272_s0 = inlined_call_operand.hbm [shape: f32[2,16,16,128], index: 0, kind: input, shape index: {}]   ;;  %s8273_s1 = inlined_call_operand.hbm [shape: f32[2,16,16,128], index: 1, kind: input, shape index: {}]   ;;  %s8274_s2 = inlined_call_operand.hbm [shape: f32[128,128], index: 2, kind: input, shape index: {}]   ;;  %s8275_s3 = inlined_call_operand.vmem [shape: f32[1,128], index: 3, kind: input, shape index: {}]   ;;  %s8276_s4 = inlined_call_operand.vmem [shape: f32[1,128], index: 4, kind: input, shape index: {}]   ;;  %s8277_s5 = inlined_call_operand.hbm [shape: f32[3,3,128,128], index: 5, kind: input, shape index: {}]   ;;  %s8278_s6 = inlined_call_operand.vmem [shape: f32[1,128], index: 6, kind: input, shape index: {}]   ;;  %s8279_s7 = inlined_call_operand.vmem [shape: f32[1,128], index: 7, kind: input, shape index: {}]   ;;  %s8280_s8 = inlined_call_operand.hbm [shape: f32[128,128], index: 8, kind: input, shape index: {}]   ;;  %s8281_s9 = inlined_call_operand.vmem [shape: f32[1,128], index: 9, kind: input, shape index: {}]   ;;  %s8282_s10 = inlined_call_operand.vmem [shape: f32[1,128], index: 10, kind: input, shape index: {}]   ;;  %s8283_s11 = inlined_call_operand.hbm [shape: f32[2,16,16,128], index: 11, kind: output, shape index: {}]  }
   0x1   :  { %8314 = sst [smem:[#allocation32_spill]] %s8272_s0 }
   0x2   :  { %8315 = sst [smem:[#allocation33_spill]] %s8274_s2 }
   0x3   :  { %8316 = sst [smem:[#allocation34_spill]] %s8277_s5 }
   0x4   :  { %8317 = sst [smem:[#allocation35_spill]] %s8279_s7 }
   0x5   :  { %8318 = sst [smem:[#allocation36_spill]] %s8281_s9 }
   0x6   :  { %8319 = sst [smem:[#allocation37_spill]] %s8282_s10 }
   0x7   :  { %8320 = sst [smem:[#allocation38_spill]] %s8283_s11 }
   0x8   :  { %16 = vsyncpa [#allocation5], 0 }
   0x9   :  { %18 = vsyncpa [#allocation5 + $0x1], 0 }
   0xa   :  { %19 = vsyncpa [#allocation8], 0 }
   0xb   :  { %21 = vsyncpa [#allocation8 + $0x1], 0 }
   0xc   :  { %22 = vsyncpa [#allocation11], 0 }
   0xd   :  { %23 = vsyncpa [#allocation6], 0 }
   0xe   :  { %25 = vsyncpa [#allocation6 + $0x1], 0  ;;  %s6985_s17 = smov 0   ;;  %s6987_s18 = smov 0  }
   0xf   :  { %s6989_s19 = smov 0   ;;  %s6991_s20 = smov 0  }
  0x10   :  { %s6993_s21 = smov 0   ;;  %s6995_s22 = smov 0  }
  0x11 LB: > { %8321 = sst [smem:[#allocation19_spill]] %s6892_s17  ;;  %s7016_s23 = sadd.s32 4294967295, %s6912_s22   ;;  %s6912_s22 = sphi %s6995_s22, %s31_s22   ;;  %s6908_s21 = sphi %s6993_s21, %s8379_s21   ;;  %s6904_s20 = sphi %s6991_s20, %s8378_s20   ;;  %s6900_s19 = sphi %s6989_s19, %s8377_s19   ;;  %s6896_s18 = sphi %s6987_s18, %s8376_s18   ;;  %s6892_s17 = sphi %s6985_s17, %s8375_s17  }
  0x12   : > { %8322 = sst [smem:[#allocation20_spill]] %s6904_s20  ;;  %s4503_s24 = sadd.s32 4294967294, %s6912_s22  }
  0x13   : > { %p63_p0 = scmp.ne.s32.totalorder %s6896_s18, %s6892_s17  ;;  %p8287_p1 = scmp.eq.s32.totalorder %s7016_s23, 0 }
  0x14   : > { %p327_p3 = scmp.eq.s32.totalorder %s4503_s24, 1  ;;  %p4504_p5 = scmp.ge.s32.totalorder %s6912_s22, 1 }
  0x15   : > { %p7025_p4 = por %p8287_p1, %p63_p0  ;;  %p334_p7 = scmp.lt.s32.totalorder %s6912_s22, 3 }
  0x16   : > { %p7030_p6 = por %p327_p3, %p63_p0  ;;  %s6914_s28 = smov [#allocation9]  }
  0x17   : > { %s8323_s25 = scalar_select %p7025_p4, 1, 0 }
  0x18   : > { %s8324_s26 = scalar_select %p7030_p6, 1, 0 }
  0x19   : > { %p7035_p8 = pnand %p4504_p5, %p334_p7  ;;  %s346_s29 = sshll.u32 %s6914_s28, 4  ;;  %s7039_s29 = int_to_ptr.vmem [resolvable:$true] %s346_s29 }
  0x1a   : > { %8325 = sst [smem:[#allocation21_spill]] %s8324_s26  ;;  %s6915_s12 = smov [#allocation10]  }
  0x1b   : > { %s8326_s27 = scalar_select %p7035_p8, 1, 0 }
  0x1c   : > { %p6588_p9 = pneg %p7035_p8  ;;  %s365_s13 = sshll.u32 %s6915_s12, 4  ;;  %s7050_s13 = int_to_ptr.vmem [resolvable:$true] %s365_s13 }
  0x1d   : > { %s6916_s14 = smov [#allocation12]   ;;  %s8328_s2 = sld [smem:[#allocation33_spill]] }
  0x1e   : > { %p7046_p11 = pnand %p6588_p9, %p8287_p1  ;;  %s7052_s15 = sshll.u32 %s6916_s14, 4  ;;  %s387_s15 = int_to_ptr.vmem [resolvable:$true] %s7052_s15 }
  0x20   : > { %p7062_p13 = pneg %p7046_p11 }
  0x23   : > { %s6674_s28 = scalar_lea.hbm %s8328_s2, 2048 }
  0x24   : > { %p6675_p12 = scmp.ne.s32.totalorder %s8328_s2, %s6674_s28  ;;  %p6681_p5 = scmp.lt.u32.totalorder %s6674_s28, %s8328_s2 }
  0x26   : > { %p6677_p0 = pnand %p7062_p13, %p6675_p12 }
  0x28   : > { %p6678_p3 = pneg %p6677_p0 }
  0x2a   : > { %p6683_p7 = pnand %p6681_p5, %p6678_p3 }
  0x2c   : > { %6686 = shalt.err (!%p6683_p7)
}
  0x2d   : > { %s6687_s17 = scalar_lea.vmem %s7039_s29, 2048  ;;  %p6695_p2 = scmp.lt.s32.totalorder %s7039_s29, %s7039_s29 }
  0x2e   : > { %p6688_p9 = scmp.ne.s32.totalorder %s7039_s29, %s6687_s17  ;;  %p6696_p6 = scmp.lt.s32.totalorder %s6687_s17, %s6687_s17 }
  0x30   : > { %p6690_p10 = pnand %p6688_p9, %p7062_p13  ;;  %p6697_p12 = por %p6696_p6, %p6695_p2 }
  0x32   : > { %p6691_p1 = pneg %p6690_p10 }
  0x34   : > { %p6698_p0 = pnand %p6697_p12, %p6691_p1 }
  0x36   : > { %6701 = shalt.err (!%p6698_p0)
}
  0x37   : > { %s8290_s26 = smov 128   ;;  %s8292_s16 = smov 8  }
  0x38   : > { %6591 = dma.hbm_to_vmem [thread:$0]  (!%p7046_p11), %s8328_s2, 2048, %s7039_s29, [#allocation8], %s8290_s26, %s8290_s26, %s8292_s16  }
  0x39   : > { %s8330_s5 = sld [smem:[#allocation34_spill]] }
  0x3f   : > { %s6702_s17 = scalar_lea.hbm %s8330_s5, 18432 }
  0x40   : > { %p6703_p1 = scmp.ne.s32.totalorder %s8330_s5, %s6702_s17  ;;  %p6709_p10 = scmp.lt.u32.totalorder %s6702_s17, %s8330_s5 }
  0x42   : > { %p6705_p2 = pnand %p6703_p1, %p7062_p13 }
  0x44   : > { %p6706_p6 = pneg %p6705_p2 }
  0x46   : > { %p6711_p3 = pnand %p6709_p10, %p6706_p6 }
  0x48   : > { %6714 = shalt.err (!%p6711_p3)
}
  0x49   : > { %s6715_s29 = scalar_lea.vmem %s7050_s13, 18432  ;;  %p6723_p12 = scmp.lt.s32.totalorder %s7050_s13, %s7050_s13 }
  0x4a   : > { %p6716_p5 = scmp.ne.s32.totalorder %s7050_s13, %s6715_s29  ;;  %p6724_p0 = scmp.lt.s32.totalorder %s6715_s29, %s6715_s29 }
  0x4c   : > { %p6718_p7 = pnand %p6716_p5, %p7062_p13  ;;  %p6725_p1 = por %p6724_p0, %p6723_p12 }
  0x4e   : > { %p6719_p9 = pneg %p6718_p7 }
  0x50   : > { %p6726_p2 = pnand %p6725_p1, %p6719_p9 }
  0x52   : > { %6729 = shalt.err (!%p6726_p2)
}
  0x53   : > { %6594 = dma.hbm_to_vmem [thread:$0]  (!%p7046_p11), %s8330_s5, 18432, %s7050_s13, [#allocation11], %s8290_s26, %s8290_s26, %s8292_s16  }
  0x54   : > { %s6730_s24 = scalar_lea.hbm %s8280_s8, 2048 }
  0x55   : > { %p6731_p6 = scmp.ne.s32.totalorder %s8280_s8, %s6730_s24  ;;  %p6737_p5 = scmp.lt.u32.totalorder %s6730_s24, %s8280_s8 }
  0x57   : > { %p6733_p10 = pnand %p6731_p6, %p7062_p13 }
  0x59   : > { %p6734_p3 = pneg %p6733_p10 }
  0x5b   : > { %p6739_p7 = pnand %p6737_p5, %p6734_p3 }
  0x5d   : > { %6742 = shalt.err (!%p6739_p7)
}
  0x5e   : > { %s6743_s29 = scalar_lea.vmem %s387_s15, 2048  ;;  %p6751_p1 = scmp.lt.s32.totalorder %s387_s15, %s387_s15 }
  0x5f   : > { %p6744_p9 = scmp.ne.s32.totalorder %s387_s15, %s6743_s29  ;;  %p6752_p2 = scmp.lt.s32.totalorder %s6743_s29, %s6743_s29 }
  0x61   : > { %p6746_p12 = pnand %p6744_p9, %p7062_p13  ;;  %p6753_p4 = por %p6752_p2, %p6751_p1 }
  0x63   : > { %p6747_p0 = pneg %p6746_p12 }
  0x65   : > { %p6754_p8 = pnand %p6753_p4, %p6747_p0 }
  0x67   : > { %6757 = shalt.err (!%p6754_p8)
}
  0x68   : > { %6597 = dma.hbm_to_vmem [thread:$0]  (!%p7046_p11), %s8280_s8, 2048, %s387_s15, [#allocation11], %s8290_s26, %s8290_s26, %s8292_s16  }
  0x69   : > { %s50_s11 = sadd.s32 1, %s6900_s19  ;;  %s43_s30 = sadd.s32 1, %s6908_s21 }
  0x6a   : > { %p57_p4 = scmp.ne.s32.totalorder %s6900_s19, %s6896_s18  ;;  %p45_p8 = scmp.ge.s32.totalorder %s43_s30, 2 }
  0x6b   : > { %p58_p13 = scmp.eq.s32.totalorder %s6912_s22, 0  ;;  %p8331_p6 = scmp.eq.s32.totalorder %s7016_s23, 1 }
  0x6c   : > { %p6612_p3 = scmp.lt.s32.totalorder %s6912_s22, 2  ;;  %s8381_s30 = smov (%p45_p8, %s43_s30), 0 }
  0x6d   : > { %p7141_p10 = por %p8331_p6, %p57_p4  ;;  %p59_p5 = por %p58_p13, %p57_p4 }
  0x6e   : > { %s412_s10 = sand.u32 1, %s6900_s19   ;;  %s47_s20 = ssub.s32 %s6908_s21, %s8381_s30 }
  0x6f   : > { %p48_p7 = scmp.eq.s32.totalorder %s47_s20, 0  ;;  %s4511_s15 = sshll.u32 %s412_s10, 8 }
  0x70   : > { %s4535_s24 = sshll.u32 %s6908_s21, 12  ;;  %s8333_s0 = sld [smem:[#allocation32_spill]] }
  0x71   : > { %s7153_s28 = scalar_select %p48_p7, %s6900_s19, %s50_s11  }
  0x72   : > { %s416_s29 = scalar_lea.vmem [#allocation4], %s4511_s15  ;;  %p7164_p11 = pnand %p6612_p3, %p59_p5 }
  0x73   : > { %s423_s13 = sshll.u32 %s416_s29, 4  ;;  %s7171_s12 = scalar_lea.hbm %s8273_s1, %s4535_s24  ;;  %s7160_s13 = int_to_ptr.vmem [resolvable:$true] %s423_s13 }
  0x74   : > { %s437_s14 = scalar_lea.vmem [#allocation7], %s4511_s15  ;;  %s7175_s16 = scalar_lea.sflag [#allocation5], %s412_s10 }
  0x75   : > { %s7173_s26 = sshll.u32 %s437_s14, 4  ;;  %p6760_p12 = pneg %p7164_p11  ;;  %s7207_s26 = int_to_ptr.vmem [resolvable:$true] %s7173_s26 }
  0x76   : > { %s7158_s17 = scalar_lea.hbm %s8333_s0, %s4535_s24  ;;  %s6763_s11 = scalar_lea.hbm %s8333_s0, 8192 }
  0x77   : > { %s6758_s29 = scalar_lea.hbm %s7158_s17, 4096  ;;  %p6764_p2 = scmp.lt.u32.totalorder %s7158_s17, %s8333_s0 }
  0x78   : > { %p6759_p9 = scmp.ne.s32.totalorder %s7158_s17, %s6758_s29  ;;  %p6765_p4 = scmp.lt.u32.totalorder %s6763_s11, %s6758_s29 }
  0x79   : > { %p6767_p13 = scmp.lt.u32.totalorder %s6758_s29, %s7158_s17 }
  0x7a   : > { %p6761_p0 = pnand %p6760_p12, %p6759_p9  ;;  %p6766_p8 = por %p6765_p4, %p6764_p2 }
  0x7c   : > { %p6762_p1 = pneg %p6761_p0  ;;  %p6768_p6 = por %p6767_p13, %p6766_p8 }
  0x7e   : > { %p6769_p3 = pnand %p6768_p6, %p6762_p1 }
  0x80   : > { %6772 = shalt.err (!%p6769_p3)
}
  0x81   : > { %s6773_s10 = scalar_lea.vmem %s7160_s13, 4096  ;;  %s6919_s2 = smov [#allocation4]  }
  0x82   : > { %p6774_p5 = scmp.ne.s32.totalorder %s7160_s13, %s6773_s10  ;;  %s6778_s5 = sshll.u32 %s6919_s2, 4  ;;  %s6779_s5 = int_to_ptr.vmem [resolvable:$false] %s6778_s5 }
  0x83   : > { %s6780_s15 = scalar_lea.vmem %s6779_s5, 8192  ;;  %p6781_p0 = scmp.lt.s32.totalorder %s7160_s13, %s6779_s5 }
  0x84   : > { %p6776_p7 = pnand %p6774_p5, %p6760_p12  ;;  %p6782_p2 = scmp.lt.s32.totalorder %s6780_s15, %s6773_s10 }
  0x86   : > { %p6777_p9 = pneg %p6776_p7  ;;  %p6783_p4 = por %p6782_p2, %p6781_p0 }
  0x88   : > { %p6784_p8 = pnand %p6783_p4, %p6777_p9 }
  0x8a   : > { %6787 = shalt.err (!%p6784_p8)
}
  0x8b   : > { %s8335_s14 = smov 8   ;;  %s8336_s29 = smov 128  }
  0x8c   : > { %6601 = dma.hbm_to_vmem [thread:$0]  (!%p7164_p11), %s7158_s17, 4096, %s7160_s13, %s7175_s16, %s8336_s29, %s8336_s29, %s8335_s14  }
  0x8d   : > { %s433_s11 = sand.u32 1, %s6912_s22   ;;  %s6788_s24 = scalar_lea.hbm %s7171_s12, 4096 }
  0x8e   : > { %s7210_s20 = scalar_lea.sflag [#allocation8], %s433_s11  ;;  %p6789_p1 = scmp.ne.s32.totalorder %s7171_s12, %s6788_s24 }
  0x8f   : > { %s6793_s5 = scalar_lea.hbm %s8273_s1, 8192  ;;  %p6794_p3 = scmp.lt.u32.totalorder %s7171_s12, %s8273_s1 }
  0x90   : > { %p6791_p13 = pnand %p6789_p1, %p6760_p12  ;;  %p6795_p5 = scmp.lt.u32.totalorder %s6793_s5, %s6788_s24 }
  0x91   : > { %p6797_p9 = scmp.lt.u32.totalorder %s6788_s24, %s7171_s12 }
  0x92   : > { %p6792_p6 = pneg %p6791_p13  ;;  %p6796_p7 = por %p6795_p5, %p6794_p3 }
  0x94   : > { %p6798_p0 = por %p6797_p9, %p6796_p7 }
  0x96   : > { %p6799_p2 = pnand %p6798_p0, %p6792_p6 }
  0x98   : > { %6802 = shalt.err (!%p6799_p2)
}
  0x99   : > { %s6803_s16 = scalar_lea.vmem %s7207_s26, 4096  ;;  %s6920_s17 = smov [#allocation7]  }
  0x9a   : > { %p6804_p4 = scmp.ne.s32.totalorder %s7207_s26, %s6803_s16  ;;  %s6808_s13 = sshll.u32 %s6920_s17, 4  ;;  %s6809_s13 = int_to_ptr.vmem [resolvable:$false] %s6808_s13 }
  0x9b   : > { %s6810_s0 = scalar_lea.vmem %s6809_s13, 8192  ;;  %p6811_p13 = scmp.lt.s32.totalorder %s7207_s26, %s6809_s13 }
  0x9c   : > { %p6806_p8 = pnand %p6804_p4, %p6760_p12  ;;  %p6812_p3 = scmp.lt.s32.totalorder %s6810_s0, %s6803_s16 }
  0x9e   : > { %p6807_p1 = pneg %p6806_p8  ;;  %p6813_p5 = por %p6812_p3, %p6811_p13 }
  0xa0   : > { %p6814_p7 = pnand %p6813_p5, %p6807_p1 }
  0xa2   : > { %6817 = shalt.err (!%p6814_p7)
}
  0xa3   : > { %6604 = dma.hbm_to_vmem [thread:$0]  (!%p7164_p11), %s7171_s12, 4096, %s7207_s26, %s7210_s20, %s8336_s29, %s8336_s29, %s8335_s14  }
  0xa4   : > { %p8337_p12 = scmp.ne.s32.totalorder %s8326_s27, 0 }
  0xa6   : > { %457 = sbr.rel (%p8337_p12) target bundleno = 1288 (0x508), region = 64 }
  0xad   : > { %s7242_s11 = sand.u32 1, %s6896_s18   ;;  %p8338_p6 = scmp.ne.s32.totalorder %s8323_s25, 0 }
  0xae   : > { %s7245_s24 = sshll.u32 %s7242_s11, 8  ;;  %s460_s7 = scalar_lea.sflag [#allocation5], %s7242_s11 }
  0xaf   : > { %s7249_s10 = scalar_lea.vmem [#allocation4], %s7245_s24 }
  0xb0   : > { %6871 = dma.done.wait (%p8338_p6), %s460_s7, 4096  }
  0xb1   : > { %6873 = vsyncadd (%p8338_p6), %s460_s7, 4294963200  ;;  %s468_s27 = sand.u32 1, %s7016_s23   ;;  %s7257_s12 = scalar_lea.vmem [#allocation7], %s7245_s24 }
  0xb2   : > { %s469_s26 = scalar_lea.sflag [#allocation8], %s468_s27 }
  0xb3   : > { %6875 = dma.done.wait (%p8338_p6), %s469_s26, 4096  }
  0xb4   : > { %6877 = vsyncadd (%p8338_p6), %s469_s26, 4294963200  ;;  %p8339_p11 = scmp.eq.s32.totalorder %s7016_s23, 0 }
  0xb6   : > { %6879 = dma.done.wait (%p8339_p11), [#allocation8], 2048   ;;  %p8340_p9 = pmov %p8339_p11 }
  0xb8   : > { %6881 = vsyncadd (%p8340_p9), [#allocation8], 4294965248  ;;  %p8341_p0 = pmov %p8340_p9 }
  0xba   : > { %6883 = dma.done.wait (%p8341_p0), [#allocation11], 20480   ;;  %p8342_p2 = pmov %p8341_p0 }
  0xbb   : > { %v576_v0 = vld [vmem:[#allocation9] sm:$0xff]  ;;  %v577_v1 = vld [vmem:[#allocation9 + $0x8] sm:$0xff]  ;;  %v578_v2 = vld [vmem:[#allocation9 + $0x10] sm:$0xff]  ;;  %s8365_s16 = sld [smem:[#allocation35_spill]]  ;;  %s8366_s0 = sld [smem:[#allocation36_spill]] }
  0xbc   : > { %6885 = vsyncadd (%p8342_p2), [#allocation11], 4294946816  ;;  %v5946_v3 = vpack.c.bf16 %v577_v1, %v576_v0  ;;  %v579_v4 = vld [vmem:[#allocation9 + $0x18] sm:$0xff]  ;;  %v580_v6 = vld [vmem:[#allocation9 + $0x20] sm:$0xff]  ;;  %s8367_s27 = sld [smem:[#allocation37_spill]]  ;;  %s8098_s26 = scalar_lea.vmem [#allocation13], %s7245_s24 }
  0xbd   : > { %v5950_v5 = vpack.c.bf16 %v579_v4, %v578_v2  ;;  %v581_v7 = vld [vmem:[#allocation9 + $0x28] sm:$0xff]  ;;  %v544_v9 = vld [vmem:[%s7249_s10] sm:$0xff]  ;;  %v582_v10 = vld [vmem:[#allocation9 + $0x30] sm:$0xff]  ;;  %s8368_s24 = sld [smem:[#allocation20_spill]]  ;;  %s4340_s25 = sshll.u32 %s8098_s26, 4  ;;  %s8221_s25 = int_to_ptr.vmem [resolvable:$true] %s4340_s25 }
  0xbe   : > { %5947 = vmatprep.subr.bf16.mxu0 %v5946_v3  ;;  %v5954_v8 = vpack.c.bf16 %v581_v7, %v580_v6  ;;  %v583_v11 = vld [vmem:[#allocation9 + $0x38] sm:$0xff]  ;;  %5098 = vmatprep.mubr.f32.mxu0 %v544_v9  ;;  %v584_v13 = vld [vmem:[#allocation9 + $0x40] sm:$0xff]  ;;  %v585_v14 = vld [vmem:[#allocation9 + $0x48] sm:$0xff]  ;;  %s8369_s20 = sld [smem:[#allocation38_spill]]  ;;  %s6818_s15 = scalar_lea.vmem %s8221_s25, 4096 }
  0xbf   : > { %5949 = vmatpush3.bf16.msra.mxu0 %v5946_v3  ;;  %v5958_v12 = vpack.c.bf16 %v583_v11, %v582_v10  ;;  %v5962_v15 = vpack.c.bf16 %v585_v14, %v584_v13  ;;  %v586_v16 = vld [vmem:[#allocation9 + $0x50] sm:$0xff]  ;;  %v587_v17 = vld [vmem:[#allocation9 + $0x58] sm:$0xff]  ;;  %v588_v19 = vld [vmem:[#allocation9 + $0x60] sm:$0xff]  ;;  %v6921_v13 = vmov 0.0   ;;  %p6819_p4 = scmp.ne.s32.totalorder %s8221_s25, %s6818_s15 }
  0xc0   : > { %5951 = vmatprep.subr.bf16.mxu0 %v5950_v5  ;;  %v5966_v18 = vpack.c.bf16 %v587_v17, %v586_v16  ;;  %v589_v20 = vld [vmem:[#allocation9 + $0x68] sm:$0xff]  ;;  %v590_v22 = vld [vmem:[#allocation9 + $0x70] sm:$0xff]  ;;  %v591_v23 = vld [vmem:[#allocation9 + $0x78] sm:$0xff]  ;;  %931 = vst [vmem:[#allocation2 + $0x20] sm:$0xff] %v6921_v13 }
  0xc1   : > { %v5970_v21 = vpack.c.bf16 %v589_v20, %v588_v19  ;;  %v5974_v24 = vpack.c.bf16 %v591_v23, %v590_v22  ;;  %v1095_v25 = vld [vmem:[#allocation10 + $0x80] sm:$0xff]  ;;  %v1096_v26 = vld [vmem:[#allocation10 + $0x88] sm:$0xff]  ;;  %v1097_v28 = vld [vmem:[#allocation10 + $0x90] sm:$0xff]  ;;  %932 = vst [vmem:[#allocation2 + $0x28] sm:$0x3] %v6921_v13  ;;  %p6820_p8 = pnand %p6819_p4, %p7141_p10 }
  0xc2   : > { %v5978_v27 = vpack.c.bf16 %v1096_v26, %v1095_v25  ;;  %v1098_v29 = vld [vmem:[#allocation10 + $0x98] sm:$0xff]  ;;  %v545_v30 = vld [vmem:[%s7249_s10 + $0x8] sm:$0xff]  ;;  %v546_v31 = vld [vmem:[%s7249_s10 + $0x10] sm:$0xff]  ;;  %927 = vst [vmem:[#allocation2] sm:$0xff] %v6921_v13 }
  0xc3   : > { %5953 = vmatpush3.bf16.msra.mxu0 %v5950_v5  ;;  %v5982_v32 = vpack.c.bf16 %v1098_v29, %v1097_v28  ;;  %v1099_v33 = vld [vmem:[#allocation10 + $0xa0] sm:$0xff]  ;;  %v1100_v34 = vld [vmem:[#allocation10 + $0xa8] sm:$0xff]  ;;  %v547_v35 = vld [vmem:[%s7249_s10 + $0x18] sm:$0xff]  ;;  %928 = vst [vmem:[#allocation2 + $0x8] sm:$0xff] %v6921_v13  ;;  %s4537_s23 = sshll.u32 %s8368_s24, 12  ;;  %p6821_p1 = pneg %p6820_p8 }
  0xc4   : > { %5955 = vmatprep.subr.bf16.mxu0 %v5954_v8  ;;  %v548_v36 = vld [vmem:[%s7249_s10 + $0x20] sm:$0xff]  ;;  %v5986_v37 = vpack.c.bf16 %v1100_v34, %v1099_v33  ;;  %v1101_v38 = vld [vmem:[#allocation10 + $0xb0] sm:$0xff]  ;;  %v1102_v39 = vld [vmem:[#allocation10 + $0xb8] sm:$0xff]  ;;  %929 = vst [vmem:[#allocation2 + $0x10] sm:$0x3] %v6921_v13  ;;  %s8370_s2 = smov %s8369_s20  ;;  %s8219_s5 = scalar_lea.hbm %s8369_s20, %s4537_s23 }
  0xc5   : > { %v549_v40 = vld [vmem:[%s7249_s10 + $0x28] sm:$0xff]  ;;  %v550_v41 = vld [vmem:[%s7249_s10 + $0x30] sm:$0xff]  ;;  %v5990_v42 = vpack.c.bf16 %v1102_v39, %v1101_v38  ;;  %v1103_v43 = vld [vmem:[#allocation10 + $0xc0] sm:$0xff]  ;;  %930 = vst [vmem:[#allocation2 + $0x18] sm:$0xff] %v6921_v13 }
  0xc6   : > { %v1104_v44 = vld [vmem:[#allocation10 + $0xc8] sm:$0xff]  ;;  %v551_v45 = vld [vmem:[%s7249_s10 + $0x38] sm:$0xff]  ;;  %v552_v46 = vld [vmem:[%s7249_s10 + $0x40] sm:$0xff]  ;;  %933 = vst [vmem:[#allocation2 + $0x30] sm:$0xff] %v6921_v13 }
  0xc7   : > { %5957 = vmatpush3.bf16.msra.mxu0 %v5954_v8  ;;  %v5994_v47 = vpack.c.bf16 %v1104_v44, %v1103_v43  ;;  %v553_v48 = vld [vmem:[%s7249_s10 + $0x48] sm:$0xff]  ;;  %v554_v49 = vld [vmem:[%s7249_s10 + $0x50] sm:$0xff]  ;;  %v555_v50 = vld [vmem:[%s7249_s10 + $0x58] sm:$0xff]  ;;  %934 = vst [vmem:[#allocation2 + $0x38] sm:$0xff] %v6921_v13 }
  0xc8   : > { %5959 = vmatprep.subr.bf16.mxu0 %v5958_v12  ;;  %v556_v51 = vld [vmem:[%s7249_s10 + $0x60] sm:$0xff]  ;;  %v557_v52 = vld [vmem:[%s7249_s10 + $0x68] sm:$0xff]  ;;  %v558_v53 = vld [vmem:[%s7249_s10 + $0x70] sm:$0xff]  ;;  %935 = vst [vmem:[#allocation2 + $0x40] sm:$0x3] %v6921_v13 }
  0xc9   : > { %v559_v54 = vld [vmem:[%s7249_s10 + $0x78] sm:$0xff]  ;;  %v560_v55 = vld [vmem:[%s7249_s10 + $0x80] sm:$0xff]  ;;  %v561_v56 = vld [vmem:[%s7249_s10 + $0x88] sm:$0xff]  ;;  %936 = vst [vmem:[#allocation2 + $0x48] sm:$0xff] %v6921_v13 }
  0xca   : > { %v562_v57 = vld [vmem:[%s7249_s10 + $0x90] sm:$0xff]  ;;  %v563_v58 = vld [vmem:[%s7249_s10 + $0x98] sm:$0xff]  ;;  %v564_v59 = vld [vmem:[%s7249_s10 + $0xa0] sm:$0xff]  ;;  %937 = vst [vmem:[#allocation2 + $0x50] sm:$0xff] %v6921_v13 }
  0xcb   : > { %5961 = vmatpush3.bf16.msra.mxu0 %v5958_v12  ;;  %v565_v60 = vld [vmem:[%s7249_s10 + $0xa8] sm:$0xff]  ;;  %v566_v61 = vld [vmem:[%s7249_s10 + $0xb0] sm:$0xff]  ;;  %v567_v62 = vld [vmem:[%s7249_s10 + $0xb8] sm:$0xff]  ;;  %938 = vst [vmem:[#allocation2 + $0x58] sm:$0x3] %v6921_v13 }
  0xcc   : > { %5963 = vmatprep.subr.bf16.mxu0 %v5962_v15  ;;  %v568_v63 = vld [vmem:[%s7249_s10 + $0xc0] sm:$0xff]  ;;  %v569_v0 = vld [vmem:[%s7249_s10 + $0xc8] sm:$0xff]  ;;  %v570_v1 = vld [vmem:[%s7249_s10 + $0xd0] sm:$0xff]  ;;  %939 = vst [vmem:[#allocation2 + $0x60] sm:$0xff] %v6921_v13 }
  0xcd   : > { %v571_v2 = vld [vmem:[%s7249_s10 + $0xd8] sm:$0xff]  ;;  %v572_v3 = vld [vmem:[%s7249_s10 + $0xe0] sm:$0xff]  ;;  %v573_v4 = vld [vmem:[%s7249_s10 + $0xe8] sm:$0xff]  ;;  %940 = vst [vmem:[#allocation2 + $0x68] sm:$0xff] %v6921_v13 }
  0xce   : > { %v574_v5 = vld [vmem:[%s7249_s10 + $0xf0] sm:$0xff]  ;;  %v575_v6 = vld [vmem:[%s7249_s10 + $0xf8] sm:$0xff]  ;;  %v1107_v10 = vld [vmem:[#allocation10 + $0xe0] sm:$0xff]  ;;  %941 = vst [vmem:[#allocation2 + $0x70] sm:$0x3] %v6921_v13 }
  0xcf   : > { %5965 = vmatpush3.bf16.msra.mxu0 %v5962_v15  ;;  %v1105_v7 = vld [vmem:[#allocation10 + $0xd0] sm:$0xff]  ;;  %v1106_v8 = vld [vmem:[#allocation10 + $0xd8] sm:$0xff]  ;;  %v1108_v11 = vld [vmem:[#allocation10 + $0xe8] sm:$0xff]  ;;  %942 = vst [vmem:[#allocation2 + $0x78] sm:$0xff] %v6921_v13 }
  0xd0   : > { %5967 = vmatprep.subr.bf16.mxu0 %v5966_v18  ;;  %v5998_v9 = vpack.c.bf16 %v1106_v8, %v1105_v7  ;;  %v6002_v12 = vpack.c.bf16 %v1108_v11, %v1107_v10  ;;  %943 = vst [vmem:[#allocation2 + $0x80] sm:$0xff] %v6921_v13  ;;  %944 = vst [vmem:[#allocation2 + $0x88] sm:$0x3] %v6921_v13  ;;  %v1109_v14 = vld [vmem:[#allocation10 + $0xf0] sm:$0xff]  ;;  %v1110_v15 = vld [vmem:[#allocation10 + $0xf8] sm:$0xff] }
  0xd1   : > { %945 = vst [vmem:[#allocation2 + $0x90] sm:$0xff] %v6921_v13  ;;  %946 = vst [vmem:[#allocation2 + $0x98] sm:$0xff] %v6921_v13  ;;  %v6006_v16 = vpack.c.bf16 %v1110_v15, %v1109_v14  ;;  %v1062_v17 = vld [vmem:[#allocation2 + $0x1] sm:$0xff]  ;;  %v1900_v19 = vld [vmem:[#allocation10 + $0x180] sm:$0xff] }
  0xd2   : > { %947 = vst [vmem:[#allocation2 + $0xa0] sm:$0x3] %v6921_v13  ;;  %948 = vst [vmem:[#allocation2 + $0xa8] sm:$0xff] %v6921_v13  ;;  %v1901_v20 = vld [vmem:[#allocation10 + $0x188] sm:$0xff]  ;;  %v1902_v22 = vld [vmem:[#allocation10 + $0x190] sm:$0xff] }
  0xd3   : > { %5969 = vmatpush3.bf16.msra.mxu0 %v5966_v18  ;;  %949 = vst [vmem:[#allocation2 + $0xb0] sm:$0xff] %v6921_v13  ;;  %950 = vst [vmem:[#allocation2 + $0xb8] sm:$0x3] %v6921_v13  ;;  %v1063_v18 = vld [vmem:[#allocation2 + $0x9] sm:$0xff]  ;;  %v1905_v26 = vld [vmem:[#allocation10 + $0x1a8] sm:$0xff] }
  0xd4   : > { %5971 = vmatprep.subr.bf16.mxu0 %v5970_v21  ;;  %951 = vst [vmem:[#allocation2 + $0xc0] sm:$0xff] %v6921_v13  ;;  %952 = vst [vmem:[#allocation2 + $0xc8] sm:$0xff] %v6921_v13  ;;  %v1903_v23 = vld [vmem:[#allocation10 + $0x198] sm:$0xff]  ;;  %v1904_v25 = vld [vmem:[#allocation10 + $0x1a0] sm:$0xff] }
  0xd5   : > { %953 = vst [vmem:[#allocation2 + $0xd0] sm:$0x3] %v6921_v13  ;;  %954 = vst [vmem:[#allocation2 + $0xd8] sm:$0xff] %v6921_v13  ;;  %v1906_v28 = vld [vmem:[#allocation10 + $0x1b0] sm:$0xff]  ;;  %v1907_v29 = vld [vmem:[#allocation10 + $0x1b8] sm:$0xff] }
  0xd6   : > { %955 = vst [vmem:[#allocation2 + $0xe0] sm:$0xff] %v6921_v13  ;;  %956 = vst [vmem:[#allocation2 + $0xe8] sm:$0x3] %v6921_v13  ;;  %v1910_v34 = vld [vmem:[#allocation10 + $0x1d0] sm:$0xff]  ;;  %v1047_v38 = vld [vmem:[#allocation10 + $0x8] sm:$0xff] }
  0xd7   : > { %5973 = vmatpush3.bf16.msra.mxu0 %v5970_v21  ;;  %957 = vst [vmem:[#allocation2 + $0xf0] sm:$0xff] %v6921_v13  ;;  %958 = vst [vmem:[#allocation2 + $0xf8] sm:$0xff] %v6921_v13  ;;  %v7357_v21 = vpack.c.bf16 %v1901_v20, %v1900_v19  ;;  %v1049_v44 = vld [vmem:[#allocation10 + $0x18] sm:$0xff]  ;;  %v1595_v7 = vld [vmem:[#allocation10 + $0x108] sm:$0xff] }
  0xd8   : > { %5975 = vmatprep.subr.bf16.mxu0 %v5974_v24  ;;  %959 = vst [vmem:[#allocation2 + $0x100] sm:$0x3] %v6921_v13  ;;  %960 = vst [vmem:[#allocation2 + $0x108] sm:$0xff] %v6921_v13  ;;  %v7403_v11 = vld [vmem:[%s8276_s4] ss:$0 sm:$0xff] }
  0xd9   : > { %961 = vst [vmem:[#allocation2 + $0x110] sm:$0xff] %v6921_v13  ;;  %962 = vst [vmem:[#allocation2 + $0x118] sm:$0x3] %v6921_v13  ;;  %6298 = vmatprep.subr.bf16.mxu1 %v7357_v21 }
  0xda   : > { %963 = vst [vmem:[#allocation2 + $0x120] sm:$0xff] %v6921_v13  ;;  %964 = vst [vmem:[#allocation2 + $0x128] sm:$0xff] %v6921_v13  ;;  %6306 = vmatpush3.bf16.msra.mxu1 %v7357_v21 }
  0xdb   : > { %5977 = vmatpush3.bf16.msra.mxu0 %v5974_v24  ;;  %965 = vst [vmem:[#allocation2 + $0x130] sm:$0x3] %v6921_v13  ;;  %966 = vst [vmem:[#allocation2 + $0x138] sm:$0xff] %v6921_v13  ;;  %v7361_v24 = vpack.c.bf16 %v1903_v23, %v1902_v22 }
  0xdc   : > { %5979 = vmatprep.subr.bf16.mxu0 %v5978_v27  ;;  %967 = vst [vmem:[#allocation2 + $0x140] sm:$0xff] %v6921_v13  ;;  %968 = vst [vmem:[#allocation2 + $0x148] sm:$0x3] %v6921_v13 }
  0xdd   : > { %969 = vst [vmem:[#allocation2 + $0x150] sm:$0xff] %v6921_v13  ;;  %970 = vst [vmem:[#allocation2 + $0x158] sm:$0xff] %v6921_v13  ;;  %6299 = vmatprep.subr.bf16.mxu1 %v7361_v24 }
  0xde   : > { %5099 = vmatmul.mubr.f32.vlgmr.msra.gmra.mrb[0].mxu0 %v545_v30  ;;  %971 = vst [vmem:[#allocation2 + $0x160] sm:$0x3] %v6921_v13  ;;  %972 = vst [vmem:[#allocation2 + $0x168] sm:$0xff] %v6921_v13  ;;  %6307 = vmatpush3.bf16.msra.mxu1 %v7361_v24  ;;  %v7369_v30 = vpack.c.bf16 %v1907_v29, %v1906_v28 }
  0xdf   : > { %5101 = vmatprep.mubr.f32.mxu0 %v546_v31  ;;  %5981 = vmatpush3.bf16.msra.mxu0 %v5978_v27  ;;  %973 = vst [vmem:[#allocation2 + $0x170] sm:$0xff] %v6921_v13  ;;  %974 = vst [vmem:[#allocation2 + $0x178] sm:$0x3] %v6921_v13  ;;  %v7365_v27 = vpack.c.bf16 %v1905_v26, %v1904_v25  ;;  %v1908_v31 = vld [vmem:[#allocation10 + $0x1c0] sm:$0xff] }
  0xe0   : > { %5983 = vmatprep.subr.bf16.mxu0 %v5982_v32  ;;  %975 = vst [vmem:[#allocation2 + $0x180] sm:$0xff] %v6921_v13  ;;  %976 = vst [vmem:[#allocation2 + $0x188] sm:$0xff] %v6921_v13 }
  0xe1   : > { %977 = vst [vmem:[#allocation2 + $0x190] sm:$0x3] %v6921_v13  ;;  %978 = vst [vmem:[#allocation2 + $0x198] sm:$0xff] %v6921_v13  ;;  %6300 = vmatprep.subr.bf16.mxu1 %v7365_v27 }
  0xe2   : > { %5102 = vmatmul.mubr.f32.gmra.mrb[2].mxu0 %v547_v35  ;;  %979 = vst [vmem:[#allocation2 + $0x1a0] sm:$0xff] %v6921_v13  ;;  %980 = vst [vmem:[#allocation2 + $0x1a8] sm:$0x3] %v6921_v13  ;;  %6308 = vmatpush3.bf16.msra.mxu1 %v7365_v27  ;;  %v1911_v35 = vld [vmem:[#allocation10 + $0x1d8] sm:$0xff] }
  0xe3   : > { %5104 = vmatprep.mubr.f32.mxu0 %v548_v36  ;;  %5985 = vmatpush3.bf16.msra.mxu0 %v5982_v32  ;;  %8343 = vst [vmem:[#allocation22_spill] sm:$0xff] %v7369_v30  ;;  %v1909_v32 = vld [vmem:[#allocation10 + $0x1c8] sm:$0xff]  ;;  %v1046_v36 = vld [vmem:[#allocation10] sm:$0xff] }
  0xe4   : > { %5987 = vmatprep.subr.bf16.mxu0 %v5986_v37  ;;  %6301 = vmatprep.subr.bf16.mxu1 %v7369_v30  ;;  %v7373_v33 = vpack.c.bf16 %v1909_v32, %v1908_v31  ;;  %v6010_v39 = vpack.c.bf16 %v1047_v38, %v1046_v36 }
  0xe6   : > { %5105 = vmatmul.mubr.f32.gmra.mrb[4].mxu0 %v549_v40  ;;  %6309 = vmatpush3.bf16.msra.mxu1 %v7369_v30  ;;  %8344 = vst [vmem:[#allocation23_spill] sm:$0xff] %v7373_v33  ;;  %v1912_v40 = vld [vmem:[#allocation10 + $0x1e0] sm:$0xff]  ;;  %v2514_v30 = vld [vmem:[#allocation10 + $0x290] sm:$0xff] }
  0xe7   : > { %5107 = vmatprep.mubr.f32.mxu0 %v550_v41  ;;  %5989 = vmatpush3.bf16.msra.mxu0 %v5986_v37  ;;  %v7377_v37 = vpack.c.bf16 %v1911_v35, %v1910_v34  ;;  %v1913_v41 = vld [vmem:[#allocation10 + $0x1e8] sm:$0xff] }
  0xe8   : > { %5991 = vmatprep.subr.bf16.mxu0 %v5990_v42  ;;  %6302 = vmatprep.subr.bf16.mxu1 %v7373_v33  ;;  %v7381_v43 = vpack.c.bf16 %v1913_v41, %v1912_v40 }
  0xe9   : > { %8345 = vst [vmem:[#allocation24_spill] sm:$0xff] %v7377_v37 }
  0xea   : > { %5108 = vmatmul.mubr.f32.gmra.mrb[6].mxu0 %v551_v45  ;;  %6310 = vmatpush3.bf16.msra.mxu1 %v7373_v33  ;;  %8346 = vst [vmem:[#allocation25_spill] sm:$0xff] %v7381_v43 }
  0xeb   : > { %5110 = vmatprep.mubr.f32.mxu0 %v552_v46  ;;  %5993 = vmatpush3.bf16.msra.mxu0 %v5990_v42  ;;  %v1048_v42 = vld [vmem:[#allocation10 + $0x10] sm:$0xff] }
  0xec   : > { %5995 = vmatprep.subr.bf16.mxu0 %v5994_v47  ;;  %6303 = vmatprep.subr.bf16.mxu1 %v7377_v37  ;;  %v6014_v45 = vpack.c.bf16 %v1049_v44, %v1048_v42  ;;  %v1914_v46 = vld [vmem:[#allocation10 + $0x1f0] sm:$0xff] }
  0xee   : > { %5111 = vmatmul.mubr.f32.gmra.mrb[8].mxu0 %v553_v48  ;;  %6311 = vmatpush3.bf16.msra.mxu1 %v7377_v37  ;;  %v1050_v48 = vld [vmem:[#allocation10 + $0x20] sm:$0xff]  ;;  %v1599_v37 = vld [vmem:[#allocation10 + $0x128] sm:$0xff] }
  0xef   : > { %5113 = vmatprep.mubr.f32.mxu0 %v554_v49  ;;  %5997 = vmatpush3.bf16.msra.mxu0 %v5994_v47  ;;  %v1915_v47 = vld [vmem:[#allocation10 + $0x1f8] sm:$0xff] }
  0xf0   : > { %5999 = vmatprep.subr.bf16.mxu0 %v5998_v9  ;;  %6304 = vmatprep.subr.bf16.mxu1 %v7381_v43  ;;  %v7385_v49 = vpack.c.bf16 %v1915_v47, %v1914_v46 }
  0xf2   : > { %5114 = vmatmul.mubr.f32.gmra.mrb[10].mxu0 %v555_v50  ;;  %6312 = vmatpush3.bf16.msra.mxu1 %v7381_v43  ;;  %8347 = vst [vmem:[#allocation26_spill] sm:$0xff] %v7385_v49  ;;  %v1051_v50 = vld [vmem:[#allocation10 + $0x28] sm:$0xff] }
  0xf3   : > { %5116 = vmatprep.mubr.f32.mxu0 %v556_v51  ;;  %6001 = vmatpush3.bf16.msra.mxu0 %v5998_v9  ;;  %v6018_v51 = vpack.c.bf16 %v1051_v50, %v1050_v48  ;;  %v7398_v9 = vld [vmem:[%s8275_s3] ss:$0 sm:$0xff] }
  0xf4   : > { %6003 = vmatprep.subr.bf16.mxu0 %v6002_v12  ;;  %6305 = vmatprep.subr.bf16.mxu1 %v7385_v49 }
  0xf6   : > { %5117 = vmatmul.mubr.f32.gmra.mrb[12].mxu0 %v557_v52  ;;  %6313 = vmatpush3.bf16.msra.mxu1 %v7385_v49  ;;  %v2206_v52 = vld [vmem:[#allocation10 + $0x200] sm:$0xff]  ;;  %v2221_v49 = vld [vmem:[#allocation10 + $0x278] sm:$0xff] }
  0xf7   : > { %5119 = vmatprep.mubr.f32.mxu0 %v558_v53  ;;  %6005 = vmatpush3.bf16.msra.mxu0 %v6002_v12  ;;  %v2207_v53 = vld [vmem:[#allocation10 + $0x208] sm:$0xff] }
  0xf8   : > { %6007 = vmatprep.subr.bf16.mxu0 %v6006_v16 }
  0xfa   : > { %5120 = vmatmul.mubr.f32.gmra.mrb[14].mxu0 %v559_v54  ;;  %v1052_v54 = vld [vmem:[#allocation10 + $0x30] sm:$0xff] }
  0xfb   : > { %5122 = vmatprep.mubr.f32.mxu0 %v560_v55  ;;  %6009 = vmatpush3.bf16.msra.mxu0 %v6006_v16  ;;  %v7389_v55 = vpack.c.bf16 %v2207_v53, %v2206_v52 }
  0xfc   : > { %6011 = vmatprep.subr.bf16.mxu0 %v6010_v39 }
  0xfd   : > { %6107 = vmatprep.subr.bf16.mxu1 %v7389_v55 }
  0xfe   : > { %5123 = vmatmul.mubr.f32.gmra.mrb[16].mxu0 %v561_v56  ;;  %v1053_v56 = vld [vmem:[#allocation10 + $0x38] sm:$0xff] }
  0xff   : > { %5125 = vmatprep.mubr.f32.mxu0 %v562_v57  ;;  %v6022_v57 = vpack.c.bf16 %v1053_v56, %v1052_v54 }
 0x102   : > { %5126 = vmatmul.mubr.f32.gmra.mrb[18].mxu0 %v563_v58  ;;  %v1054_v58 = vld [vmem:[#allocation10 + $0x40] sm:$0xff] }
 0x103   : > { %5128 = vmatprep.mubr.f32.mxu0 %v564_v59  ;;  %v1055_v59 = vld [vmem:[#allocation10 + $0x48] sm:$0xff] }
 0x106   : > { %5129 = vmatmul.mubr.f32.gmra.mrb[20].mxu0 %v565_v60  ;;  %v6026_v60 = vpack.c.bf16 %v1055_v59, %v1054_v58 }
 0x107   : > { %5131 = vmatprep.mubr.f32.mxu0 %v566_v61  ;;  %v1056_v61 = vld [vmem:[#allocation10 + $0x50] sm:$0xff] }
 0x10a   : > { %5132 = vmatmul.mubr.f32.gmra.mrb[22].mxu0 %v567_v62  ;;  %v1057_v62 = vld [vmem:[#allocation10 + $0x58] sm:$0xff] }
 0x10b   : > { %5134 = vmatprep.mubr.f32.mxu0 %v568_v63  ;;  %v6030_v63 = vpack.c.bf16 %v1057_v62, %v1056_v61 }
 0x10e   : > { %5135 = vmatmul.mubr.f32.gmra.mrb[24].mxu0 %v569_v0  ;;  %v1058_v0 = vld [vmem:[#allocation10 + $0x60] sm:$0xff] }
 0x10f   : > { %5137 = vmatprep.mubr.f32.mxu0 %v570_v1  ;;  %v1059_v1 = vld [vmem:[#allocation10 + $0x68] sm:$0xff] }
 0x112   : > { %5138 = vmatmul.mubr.f32.gmra.mrb[26].mxu0 %v571_v2  ;;  %v6034_v2 = vpack.c.bf16 %v1059_v1, %v1058_v0 }
 0x113   : > { %5140 = vmatprep.mubr.f32.mxu0 %v572_v3  ;;  %v1060_v3 = vld [vmem:[#allocation10 + $0x70] sm:$0xff] }
 0x116   : > { %5141 = vmatmul.mubr.f32.gmra.mrb[28].mxu0 %v573_v4  ;;  %v1061_v4 = vld [vmem:[#allocation10 + $0x78] sm:$0xff] }
 0x117   : > { %5143 = vmatprep.mubr.f32.mxu0 %v574_v5  ;;  %v6038_v5 = vpack.c.bf16 %v1061_v4, %v1060_v3 }
 0x11a   : > { %5144 = vmatmul.mubr.f32.gmra.mrb[30].mxu0 %v575_v6  ;;  %v1594_v6 = vld [vmem:[#allocation10 + $0x100] sm:$0xff] }
 0x11b   : > { %5178 = vmatprep.mubr.f32.mxu0 %v1062_v17  ;;  %v7392_v8 = vpack.c.bf16 %v1595_v7, %v1594_v6 }
 0x11e   : > { %5179 = vmatmul.mubr.f32.vlgmr.msra.gmra.mrb[32].mxu0 %v1063_v18 }
 0x11f   : > { %6013 = vmatpush3.bf16.msra.mxu0 %v6010_v39 }
 0x120   : > { %6015 = vmatprep.subr.bf16.mxu0 %v6014_v45 }
 0x123   : > { %6017 = vmatpush3.bf16.msra.mxu0 %v6014_v45 }
 0x124   : > { %6019 = vmatprep.subr.bf16.mxu0 %v6018_v51 }
 0x127   : > { %6021 = vmatpush3.bf16.msra.mxu0 %v6018_v51 }
 0x128   : > { %6023 = vmatprep.subr.bf16.mxu0 %v6022_v57 }
 0x12b   : > { %6025 = vmatpush3.bf16.msra.mxu0 %v6022_v57 }
 0x12c   : > { %6027 = vmatprep.subr.bf16.mxu0 %v6026_v60 }
 0x12f   : > { %6029 = vmatpush3.bf16.msra.mxu0 %v6026_v60 }
 0x130   : > { %6031 = vmatprep.subr.bf16.mxu0 %v6030_v63 }
 0x133   : > { %6033 = vmatpush3.bf16.msra.mxu0 %v6030_v63 }
 0x134   : > { %6035 = vmatprep.subr.bf16.mxu0 %v6034_v2 }
 0x137   : > { %6037 = vmatpush3.bf16.msra.mxu0 %v6034_v2 }
 0x138   : > { %6039 = vmatprep.subr.bf16.mxu0 %v6038_v5 }
 0x13b   : > { %6041 = vmatpush3.bf16.msra.mxu0 %v6038_v5 }
 0x13c   : > { %6043 = vmatprep.subr.bf16.mxu0 %v7392_v8 }
 0x1b1   : > { %v5100_v10 = vpop.f32.mrb[0].mxu0 }
 0x1b2   : > { %v825_v12 = vmul.f32 %v5100_v10, %v7398_v9  ;;  %v658_v14 = vpop.f32.mrb[1].mxu0 }
 0x1b3   : > { %v824_v15 = vmul.f32 %v7398_v9, %v658_v14 }
 0x1b4   : > { %v864_v16 = vadd.f32 %v7403_v11, %v825_v12 }
 0x1b5   : > { %v863_v17 = vadd.f32 %v7403_v11, %v824_v15  ;;  %v5103_v18 = vpop.f32.mrb[2].mxu0 }
 0x1b6   : > { %v7409_v19 = vmax.f32 %v864_v16, 0.0  ;;  %v827_v20 = vmul.f32 %v5103_v18, %v7398_v9  ;;  %v668_v22 = vpop.f32.mrb[3].mxu0 }
 0x1b7   : > { %v7412_v23 = vmax.f32 %v863_v17, 0.0  ;;  %v826_v25 = vmul.f32 %v7398_v9, %v668_v22 }
 0x1b8   : > { %983 = vst [vmem:[#allocation2 + $0x21] sm:$0xff] %v7409_v19  ;;  %v866_v26 = vadd.f32 %v7403_v11, %v827_v20 }
 0x1b9   : > { %982 = vst [vmem:[#allocation2 + $0x19] sm:$0xff] %v7412_v23  ;;  %v865_v28 = vadd.f32 %v7403_v11, %v826_v25  ;;  %v5106_v29 = vpop.f32.mrb[4].mxu0  ;;  %5181 = vmatprep.mubr.f32.mxu0 %v7412_v23 }
 0x1ba   : > { %v7420_v31 = vmax.f32 %v866_v26, 0.0  ;;  %v829_v32 = vmul.f32 %v5106_v29, %v7398_v9  ;;  %v678_v34 = vpop.f32.mrb[5].mxu0  ;;  %5182 = vmatmul.mubr.f32.gmra.mrb[34].mxu0 %v7409_v19 }
 0x1bb   : > { %v7424_v35 = vmax.f32 %v865_v28, 0.0  ;;  %v828_v36 = vmul.f32 %v7398_v9, %v678_v34 }
 0x1bc   : > { %985 = vst [vmem:[#allocation2 + $0x39] sm:$0xff] %v7420_v31  ;;  %v868_v38 = vadd.f32 %v7403_v11, %v829_v32 }
 0x1bd   : > { %984 = vst [vmem:[#allocation2 + $0x31] sm:$0xff] %v7424_v35  ;;  %v867_v39 = vadd.f32 %v7403_v11, %v828_v36  ;;  %v5109_v40 = vpop.f32.mrb[6].mxu0  ;;  %5184 = vmatprep.mubr.f32.mxu0 %v7424_v35 }
 0x1be   : > { %v7432_v41 = vmax.f32 %v868_v38, 0.0  ;;  %v831_v42 = vmul.f32 %v5109_v40, %v7398_v9  ;;  %v688_v44 = vpop.f32.mrb[7].mxu0  ;;  %5185 = vmatmul.mubr.f32.gmra.mrb[36].mxu0 %v7420_v31 }
 0x1bf   : > { %v7436_v45 = vmax.f32 %v867_v39, 0.0  ;;  %v830_v46 = vmul.f32 %v7398_v9, %v688_v44 }
 0x1c0   : > { %987 = vst [vmem:[#allocation2 + $0x51] sm:$0xff] %v7432_v41  ;;  %v870_v47 = vadd.f32 %v7403_v11, %v831_v42 }
 0x1c1   : > { %986 = vst [vmem:[#allocation2 + $0x49] sm:$0xff] %v7436_v45  ;;  %v869_v48 = vadd.f32 %v7403_v11, %v830_v46  ;;  %v5112_v50 = vpop.f32.mrb[8].mxu0  ;;  %5187 = vmatprep.mubr.f32.mxu0 %v7436_v45 }
 0x1c2   : > { %v7444_v51 = vmax.f32 %v870_v47, 0.0  ;;  %v833_v52 = vmul.f32 %v5112_v50, %v7398_v9  ;;  %v698_v53 = vpop.f32.mrb[9].mxu0  ;;  %5188 = vmatmul.mubr.f32.gmra.mrb[38].mxu0 %v7432_v41 }
 0x1c3   : > { %v7448_v54 = vmax.f32 %v869_v48, 0.0  ;;  %v832_v56 = vmul.f32 %v7398_v9, %v698_v53 }
 0x1c4   : > { %989 = vst [vmem:[#allocation2 + $0x69] sm:$0xff] %v7444_v51  ;;  %v872_v57 = vadd.f32 %v7403_v11, %v833_v52 }
 0x1c5   : > { %988 = vst [vmem:[#allocation2 + $0x61] sm:$0xff] %v7448_v54  ;;  %v871_v58 = vadd.f32 %v7403_v11, %v832_v56  ;;  %v5115_v59 = vpop.f32.mrb[10].mxu0  ;;  %5190 = vmatprep.mubr.f32.mxu0 %v7448_v54 }
 0x1c6   : > { %v7456_v60 = vmax.f32 %v872_v57, 0.0  ;;  %v835_v61 = vmul.f32 %v5115_v59, %v7398_v9  ;;  %v708_v62 = vpop.f32.mrb[11].mxu0  ;;  %5191 = vmatmul.mubr.f32.gmra.mrb[40].mxu0 %v7444_v51 }
 0x1c7   : > { %v7460_v63 = vmax.f32 %v871_v58, 0.0  ;;  %v834_v0 = vmul.f32 %v7398_v9, %v708_v62 }
 0x1c8   : > { %991 = vst [vmem:[#allocation2 + $0x81] sm:$0xff] %v7456_v60  ;;  %v874_v1 = vadd.f32 %v7403_v11, %v835_v61 }
 0x1c9   : > { %990 = vst [vmem:[#allocation2 + $0x79] sm:$0xff] %v7460_v63  ;;  %v873_v2 = vadd.f32 %v7403_v11, %v834_v0  ;;  %v5118_v3 = vpop.f32.mrb[12].mxu0  ;;  %5193 = vmatprep.mubr.f32.mxu0 %v7460_v63 }
 0x1ca   : > { %v7468_v4 = vmax.f32 %v874_v1, 0.0  ;;  %v837_v5 = vmul.f32 %v5118_v3, %v7398_v9  ;;  %v718_v6 = vpop.f32.mrb[13].mxu0  ;;  %5194 = vmatmul.mubr.f32.gmra.mrb[42].mxu0 %v7456_v60  ;;  %v2208_v3 = vld [vmem:[#allocation10 + $0x210] sm:$0xff] }
 0x1cb   : > { %v7472_v7 = vmax.f32 %v873_v2, 0.0  ;;  %v836_v10 = vmul.f32 %v7398_v9, %v718_v6 }
 0x1cc   : > { %993 = vst [vmem:[#allocation2 + $0x99] sm:$0xff] %v7468_v4  ;;  %v876_v12 = vadd.f32 %v7403_v11, %v837_v5  ;;  %v2209_v5 = vld [vmem:[#allocation10 + $0x218] sm:$0xff] }
 0x1cd   : > { %992 = vst [vmem:[#allocation2 + $0x91] sm:$0xff] %v7472_v7  ;;  %v875_v14 = vadd.f32 %v7403_v11, %v836_v10  ;;  %v5121_v15 = vpop.f32.mrb[14].mxu0  ;;  %5196 = vmatprep.mubr.f32.mxu0 %v7472_v7 }
 0x1ce   : > { %v7480_v16 = vmax.f32 %v876_v12, 0.0  ;;  %v839_v17 = vmul.f32 %v5121_v15, %v7398_v9  ;;  %v728_v18 = vpop.f32.mrb[15].mxu0  ;;  %5197 = vmatmul.mubr.f32.gmra.mrb[44].mxu0 %v7468_v4 }
 0x1cf   : > { %v7484_v20 = vmax.f32 %v875_v14, 0.0  ;;  %v838_v22 = vmul.f32 %v7398_v9, %v728_v18 }
 0x1d0   : > { %995 = vst [vmem:[#allocation2 + $0xb1] sm:$0xff] %v7480_v16  ;;  %v878_v25 = vadd.f32 %v7403_v11, %v839_v17 }
 0x1d1   : > { %994 = vst [vmem:[#allocation2 + $0xa9] sm:$0xff] %v7484_v20  ;;  %v877_v26 = vadd.f32 %v7403_v11, %v838_v22  ;;  %v5124_v28 = vpop.f32.mrb[16].mxu0  ;;  %5199 = vmatprep.mubr.f32.mxu0 %v7484_v20 }
 0x1d2   : > { %v7492_v29 = vmax.f32 %v878_v25, 0.0  ;;  %v841_v32 = vmul.f32 %v5124_v28, %v7398_v9  ;;  %v738_v34 = vpop.f32.mrb[17].mxu0  ;;  %5200 = vmatmul.mubr.f32.gmra.mrb[46].mxu0 %v7480_v16  ;;  %v6110_v25 = vpack.c.bf16 %v2209_v5, %v2208_v3 }
 0x1d3   : > { %v7496_v36 = vmax.f32 %v877_v26, 0.0  ;;  %v840_v38 = vmul.f32 %v7398_v9, %v738_v34  ;;  %v2211_v34 = vld [vmem:[#allocation10 + $0x228] sm:$0xff] }
 0x1d4   : > { %997 = vst [vmem:[#allocation2 + $0xc9] sm:$0xff] %v7492_v29  ;;  %v880_v39 = vadd.f32 %v7403_v11, %v841_v32  ;;  %v2210_v32 = vld [vmem:[#allocation10 + $0x220] sm:$0xff] }
 0x1d5   : > { %996 = vst [vmem:[#allocation2 + $0xc1] sm:$0xff] %v7496_v36  ;;  %v879_v40 = vadd.f32 %v7403_v11, %v840_v38  ;;  %v5127_v42 = vpop.f32.mrb[18].mxu0  ;;  %5202 = vmatprep.mubr.f32.mxu0 %v7496_v36 }
 0x1d6   : > { %v7504_v44 = vmax.f32 %v880_v39, 0.0  ;;  %v843_v46 = vmul.f32 %v5127_v42, %v7398_v9  ;;  %v748_v47 = vpop.f32.mrb[19].mxu0  ;;  %5203 = vmatmul.mubr.f32.gmra.mrb[48].mxu0 %v7492_v29 }
 0x1d7   : > { %v7508_v48 = vmax.f32 %v879_v40, 0.0  ;;  %v842_v50 = vmul.f32 %v7398_v9, %v748_v47 }
 0x1d8   : > { %999 = vst [vmem:[#allocation2 + $0xe1] sm:$0xff] %v7504_v44  ;;  %v882_v52 = vadd.f32 %v7403_v11, %v843_v46 }
 0x1d9   : > { %998 = vst [vmem:[#allocation2 + $0xd9] sm:$0xff] %v7508_v48  ;;  %v881_v53 = vadd.f32 %v7403_v11, %v842_v50  ;;  %v5130_v56 = vpop.f32.mrb[20].mxu0  ;;  %5205 = vmatprep.mubr.f32.mxu0 %v7508_v48 }
 0x1da   : > { %v7516_v57 = vmax.f32 %v882_v52, 0.0  ;;  %v845_v58 = vmul.f32 %v5130_v56, %v7398_v9  ;;  %v758_v59 = vpop.f32.mrb[21].mxu0  ;;  %5206 = vmatmul.mubr.f32.gmra.mrb[50].mxu0 %v7504_v44 }
 0x1db   : > { %v7520_v61 = vmax.f32 %v881_v53, 0.0  ;;  %v844_v62 = vmul.f32 %v7398_v9, %v758_v59  ;;  %v6114_v53 = vpack.c.bf16 %v2211_v34, %v2210_v32  ;;  %v2213_v59 = vld [vmem:[#allocation10 + $0x238] sm:$0xff] }
 0x1dc   : > { %1001 = vst [vmem:[#allocation2 + $0xf9] sm:$0xff] %v7516_v57  ;;  %v884_v0 = vadd.f32 %v7403_v11, %v845_v58 }
 0x1dd   : > { %1000 = vst [vmem:[#allocation2 + $0xf1] sm:$0xff] %v7520_v61  ;;  %v883_v1 = vadd.f32 %v7403_v11, %v844_v62  ;;  %v5133_v2 = vpop.f32.mrb[22].mxu0  ;;  %5208 = vmatprep.mubr.f32.mxu0 %v7520_v61 }
 0x1de   : > { %v7528_v6 = vmax.f32 %v884_v0, 0.0  ;;  %v847_v10 = vmul.f32 %v5133_v2, %v7398_v9  ;;  %v768_v12 = vpop.f32.mrb[23].mxu0  ;;  %5209 = vmatmul.mubr.f32.gmra.mrb[52].mxu0 %v7516_v57 }
 0x1df   : > { %v7532_v14 = vmax.f32 %v883_v1, 0.0  ;;  %v846_v15 = vmul.f32 %v7398_v9, %v768_v12 }
 0x1e0   : > { %1003 = vst [vmem:[#allocation2 + $0x111] sm:$0xff] %v7528_v6  ;;  %v886_v17 = vadd.f32 %v7403_v11, %v847_v10  ;;  %v7537_v18 = vld [vmem:[#allocation2 + $0xd8] sm:$0xff]  ;;  %v7539_v22 = vld [vmem:[#allocation2 + $0xe0] sm:$0xff] }
 0x1e1   : > { %1002 = vst [vmem:[#allocation2 + $0x109] sm:$0xff] %v7532_v14  ;;  %v885_v26 = vadd.f32 %v7403_v11, %v846_v15  ;;  %v5136_v28 = vpop.f32.mrb[24].mxu0  ;;  %5442 = vmatprep.mubr.f32.mxu1 %v7537_v18  ;;  %5211 = vmatprep.mubr.f32.mxu0 %v7532_v14 }
 0x1e2   : > { %v7545_v38 = vmax.f32 %v886_v17, 0.0  ;;  %v849_v39 = vmul.f32 %v5136_v28, %v7398_v9  ;;  %v778_v40 = vpop.f32.mrb[25].mxu0  ;;  %5443 = vmatmul.mubr.f32.vlgmr.msra.gmra.mrb[0].mxu1 %v7539_v22  ;;  %5212 = vmatmul.mubr.f32.gmra.mrb[54].mxu0 %v7528_v6  ;;  %v2215_v28 = vld [vmem:[#allocation10 + $0x248] sm:$0xff] }
 0x1e3   : > { %v7550_v42 = vmax.f32 %v885_v26, 0.0  ;;  %v848_v46 = vmul.f32 %v7398_v9, %v778_v40  ;;  %6109 = vmatpush3.bf16.msra.mxu1 %v7389_v55  ;;  %v2212_v55 = vld [vmem:[#allocation10 + $0x230] sm:$0xff] }
 0x1e4   : > { %1005 = vst [vmem:[#allocation2 + $0x129] sm:$0xff] %v7545_v38  ;;  %v888_v47 = vadd.f32 %v7403_v11, %v849_v39  ;;  %v7556_v50 = vld [vmem:[#allocation2 + $0xf0] sm:$0xff]  ;;  %6111 = vmatprep.subr.bf16.mxu1 %v6110_v25  ;;  %v7558_v52 = vld [vmem:[#allocation2 + $0xf8] sm:$0xff]  ;;  %v6118_v15 = vpack.c.bf16 %v2213_v59, %v2212_v55 }
 0x1e5   : > { %1004 = vst [vmem:[#allocation2 + $0x121] sm:$0xff] %v7550_v42  ;;  %v887_v56 = vadd.f32 %v7403_v11, %v848_v46  ;;  %v5139_v58 = vpop.f32.mrb[26].mxu0  ;;  %5445 = vmatprep.mubr.f32.mxu1 %v7556_v50  ;;  %5214 = vmatprep.mubr.f32.mxu0 %v7550_v42 }
 0x1e6   : > { %v7564_v62 = vmax.f32 %v888_v47, 0.0  ;;  %v851_v0 = vmul.f32 %v5139_v58, %v7398_v9  ;;  %v788_v1 = vpop.f32.mrb[27].mxu0  ;;  %5446 = vmatmul.mubr.f32.gmra.mrb[2].mxu1 %v7558_v52  ;;  %5215 = vmatmul.mubr.f32.gmra.mrb[56].mxu0 %v7545_v38 }
 0x1e7   : > { %v7569_v2 = vmax.f32 %v887_v56, 0.0  ;;  %v850_v3 = vmul.f32 %v7398_v9, %v788_v1  ;;  %6113 = vmatpush3.bf16.msra.mxu1 %v6110_v25  ;;  %v2214_v25 = vld [vmem:[#allocation10 + $0x240] sm:$0xff]  ;;  %v2217_v1 = vld [vmem:[#allocation10 + $0x258] sm:$0xff] }
 0x1e8   : > { %1007 = vst [vmem:[#allocation2 + $0x141] sm:$0xff] %v7564_v62  ;;  %v890_v5 = vadd.f32 %v7403_v11, %v851_v0  ;;  %v7574_v10 = vld [vmem:[#allocation2 + $0x108] sm:$0xff]  ;;  %6115 = vmatprep.subr.bf16.mxu1 %v6114_v53  ;;  %v7576_v12 = vld [vmem:[#allocation2 + $0x110] sm:$0xff]  ;;  %v6122_v55 = vpack.c.bf16 %v2215_v28, %v2214_v25 }
 0x1e9   : > { %1006 = vst [vmem:[#allocation2 + $0x139] sm:$0xff] %v7569_v2  ;;  %v889_v17 = vadd.f32 %v7403_v11, %v850_v3  ;;  %v5142_v26 = vpop.f32.mrb[28].mxu0  ;;  %5448 = vmatprep.mubr.f32.mxu1 %v7574_v10  ;;  %5217 = vmatprep.mubr.f32.mxu0 %v7569_v2 }
 0x1ea   : > { %v7582_v32 = vmax.f32 %v890_v5, 0.0  ;;  %v853_v34 = vmul.f32 %v5142_v26, %v7398_v9  ;;  %v798_v39 = vpop.f32.mrb[29].mxu0  ;;  %5449 = vmatmul.mubr.f32.gmra.mrb[4].mxu1 %v7576_v12  ;;  %5218 = vmatmul.mubr.f32.gmra.mrb[58].mxu0 %v7564_v62 }
 0x1eb   : > { %v7587_v40 = vmax.f32 %v889_v17, 0.0  ;;  %v852_v46 = vmul.f32 %v7398_v9, %v798_v39  ;;  %6117 = vmatpush3.bf16.msra.mxu1 %v6114_v53  ;;  %v2216_v53 = vld [vmem:[#allocation10 + $0x250] sm:$0xff] }
 0x1ec   : > { %1009 = vst [vmem:[#allocation2 + $0x159] sm:$0xff] %v7582_v32  ;;  %v892_v47 = vadd.f32 %v7403_v11, %v853_v34  ;;  %v7592_v56 = vld [vmem:[#allocation2 + $0x120] sm:$0xff]  ;;  %6119 = vmatprep.subr.bf16.mxu1 %v6118_v15  ;;  %v7594_v58 = vld [vmem:[#allocation2 + $0x128] sm:$0xff] }
 0x1ed   : > { %1008 = vst [vmem:[#allocation2 + $0x151] sm:$0xff] %v7587_v40  ;;  %v891_v59 = vadd.f32 %v7403_v11, %v852_v46  ;;  %v5145_v0 = vpop.f32.mrb[30].mxu0  ;;  %5451 = vmatprep.mubr.f32.mxu1 %v7592_v56  ;;  %5220 = vmatprep.mubr.f32.mxu0 %v7587_v40  ;;  %v6126_v46 = vpack.c.bf16 %v2217_v1, %v2216_v53 }
 0x1ee   : > { %v7600_v3 = vmax.f32 %v892_v47, 0.0  ;;  %v855_v5 = vmul.f32 %v5145_v0, %v7398_v9  ;;  %v808_v17 = vpop.f32.mrb[31].mxu0  ;;  %5452 = vmatmul.mubr.f32.gmra.mrb[6].mxu1 %v7594_v58  ;;  %5221 = vmatmul.mubr.f32.gmra.mrb[60].mxu0 %v7582_v32  ;;  %v1596_v0 = vld [vmem:[#allocation10 + $0x110] sm:$0xff] }
 0x1ef   : > { %v7605_v26 = vmax.f32 %v891_v59, 0.0  ;;  %v854_v25 = vmul.f32 %v7398_v9, %v808_v17  ;;  %6121 = vmatpush3.bf16.msra.mxu1 %v6118_v15  ;;  %v2218_v9 = vld [vmem:[#allocation10 + $0x260] sm:$0xff]  ;;  %v2219_v15 = vld [vmem:[#allocation10 + $0x268] sm:$0xff] }
 0x1f0   : > { %1011 = vst [vmem:[#allocation2 + $0x171] sm:$0xff] %v7600_v3  ;;  %v7610_v28 = vadd.f32 %v7403_v11, %v855_v5  ;;  %v7612_v34 = vld [vmem:[#allocation2 + $0x138] sm:$0xff]  ;;  %6123 = vmatprep.subr.bf16.mxu1 %v6122_v55  ;;  %v7614_v39 = vld [vmem:[#allocation2 + $0x140] sm:$0xff]  ;;  %v1597_v5 = vld [vmem:[#allocation10 + $0x118] sm:$0xff]  ;;  %v6130_v17 = vpack.c.bf16 %v2219_v15, %v2218_v9 }
 0x1f1   : > { %1010 = vst [vmem:[#allocation2 + $0x169] sm:$0xff] %v7605_v26  ;;  %v7618_v47 = vadd.f32 %v7403_v11, %v854_v25  ;;  %5454 = vmatprep.mubr.f32.mxu1 %v7612_v34  ;;  %5223 = vmatprep.mubr.f32.mxu0 %v7605_v26  ;;  %v2220_v25 = vld [vmem:[#allocation10 + $0x270] sm:$0xff]  ;;  %v6046_v43 = vpack.c.bf16 %v1597_v5, %v1596_v0  ;;  %v2512_v0 = vld [vmem:[#allocation10 + $0x280] sm:$0xff]  ;;  %v2513_v5 = vld [vmem:[#allocation10 + $0x288] sm:$0xff] }
 0x1f2   : > { %8348 = vst [vmem:[#allocation27_spill] sm:$0xff] %v7610_v28  ;;  %v8298_v59 = vmax.f32 %v7610_v28, 0.0  ;;  %5455 = vmatmul.mubr.f32.gmra.mrb[8].mxu1 %v7614_v39  ;;  %5224 = vmatmul.mubr.f32.gmra.mrb[62].mxu0 %v7600_v3  ;;  %v2515_v28 = vld [vmem:[#allocation10 + $0x298] sm:$0xff] }
 0x1f3   : > { %v8301_v53 = vmax.f32 %v7618_v47, 0.0  ;;  %6125 = vmatpush3.bf16.msra.mxu1 %v6122_v55  ;;  %5258 = vmatprep.mubr.f32.mxu0 %v6921_v13  ;;  %v7638_v55 = vld [vmem:[#allocation2 + $0x18] sm:$0xff] }
 0x1f4   : > { %1013 = vst [vmem:[#allocation2 + $0x189] sm:$0xff] %v8298_v59  ;;  %v7629_v11 = vld [vmem:[#allocation2 + $0x150] sm:$0xff]  ;;  %6127 = vmatprep.subr.bf16.mxu1 %v6126_v46  ;;  %v7631_v1 = vld [vmem:[#allocation2 + $0x158] sm:$0xff]  ;;  %8349 = vst [vmem:[#allocation28_spill] sm:$0xff] %v7638_v55 }
 0x1f5   : > { %1012 = vst [vmem:[#allocation2 + $0x181] sm:$0xff] %v8301_v53  ;;  %5457 = vmatprep.mubr.f32.mxu1 %v7629_v11  ;;  %v1598_v59 = vld [vmem:[#allocation10 + $0x120] sm:$0xff]  ;;  %v6134_v53 = vpack.c.bf16 %v2221_v49, %v2220_v25  ;;  %v6138_v25 = vpack.c.bf16 %v2513_v5, %v2512_v0 }
 0x1f6   : > { %5458 = vmatmul.mubr.f32.gmra.mrb[10].mxu1 %v7631_v1  ;;  %5259 = vmatmul.mubr.f32.vlgmr.msra.gmra.mrb[32].mxu0 %v6921_v13  ;;  %v7647_v13 = vld [vmem:[#allocation2 + $0x20] sm:$0xff]  ;;  %v6050_v33 = vpack.c.bf16 %v1599_v37, %v1598_v59  ;;  %v1601_v59 = vld [vmem:[#allocation10 + $0x138] sm:$0xff]  ;;  %v7661_v0 = vld [vmem:[#allocation2 + $0x50] sm:$0xff] }
 0x1f7   : > { %6129 = vmatpush3.bf16.msra.mxu1 %v6126_v46  ;;  %5261 = vmatprep.mubr.f32.mxu0 %v7638_v55  ;;  %v7651_v46 = vld [vmem:[#allocation2 + $0x30] sm:$0xff]  ;;  %v7654_v55 = vld [vmem:[#allocation2 + $0x38] sm:$0xff]  ;;  %v1600_v37 = vld [vmem:[#allocation10 + $0x130] sm:$0xff] }
 0x1f8   : > { %v7641_v9 = vld [vmem:[#allocation2 + $0x168] sm:$0xff]  ;;  %6131 = vmatprep.subr.bf16.mxu1 %v6130_v17  ;;  %v7643_v15 = vld [vmem:[#allocation2 + $0x170] sm:$0xff]  ;;  %6045 = vmatpush3.bf16.msra.mxu0 %v7392_v8  ;;  %8350 = vst [vmem:[#allocation29_spill] sm:$0xff] %v7651_v46 }
 0x1f9   : > { %5460 = vmatprep.mubr.f32.mxu1 %v7641_v9  ;;  %6047 = vmatprep.subr.bf16.mxu0 %v6046_v43  ;;  %v2516_v5 = vld [vmem:[#allocation10 + $0x2a0] sm:$0xff] }
 0x1fa   : > { %5461 = vmatmul.mubr.f32.gmra.mrb[12].mxu1 %v7643_v15  ;;  %5262 = vmatmul.mubr.f32.gmra.mrb[34].mxu0 %v7647_v13 }
 0x1fb   : > { %6133 = vmatpush3.bf16.msra.mxu1 %v6130_v17  ;;  %5264 = vmatprep.mubr.f32.mxu0 %v7651_v46  ;;  %v7658_v17 = vld [vmem:[#allocation2 + $0x48] sm:$0xff]  ;;  %v6054_v46 = vpack.c.bf16 %v1601_v59, %v1600_v37  ;;  %v7677_v37 = vld [vmem:[#allocation2 + $0x80] sm:$0xff]  ;;  %v2520_v59 = vld [vmem:[#allocation10 + $0x2c0] sm:$0xff] }
 0x1fc   : > { %v1897_v49 = vld [vmem:[#allocation2 + $0x180] sm:$0xff]  ;;  %6135 = vmatprep.subr.bf16.mxu1 %v6134_v53  ;;  %v1898_v8 = vld [vmem:[#allocation2 + $0x188] sm:$0xff]  ;;  %6049 = vmatpush3.bf16.msra.mxu0 %v6046_v43  ;;  %v6142_v43 = vpack.c.bf16 %v2515_v28, %v2514_v30 }
 0x1fd   : > { %5463 = vmatprep.mubr.f32.mxu1 %v1897_v49  ;;  %6051 = vmatprep.subr.bf16.mxu0 %v6050_v33  ;;  %v2517_v49 = vld [vmem:[#allocation10 + $0x2a8] sm:$0xff]  ;;  %v7669_v30 = vld [vmem:[#allocation2 + $0x68] sm:$0xff]  ;;  %v2518_v28 = vld [vmem:[#allocation10 + $0x2b0] sm:$0xff] }
 0x1fe   : > { %5464 = vmatmul.mubr.f32.gmra.mrb[14].mxu1 %v1898_v8  ;;  %5265 = vmatmul.mubr.f32.gmra.mrb[36].mxu0 %v7654_v55  ;;  %8351 = vst [vmem:[#allocation30_spill] sm:$0xff] %v7669_v30  ;;  %v2519_v8 = vld [vmem:[#allocation10 + $0x2b8] sm:$0xff] }
 0x1ff   : > { %6137 = vmatpush3.bf16.msra.mxu1 %v6134_v53  ;;  %5498 = vmatprep.mubr.f32.mxu1 %v7412_v23  ;;  %v7666_v23 = vld [vmem:[#allocation2 + $0x60] sm:$0xff]  ;;  %v6146_v53 = vpack.c.bf16 %v2517_v49, %v2516_v5 }
 0x200   : > { %6139 = vmatprep.subr.bf16.mxu1 %v6138_v25  ;;  %5267 = vmatprep.mubr.f32.mxu0 %v7658_v17  ;;  %v1604_v49 = vld [vmem:[#allocation10 + $0x150] sm:$0xff] }
 0x201   : > { %6053 = vmatpush3.bf16.msra.mxu0 %v6050_v33  ;;  %v1602_v33 = vld [vmem:[#allocation10 + $0x140] sm:$0xff] }
 0x202   : > { %5499 = vmatmul.mubr.f32.vlgmr.msra.gmra.mrb[16].mxu1 %v7409_v19  ;;  %5268 = vmatmul.mubr.f32.gmra.mrb[38].mxu0 %v7661_v0  ;;  %v1603_v19 = vld [vmem:[#allocation10 + $0x148] sm:$0xff] }
 0x203   : > { %6141 = vmatpush3.bf16.msra.mxu1 %v6138_v25  ;;  %5501 = vmatprep.mubr.f32.mxu1 %v7424_v35  ;;  %v7674_v35 = vld [vmem:[#allocation2 + $0x78] sm:$0xff]  ;;  %v6150_v25 = vpack.c.bf16 %v2519_v8, %v2518_v28  ;;  %v6058_v5 = vpack.c.bf16 %v1603_v19, %v1602_v33  ;;  %v2523_v8 = vld [vmem:[#allocation10 + $0x2d8] sm:$0xff]  ;;  %v7693_v19 = vld [vmem:[#allocation2 + $0xb0] sm:$0xff] }
 0x204   : > { %6143 = vmatprep.subr.bf16.mxu1 %v6142_v43  ;;  %5270 = vmatprep.mubr.f32.mxu0 %v7666_v23  ;;  %v7689_v33 = vld [vmem:[#allocation2 + $0xa8] sm:$0xff] }
 0x205   : > { %6055 = vmatprep.subr.bf16.mxu0 %v6054_v46 }
 0x206   : > { %5502 = vmatmul.mubr.f32.gmra.mrb[18].mxu1 %v7420_v31  ;;  %5271 = vmatmul.mubr.f32.gmra.mrb[40].mxu0 %v7669_v30  ;;  %v2521_v31 = vld [vmem:[#allocation10 + $0x2c8] sm:$0xff]  ;;  %v1605_v30 = vld [vmem:[#allocation10 + $0x158] sm:$0xff] }
 0x207   : > { %5504 = vmatprep.mubr.f32.mxu1 %v7436_v45  ;;  %6145 = vmatpush3.bf16.msra.mxu1 %v6142_v43  ;;  %v7682_v45 = vld [vmem:[#allocation2 + $0x90] sm:$0xff]  ;;  %v7685_v43 = vld [vmem:[#allocation2 + $0x98] sm:$0xff]  ;;  %v6154_v28 = vpack.c.bf16 %v2521_v31, %v2520_v59 }
 0x208   : > { %5273 = vmatprep.mubr.f32.mxu0 %v7674_v35  ;;  %6147 = vmatprep.subr.bf16.mxu1 %v6146_v53  ;;  %8352 = vst [vmem:[#allocation31_spill] sm:$0xff] %v7685_v43  ;;  %v2524_v31 = vld [vmem:[#allocation10 + $0x2e0] sm:$0xff] }
 0x209   : > { %6057 = vmatpush3.bf16.msra.mxu0 %v6054_v46  ;;  %v2522_v46 = vld [vmem:[#allocation10 + $0x2d0] sm:$0xff] }
 0x20a   : > { %5505 = vmatmul.mubr.f32.gmra.mrb[20].mxu1 %v7432_v41  ;;  %5274 = vmatmul.mubr.f32.gmra.mrb[42].mxu0 %v7677_v37  ;;  %v6062_v41 = vpack.c.bf16 %v1605_v30, %v1604_v49  ;;  %v6158_v59 = vpack.c.bf16 %v2523_v8, %v2522_v46  ;;  %v2525_v30 = vld [vmem:[#allocation10 + $0x2e8] sm:$0xff]  ;;  %v7697_v49 = vld [vmem:[#allocation2 + $0xc0] sm:$0xff]  ;;  %v2527_v8 = vld [vmem:[#allocation10 + $0x2f8] sm:$0xff] }
 0x20b   : > { %5507 = vmatprep.mubr.f32.mxu1 %v7448_v54  ;;  %6149 = vmatpush3.bf16.msra.mxu1 %v6146_v53  ;;  %v1606_v54 = vld [vmem:[#allocation10 + $0x160] sm:$0xff]  ;;  %v1607_v53 = vld [vmem:[#allocation10 + $0x168] sm:$0xff] }
 0x20c   : > { %5276 = vmatprep.mubr.f32.mxu0 %v7682_v45  ;;  %6151 = vmatprep.subr.bf16.mxu1 %v6150_v25 }
 0x20d   : > { %6059 = vmatprep.subr.bf16.mxu0 %v6058_v5 }
 0x20e   : > { %5508 = vmatmul.mubr.f32.gmra.mrb[22].mxu1 %v7444_v51  ;;  %5277 = vmatmul.mubr.f32.gmra.mrb[44].mxu0 %v7685_v43  ;;  %v6066_v51 = vpack.c.bf16 %v1607_v53, %v1606_v54  ;;  %v1608_v43 = vld [vmem:[#allocation10 + $0x170] sm:$0xff]  ;;  %v2831_v53 = vld [vmem:[#allocation10 + $0x360] sm:$0xff] }
 0x20f   : > { %5510 = vmatprep.mubr.f32.mxu1 %v7460_v63  ;;  %5279 = vmatprep.mubr.f32.mxu0 %v7689_v33  ;;  %v1609_v63 = vld [vmem:[#allocation10 + $0x178] sm:$0xff] }
 0x210   : > { %6153 = vmatpush3.bf16.msra.mxu1 %v6150_v25  ;;  %6061 = vmatpush3.bf16.msra.mxu0 %v6058_v5  ;;  %v7701_v25 = vld [vmem:[#allocation2 + $0xc8] sm:$0xff]  ;;  %v6162_v5 = vpack.c.bf16 %v2525_v30, %v2524_v31  ;;  %v6070_v46 = vpack.c.bf16 %v1609_v63, %v1608_v43  ;;  %v2819_v43 = vld [vmem:[#allocation10 + $0x300] sm:$0xff]  ;;  %v7807_v63 = vld [vmem:[#allocation2 + $0xda] sm:$0xff] }
 0x211   : > { %6155 = vmatprep.subr.bf16.mxu1 %v6154_v28  ;;  %6063 = vmatprep.subr.bf16.mxu0 %v6062_v41  ;;  %v7797_v54 = vld [vmem:[#allocation2 + $0xc2] sm:$0xff]  ;;  %v7802_v30 = vld [vmem:[#allocation2 + $0xca] sm:$0xff] }
 0x212   : > { %5511 = vmatmul.mubr.f32.gmra.mrb[24].mxu1 %v7456_v60  ;;  %5280 = vmatmul.mubr.f32.gmra.mrb[46].mxu0 %v7693_v19  ;;  %v2526_v60 = vld [vmem:[#allocation10 + $0x2f0] sm:$0xff]  ;;  %v8359_v31 = vld [vmem:[#allocation25_spill] sm:$0xff] }
 0x213   : > { %5513 = vmatprep.mubr.f32.mxu1 %v7472_v7  ;;  %5282 = vmatprep.mubr.f32.mxu0 %v7697_v49  ;;  %v6166_v7 = vpack.c.bf16 %v2527_v8, %v2526_v60  ;;  %v8360_v60 = vld [vmem:[#allocation26_spill] sm:$0xff]  ;;  %v7812_v8 = vld [vmem:[#allocation2 + $0xe2] sm:$0xff] }
 0x214   : > { %6157 = vmatpush3.bf16.msra.mxu1 %v6154_v28  ;;  %6065 = vmatpush3.bf16.msra.mxu0 %v6062_v41  ;;  %v2820_v28 = vld [vmem:[#allocation10 + $0x308] sm:$0xff] }
 0x215   : > { %6159 = vmatprep.subr.bf16.mxu1 %v6158_v59  ;;  %6067 = vmatprep.subr.bf16.mxu0 %v6066_v51 }
 0x216   : > { %5514 = vmatmul.mubr.f32.gmra.mrb[26].mxu1 %v7468_v4  ;;  %5283 = vmatmul.mubr.f32.gmra.mrb[48].mxu0 %v7701_v25  ;;  %v6170_v4 = vpack.c.bf16 %v2820_v28, %v2819_v43  ;;  %v7817_v43 = vld [vmem:[#allocation2 + $0xf2] sm:$0xff] }
 0x217   : > { %5516 = vmatprep.mubr.f32.mxu1 %v7484_v20  ;;  %5285 = vmatprep.mubr.f32.mxu0 %v7537_v18  ;;  %v1562_v20 = vld [vmem:[#allocation2 + $0xa] sm:$0xff] }
 0x218   : > { %6161 = vmatpush3.bf16.msra.mxu1 %v6158_v59  ;;  %6069 = vmatpush3.bf16.msra.mxu0 %v6066_v51  ;;  %v7752_v18 = vld [vmem:[#allocation2 + $0x4a] sm:$0xff]  ;;  %v2832_v59 = vld [vmem:[#allocation10 + $0x368] sm:$0xff] }
 0x219   : > { %6163 = vmatprep.subr.bf16.mxu1 %v6162_v5  ;;  %6071 = vmatprep.subr.bf16.mxu0 %v6070_v46  ;;  %v6194_v51 = vpack.c.bf16 %v2832_v59, %v2831_v53  ;;  %v3125_v28 = vld [vmem:[#allocation10 + $0x380] sm:$0xff]  ;;  %v3134_v53 = vld [vmem:[#allocation10 + $0x3c8] sm:$0xff]  ;;  %v3136_v59 = vld [vmem:[#allocation10 + $0x3d8] sm:$0xff] }
 0x21a   : > { %5517 = vmatmul.mubr.f32.gmra.mrb[28].mxu1 %v7480_v16  ;;  %5286 = vmatmul.mubr.f32.gmra.mrb[50].mxu0 %v7539_v22  ;;  %v1561_v16 = vld [vmem:[#allocation2 + $0x2] sm:$0xff] }
 0x21b   : > { %5519 = vmatprep.mubr.f32.mxu1 %v7496_v36  ;;  %5288 = vmatprep.mubr.f32.mxu0 %v7556_v50  ;;  %v1564_v36 = vld [vmem:[#allocation2 + $0x22] sm:$0xff]  ;;  %v8356_v50 = vld [vmem:[#allocation22_spill] sm:$0xff] }
 0x21c   : > { %6165 = vmatpush3.bf16.msra.mxu1 %v6162_v5  ;;  %6073 = vmatpush3.bf16.msra.mxu0 %v6070_v46  ;;  %v2833_v5 = vld [vmem:[#allocation10 + $0x370] sm:$0xff]  ;;  %v2834_v46 = vld [vmem:[#allocation10 + $0x378] sm:$0xff] }
 0x21d   : > { %6167 = vmatprep.subr.bf16.mxu1 %v6166_v7  ;;  %6075 = vmatprep.subr.bf16.mxu0 %v7357_v21 }
 0x21e   : > { %5520 = vmatmul.mubr.f32.gmra.mrb[30].mxu1 %v7492_v29  ;;  %5289 = vmatmul.mubr.f32.gmra.mrb[52].mxu0 %v7558_v52  ;;  %v1563_v29 = vld [vmem:[#allocation2 + $0x1a] sm:$0xff]  ;;  %v7761_v52 = vld [vmem:[#allocation2 + $0x62] sm:$0xff] }
 0x21f   : > { %5522 = vmatprep.mubr.f32.mxu1 %v7508_v48  ;;  %5291 = vmatprep.mubr.f32.mxu0 %v7574_v10  ;;  %v8353_v48 = vmax.f32 %v7618_v47, 0.0  ;;  %v2826_v10 = vld [vmem:[#allocation10 + $0x338] sm:$0xff] }
 0x220   : > { %6169 = vmatpush3.bf16.msra.mxu1 %v6166_v7  ;;  %v7787_v47 = vld [vmem:[#allocation2 + $0xaa] sm:$0xff]  ;;  %v6198_v7 = vpack.c.bf16 %v2834_v46, %v2833_v5  ;;  %v3139_v5 = vld [vmem:[#allocation10 + $0x3f0] sm:$0xff] }
 0x221   : > { %6171 = vmatprep.subr.bf16.mxu1 %v6170_v4 }
 0x222   : > { %5523 = vmatmul.mubr.f32.gmra.mrb[0].mxu1 %v7504_v44  ;;  %5292 = vmatmul.mubr.f32.gmra.mrb[54].mxu0 %v7576_v12  ;;  %v7740_v44 = vld [vmem:[#allocation2 + $0x32] sm:$0xff]  ;;  %v7770_v12 = vld [vmem:[#allocation2 + $0x7a] sm:$0xff] }
 0x223   : > { %5525 = vmatprep.mubr.f32.mxu1 %v7520_v61  ;;  %5294 = vmatprep.mubr.f32.mxu0 %v7592_v56  ;;  %v2821_v61 = vld [vmem:[#allocation10 + $0x310] sm:$0xff]  ;;  %v8357_v56 = vld [vmem:[#allocation23_spill] sm:$0xff] }
 0x226   : > { %5526 = vmatmul.mubr.f32.gmra.mrb[2].mxu1 %v7516_v57  ;;  %5295 = vmatmul.mubr.f32.gmra.mrb[56].mxu0 %v7594_v58  ;;  %v7746_v57 = vld [vmem:[#allocation2 + $0x3a] sm:$0xff]  ;;  %v2827_v58 = vld [vmem:[#allocation10 + $0x340] sm:$0xff] }
 0x227   : > { %5528 = vmatprep.mubr.f32.mxu1 %v7532_v14  ;;  %5297 = vmatprep.mubr.f32.mxu0 %v7612_v34  ;;  %v7782_v34 = vld [vmem:[#allocation2 + $0x9a] sm:$0xff] }
 0x22a   : > { %5529 = vmatmul.mubr.f32.gmra.mrb[4].mxu1 %v7528_v6  ;;  %5298 = vmatmul.mubr.f32.gmra.mrb[58].mxu0 %v7614_v39  ;;  %v2822_v6 = vld [vmem:[#allocation10 + $0x318] sm:$0xff] }
 0x22b   : > { %5531 = vmatprep.mubr.f32.mxu1 %v7550_v42  ;;  %5300 = vmatprep.mubr.f32.mxu0 %v7629_v11  ;;  %v6174_v22 = vpack.c.bf16 %v2822_v6, %v2821_v61  ;;  %v2824_v42 = vld [vmem:[#allocation10 + $0x328] sm:$0xff]  ;;  %v2829_v11 = vld [vmem:[#allocation10 + $0x350] sm:$0xff]  ;;  %v7837_v61 = vld [vmem:[#allocation2 + $0x12a] sm:$0xff] }
 0x22c   : > { %v7841_v6 = vld [vmem:[#allocation2 + $0x13a] sm:$0xff] }
 0x22e   : > { %5532 = vmatmul.mubr.f32.gmra.mrb[6].mxu1 %v7545_v38  ;;  %5301 = vmatmul.mubr.f32.gmra.mrb[60].mxu0 %v7631_v1  ;;  %v2823_v38 = vld [vmem:[#allocation10 + $0x320] sm:$0xff]  ;;  %v2830_v1 = vld [vmem:[#allocation10 + $0x358] sm:$0xff] }
 0x22f   : > { %5534 = vmatprep.mubr.f32.mxu1 %v7569_v2  ;;  %5303 = vmatprep.mubr.f32.mxu0 %v7641_v9  ;;  %v7764_v2 = vld [vmem:[#allocation2 + $0x6a] sm:$0xff]  ;;  %v8358_v9 = vld [vmem:[#allocation24_spill] sm:$0xff]  ;;  %v6190_v41 = vpack.c.bf16 %v2830_v1, %v2829_v11 }
 0x230   : > { %v3131_v1 = vld [vmem:[#allocation10 + $0x3b0] sm:$0xff] }
 0x232   : > { %5535 = vmatmul.mubr.f32.gmra.mrb[8].mxu1 %v7564_v62  ;;  %5304 = vmatmul.mubr.f32.gmra.mrb[62].mxu0 %v7643_v15  ;;  %v6178_v62 = vpack.c.bf16 %v2824_v42, %v2823_v38  ;;  %v7792_v15 = vld [vmem:[#allocation2 + $0xb2] sm:$0xff]  ;;  %v7857_v38 = vld [vmem:[#allocation2 + $0x16a] sm:$0xff] }
 0x233   : > { %5537 = vmatprep.mubr.f32.mxu1 %v7587_v40  ;;  %5338 = vmatprep.mubr.f32.mxu0 %v1561_v16  ;;  %v7773_v40 = vld [vmem:[#allocation2 + $0x82] sm:$0xff]  ;;  %v7821_v16 = vld [vmem:[#allocation2 + $0xfa] sm:$0xff]  ;;  %v7861_v42 = vld [vmem:[#allocation2 + $0x172] sm:$0xff] }
 0x236   : > { %5538 = vmatmul.mubr.f32.gmra.mrb[10].mxu1 %v7582_v32  ;;  %5339 = vmatmul.mubr.f32.vlgmr.msra.gmra.mrb[32].mxu0 %v1562_v20 }
 0x237   : > { %5540 = vmatprep.mubr.f32.mxu1 %v7605_v26  ;;  %5341 = vmatprep.mubr.f32.mxu0 %v1563_v29  ;;  %v7779_v26 = vld [vmem:[#allocation2 + $0x92] sm:$0xff] }
 0x238   : > { %6077 = vmatpush3.bf16.msra.mxu0 %v7357_v21  ;;  %v8354_v21 = vld [vmem:[#allocation27_spill] sm:$0xff] }
 0x239   : > { %6079 = vmatprep.subr.bf16.mxu0 %v7361_v24  ;;  %v8355_v14 = vmax.f32 %v8354_v21, 0.0  ;;  %v7845_v21 = vld [vmem:[#allocation2 + $0x142] sm:$0xff] }
 0x23a   : > { %5541 = vmatmul.mubr.f32.gmra.mrb[12].mxu1 %v7600_v3  ;;  %5342 = vmatmul.mubr.f32.gmra.mrb[34].mxu0 %v1564_v36  ;;  %v2828_v3 = vld [vmem:[#allocation10 + $0x348] sm:$0xff] }
 0x23b   : > { %5543 = vmatprep.mubr.f32.mxu1 %v8353_v48  ;;  %5344 = vmatprep.mubr.f32.mxu0 %v7740_v44  ;;  %v6186_v39 = vpack.c.bf16 %v2828_v3, %v2827_v58  ;;  %v7833_v48 = vld [vmem:[#allocation2 + $0x122] sm:$0xff]  ;;  %v3129_v58 = vld [vmem:[#allocation10 + $0x3a0] sm:$0xff]  ;;  %v3130_v3 = vld [vmem:[#allocation10 + $0x3a8] sm:$0xff] }
 0x23c   : > { %6081 = vmatpush3.bf16.msra.mxu0 %v7361_v24  ;;  %v7756_v24 = vld [vmem:[#allocation2 + $0x52] sm:$0xff]  ;;  %v6210_v11 = vpack.c.bf16 %v3130_v3, %v3129_v58  ;;  %v2812_v3 = vld [vmem:[#allocation2 + $0x168] sm:$0xff] }
 0x23d   : > { %6083 = vmatprep.subr.bf16.mxu0 %v7365_v27  ;;  %v2811_v58 = vld [vmem:[#allocation2 + $0x158] sm:$0xff] }
 0x23e   : > { %5544 = vmatmul.mubr.f32.gmra.mrb[14].mxu1 %v8355_v14  ;;  %5345 = vmatmul.mubr.f32.gmra.mrb[36].mxu0 %v7746_v57  ;;  %v7849_v14 = vld [vmem:[#allocation2 + $0x152] sm:$0xff] }
 0x23f   : > { %5578 = vmatprep.mubr.f32.mxu1 %v1563_v29  ;;  %5347 = vmatprep.mubr.f32.mxu0 %v7752_v18  ;;  %v7825_v29 = vld [vmem:[#allocation2 + $0x10a] sm:$0xff] }
 0x240   : > { %6085 = vmatpush3.bf16.msra.mxu0 %v7365_v27  ;;  %v2825_v27 = vld [vmem:[#allocation10 + $0x330] sm:$0xff] }
 0x241   : > { %6087 = vmatprep.subr.bf16.mxu0 %v8356_v50  ;;  %v6182_v32 = vpack.c.bf16 %v2826_v10, %v2825_v27  ;;  %v7872_v27 = vld [vmem:[#allocation2 + $0x182] sm:$0xff]  ;;  %v7877_v10 = vld [vmem:[#allocation2 + $0x18a] sm:$0xff] }
 0x242   : > { %5579 = vmatmul.mubr.f32.vlgmr.msra.gmra.mrb[16].mxu1 %v1564_v36  ;;  %5348 = vmatmul.mubr.f32.gmra.mrb[38].mxu0 %v7756_v24  ;;  %v7829_v36 = vld [vmem:[#allocation2 + $0x112] sm:$0xff] }
 0x243   : > { %6173 = vmatpush3.bf16.msra.mxu1 %v6170_v4  ;;  %5581 = vmatprep.mubr.f32.mxu1 %v7740_v44  ;;  %v3126_v4 = vld [vmem:[#allocation10 + $0x388] sm:$0xff] }
 0x244   : > { %6175 = vmatprep.subr.bf16.mxu1 %v6174_v22  ;;  %5350 = vmatprep.mubr.f32.mxu0 %v7761_v52  ;;  %v6202_v20 = vpack.c.bf16 %v3126_v4, %v3125_v28  ;;  %v3432_v28 = vld [vmem:[#allocation10 + $0x408] sm:$0xff] }
 0x245   : > { %6089 = vmatpush3.bf16.msra.mxu0 %v8356_v50  ;;  %v8361_v50 = vld [vmem:[#allocation28_spill] sm:$0xff] }
 0x246   : > { %5582 = vmatmul.mubr.f32.gmra.mrb[18].mxu1 %v7746_v57  ;;  %5351 = vmatmul.mubr.f32.gmra.mrb[40].mxu0 %v7764_v2 }
 0x247   : > { %5584 = vmatprep.mubr.f32.mxu1 %v7752_v18  ;;  %6177 = vmatpush3.bf16.msra.mxu1 %v6174_v22  ;;  %v7853_v22 = vld [vmem:[#allocation2 + $0x15a] sm:$0xff] }
 0x248   : > { %5353 = vmatprep.mubr.f32.mxu0 %v7770_v12  ;;  %6179 = vmatprep.subr.bf16.mxu1 %v6178_v62 }
 0x249   : > { %6091 = vmatprep.subr.bf16.mxu0 %v8357_v56 }
 0x24a   : > { %5585 = vmatmul.mubr.f32.gmra.mrb[20].mxu1 %v7756_v24  ;;  %5354 = vmatmul.mubr.f32.gmra.mrb[42].mxu0 %v7773_v40 }
 0x24b   : > { %5587 = vmatprep.mubr.f32.mxu1 %v7761_v52  ;;  %6181 = vmatpush3.bf16.msra.mxu1 %v6178_v62  ;;  %v8362_v62 = vld [vmem:[#allocation29_spill] sm:$0xff] }
 0x24c   : > { %5356 = vmatprep.mubr.f32.mxu0 %v7779_v26  ;;  %6183 = vmatprep.subr.bf16.mxu1 %v6182_v32 }
 0x24d   : > { %6093 = vmatpush3.bf16.msra.mxu0 %v8357_v56  ;;  %v3128_v56 = vld [vmem:[#allocation10 + $0x398] sm:$0xff] }
 0x24e   : > { %5588 = vmatmul.mubr.f32.gmra.mrb[22].mxu1 %v7764_v2  ;;  %5357 = vmatmul.mubr.f32.gmra.mrb[44].mxu0 %v7782_v34 }
 0x24f   : > { %5590 = vmatprep.mubr.f32.mxu1 %v7770_v12  ;;  %5359 = vmatprep.mubr.f32.mxu0 %v7787_v47 }
 0x250   : > { %6185 = vmatpush3.bf16.msra.mxu1 %v6182_v32  ;;  %6095 = vmatprep.subr.bf16.mxu0 %v8358_v9  ;;  %v3127_v32 = vld [vmem:[#allocation10 + $0x390] sm:$0xff] }
 0x251   : > { %6187 = vmatprep.subr.bf16.mxu1 %v6186_v39  ;;  %6097 = vmatpush3.bf16.msra.mxu0 %v8358_v9  ;;  %v3132_v9 = vld [vmem:[#allocation10 + $0x3b8] sm:$0xff] }
 0x252   : > { %5591 = vmatmul.mubr.f32.gmra.mrb[24].mxu1 %v7773_v40  ;;  %5360 = vmatmul.mubr.f32.gmra.mrb[46].mxu0 %v7792_v15 }
 0x253   : > { %5593 = vmatprep.mubr.f32.mxu1 %v7779_v26  ;;  %5362 = vmatprep.mubr.f32.mxu0 %v7797_v54 }
 0x254   : > { %6189 = vmatpush3.bf16.msra.mxu1 %v6186_v39  ;;  %6099 = vmatprep.subr.bf16.mxu0 %v8359_v31  ;;  %v8363_v39 = vld [vmem:[#allocation30_spill] sm:$0xff] }
 0x255   : > { %6191 = vmatprep.subr.bf16.mxu1 %v6190_v41  ;;  %6101 = vmatpush3.bf16.msra.mxu0 %v8359_v31 }
 0x256   : > { %5594 = vmatmul.mubr.f32.gmra.mrb[26].mxu1 %v7782_v34  ;;  %5363 = vmatmul.mubr.f32.gmra.mrb[48].mxu0 %v7802_v30 }
 0x257   : > { %5596 = vmatprep.mubr.f32.mxu1 %v7787_v47  ;;  %5365 = vmatprep.mubr.f32.mxu0 %v7807_v63 }
 0x258   : > { %6193 = vmatpush3.bf16.msra.mxu1 %v6190_v41  ;;  %6103 = vmatprep.subr.bf16.mxu0 %v8360_v60  ;;  %v3133_v41 = vld [vmem:[#allocation10 + $0x3c0] sm:$0xff] }
 0x259   : > { %6195 = vmatprep.subr.bf16.mxu1 %v6194_v51  ;;  %6105 = vmatpush3.bf16.msra.mxu0 %v8360_v60  ;;  %v2800_v60 = vld [vmem:[#allocation2 + $0xd8] sm:$0xff] }
 0x25a   : > { %5597 = vmatmul.mubr.f32.gmra.mrb[28].mxu1 %v7792_v15  ;;  %5366 = vmatmul.mubr.f32.gmra.mrb[50].mxu0 %v7812_v8 }
 0x25b   : > { %5599 = vmatprep.mubr.f32.mxu1 %v7797_v54  ;;  %5368 = vmatprep.mubr.f32.mxu0 %v7817_v43 }
 0x25c   : > { %6197 = vmatpush3.bf16.msra.mxu1 %v6194_v51  ;;  %v3138_v51 = vld [vmem:[#allocation10 + $0x3e8] sm:$0xff] }
 0x25d   : > { %6199 = vmatprep.subr.bf16.mxu1 %v6198_v7 }
 0x25e   : > { %5600 = vmatmul.mubr.f32.gmra.mrb[30].mxu1 %v7802_v30  ;;  %5369 = vmatmul.mubr.f32.gmra.mrb[52].mxu0 %v7821_v16 }
 0x25f   : > { %5602 = vmatprep.mubr.f32.mxu1 %v7807_v63  ;;  %5371 = vmatprep.mubr.f32.mxu0 %v7825_v29 }
 0x260   : > { %6201 = vmatpush3.bf16.msra.mxu1 %v6198_v7  ;;  %v3431_v7 = vld [vmem:[#allocation10 + $0x400] sm:$0xff] }
 0x261   : > { %6203 = vmatprep.subr.bf16.mxu1 %v6202_v20  ;;  %v6234_v4 = vpack.c.bf16 %v3432_v28, %v3431_v7  ;;  %v3439_v7 = vld [vmem:[#allocation10 + $0x440] sm:$0xff]  ;;  %v3440_v28 = vld [vmem:[#allocation10 + $0x448] sm:$0xff] }
 0x262   : > { %5603 = vmatmul.mubr.f32.gmra.mrb[0].mxu1 %v7812_v8  ;;  %5372 = vmatmul.mubr.f32.gmra.mrb[54].mxu0 %v7829_v36 }
 0x263   : > { %5605 = vmatprep.mubr.f32.mxu1 %v7817_v43  ;;  %5374 = vmatprep.mubr.f32.mxu0 %v7833_v48 }
 0x266   : > { %5606 = vmatmul.mubr.f32.gmra.mrb[2].mxu1 %v7821_v16  ;;  %5375 = vmatmul.mubr.f32.gmra.mrb[56].mxu0 %v7837_v61 }
 0x267   : > { %5608 = vmatprep.mubr.f32.mxu1 %v7825_v29  ;;  %5377 = vmatprep.mubr.f32.mxu0 %v7841_v6 }
 0x26a   : > { %5609 = vmatmul.mubr.f32.gmra.mrb[4].mxu1 %v7829_v36  ;;  %5378 = vmatmul.mubr.f32.gmra.mrb[58].mxu0 %v7845_v21 }
 0x26b   : > { %5611 = vmatprep.mubr.f32.mxu1 %v7833_v48  ;;  %5380 = vmatprep.mubr.f32.mxu0 %v7849_v14 }
 0x26e   : > { %5612 = vmatmul.mubr.f32.gmra.mrb[6].mxu1 %v7837_v61  ;;  %5381 = vmatmul.mubr.f32.gmra.mrb[60].mxu0 %v7853_v22 }
 0x26f   : > { %5614 = vmatprep.mubr.f32.mxu1 %v7841_v6  ;;  %5383 = vmatprep.mubr.f32.mxu0 %v7857_v38 }
 0x272   : > { %5615 = vmatmul.mubr.f32.gmra.mrb[8].mxu1 %v7845_v21  ;;  %5384 = vmatmul.mubr.f32.gmra.mrb[62].mxu0 %v7861_v42 }
 0x273   : > { %5617 = vmatprep.mubr.f32.mxu1 %v7849_v14  ;;  %5418 = vmatprep.mubr.f32.mxu0 %v8361_v50  ;;  %v2805_v50 = vld [vmem:[#allocation2 + $0x110] sm:$0xff] }
 0x276   : > { %5618 = vmatmul.mubr.f32.gmra.mrb[10].mxu1 %v7853_v22  ;;  %5419 = vmatmul.mubr.f32.vlgmr.msra.gmra.mrb[32].mxu0 %v7647_v13  ;;  %v6206_v13 = vpack.c.bf16 %v3128_v56, %v3127_v32  ;;  %v2808_v32 = vld [vmem:[#allocation2 + $0x138] sm:$0xff]  ;;  %v2809_v56 = vld [vmem:[#allocation2 + $0x140] sm:$0xff] }
 0x277   : > { %5620 = vmatprep.mubr.f32.mxu1 %v7857_v38  ;;  %5421 = vmatprep.mubr.f32.mxu0 %v8362_v62 }
 0x27a   : > { %5621 = vmatmul.mubr.f32.gmra.mrb[12].mxu1 %v7861_v42  ;;  %5422 = vmatmul.mubr.f32.gmra.mrb[34].mxu0 %v7654_v55 }
 0x27b   : > { %5623 = vmatprep.mubr.f32.mxu1 %v7872_v27  ;;  %5424 = vmatprep.mubr.f32.mxu0 %v7658_v17 }
 0x27e   : > { %5624 = vmatmul.mubr.f32.gmra.mrb[14].mxu1 %v7877_v10  ;;  %5425 = vmatmul.mubr.f32.gmra.mrb[36].mxu0 %v7661_v0 }
 0x27f   : > { %5658 = vmatprep.mubr.f32.mxu1 %v8362_v62  ;;  %5427 = vmatprep.mubr.f32.mxu0 %v7666_v23  ;;  %v2807_v62 = vld [vmem:[#allocation2 + $0x128] sm:$0xff] }
 0x282   : > { %5659 = vmatmul.mubr.f32.vlgmr.msra.gmra.mrb[16].mxu1 %v7654_v55  ;;  %5428 = vmatmul.mubr.f32.gmra.mrb[38].mxu0 %v8363_v39  ;;  %v6214_v55 = vpack.c.bf16 %v3132_v9, %v3131_v1  ;;  %v2815_v1 = vld [vmem:[#allocation2 + $0x188] sm:$0xff]  ;;  %v6673_v9 = vld [vmem:[#allocation2] sm:$0xff] }
 0x283   : > { %6205 = vmatpush3.bf16.msra.mxu1 %v6202_v20  ;;  %5661 = vmatprep.mubr.f32.mxu1 %v7658_v17  ;;  %v8364_v17 = vld [vmem:[#allocation31_spill] sm:$0xff]  ;;  %v2802_v20 = vld [vmem:[#allocation2 + $0xf0] sm:$0xff] }
 0x284   : > { %6207 = vmatprep.subr.bf16.mxu1 %v6206_v13  ;;  %5430 = vmatprep.mubr.f32.mxu0 %v7674_v35 }
 0x286   : > { %5662 = vmatmul.mubr.f32.gmra.mrb[18].mxu1 %v7661_v0  ;;  %5431 = vmatmul.mubr.f32.gmra.mrb[40].mxu0 %v7677_v37  ;;  %v6218_v0 = vpack.c.bf16 %v3134_v53, %v3133_v41  ;;  %v3092_v41 = vld [vmem:[#allocation2 + $0x31] sm:$0xff] }
 0x287   : > { %5664 = vmatprep.mubr.f32.mxu1 %v7666_v23  ;;  %6209 = vmatpush3.bf16.msra.mxu1 %v6206_v13  ;;  %v3135_v23 = vld [vmem:[#allocation10 + $0x3d0] sm:$0xff]  ;;  %v2810_v13 = vld [vmem:[#allocation2 + $0x150] sm:$0xff] }
 0x288   : > { %5433 = vmatprep.mubr.f32.mxu0 %v7682_v45  ;;  %6211 = vmatprep.subr.bf16.mxu1 %v6210_v11  ;;  %v6222_v31 = vpack.c.bf16 %v3136_v59, %v3135_v23  ;;  %v3435_v23 = vld [vmem:[#allocation10 + $0x420] sm:$0xff]  ;;  %v3436_v59 = vld [vmem:[#allocation10 + $0x428] sm:$0xff] }
 0x28a   : > { %5665 = vmatmul.mubr.f32.gmra.mrb[20].mxu1 %v8363_v39  ;;  %5434 = vmatmul.mubr.f32.gmra.mrb[42].mxu0 %v8364_v17  ;;  %v2813_v39 = vld [vmem:[#allocation2 + $0x170] sm:$0xff] }
 0x28b   : > { %5667 = vmatprep.mubr.f32.mxu1 %v7674_v35  ;;  %6213 = vmatpush3.bf16.msra.mxu1 %v6210_v11  ;;  %v3137_v35 = vld [vmem:[#allocation10 + $0x3e0] sm:$0xff]  ;;  %v2814_v11 = vld [vmem:[#allocation2 + $0x180] sm:$0xff] }
 0x28c   : > { %5436 = vmatprep.mubr.f32.mxu0 %v7689_v33  ;;  %6215 = vmatprep.subr.bf16.mxu1 %v6214_v55 }
 0x28e   : > { %5668 = vmatmul.mubr.f32.gmra.mrb[22].mxu1 %v7677_v37  ;;  %5437 = vmatmul.mubr.f32.gmra.mrb[44].mxu0 %v7693_v19  ;;  %v6226_v37 = vpack.c.bf16 %v3138_v51, %v3137_v35  ;;  %v6242_v35 = vpack.c.bf16 %v3436_v59, %v3435_v23  ;;  %v3095_v51 = vld [vmem:[#allocation2 + $0x51] sm:$0xff]  ;;  %v3110_v23 = vld [vmem:[#allocation2 + $0x109] sm:$0xff] }
 0x28f   : > { %5670 = vmatprep.mubr.f32.mxu1 %v7682_v45  ;;  %5439 = vmatprep.mubr.f32.mxu0 %v7697_v49  ;;  %v3140_v45 = vld [vmem:[#allocation10 + $0x3f8] sm:$0xff]  ;;  %v3111_v59 = vld [vmem:[#allocation2 + $0x111] sm:$0xff] }
 0x290   : > { %6217 = vmatpush3.bf16.msra.mxu1 %v6214_v55  ;;  %v6230_v46 = vpack.c.bf16 %v3140_v45, %v3139_v5  ;;  %v3433_v55 = vld [vmem:[#allocation10 + $0x410] sm:$0xff]  ;;  %v3438_v5 = vld [vmem:[#allocation10 + $0x438] sm:$0xff] }
 0x291   : > { %6219 = vmatprep.subr.bf16.mxu1 %v6218_v0  ;;  %v3096_v45 = vld [vmem:[#allocation2 + $0x61] sm:$0xff] }
 0x292   : > { %5671 = vmatmul.mubr.f32.gmra.mrb[24].mxu1 %v8364_v17  ;;  %5440 = vmatmul.mubr.f32.gmra.mrb[46].mxu0 %v7701_v25  ;;  %v3434_v17 = vld [vmem:[#allocation10 + $0x418] sm:$0xff] }
 0x293   : > { %5673 = vmatprep.mubr.f32.mxu1 %v7689_v33  ;;  %v2801_v33 = vld [vmem:[#allocation2 + $0xe0] sm:$0xff]  ;;  %v6238_v53 = vpack.c.bf16 %v3434_v17, %v3433_v55  ;;  %v3105_v55 = vld [vmem:[#allocation2 + $0xc9] sm:$0xff] }
 0x294   : > { %6221 = vmatpush3.bf16.msra.mxu1 %v6218_v0  ;;  %v3093_v0 = vld [vmem:[#allocation2 + $0x39] sm:$0xff] }
 0x295   : > { %6223 = vmatprep.subr.bf16.mxu1 %v6222_v31  ;;  %v3106_v17 = vld [vmem:[#allocation2 + $0xd9] sm:$0xff] }
 0x296   : > { %5674 = vmatmul.mubr.f32.gmra.mrb[26].mxu1 %v7693_v19  ;;  %v2803_v19 = vld [vmem:[#allocation2 + $0xf8] sm:$0xff] }
 0x297   : > { %5676 = vmatprep.mubr.f32.mxu1 %v7697_v49  ;;  %v2804_v49 = vld [vmem:[#allocation2 + $0x108] sm:$0xff] }
 0x298   : > { %6225 = vmatpush3.bf16.msra.mxu1 %v6222_v31  ;;  %v3094_v31 = vld [vmem:[#allocation2 + $0x49] sm:$0xff] }
 0x299   : > { %6227 = vmatprep.subr.bf16.mxu1 %v6226_v37 }
 0x29a   : > { %5677 = vmatmul.mubr.f32.gmra.mrb[28].mxu1 %v7701_v25  ;;  %v2806_v25 = vld [vmem:[#allocation2 + $0x120] sm:$0xff] }
 0x29b   : > { %5679 = vmatprep.mubr.f32.mxu1 %v2800_v60  ;;  %v3097_v60 = vld [vmem:[#allocation2 + $0x69] sm:$0xff] }
 0x29c   : > { %6229 = vmatpush3.bf16.msra.mxu1 %v6226_v37  ;;  %v3437_v37 = vld [vmem:[#allocation10 + $0x430] sm:$0xff] }
 0x29d   : > { %6231 = vmatprep.subr.bf16.mxu1 %v6230_v46 }
 0x29e   : > { %5680 = vmatmul.mubr.f32.gmra.mrb[30].mxu1 %v2801_v33  ;;  %v3098_v33 = vld [vmem:[#allocation2 + $0x79] sm:$0xff] }
 0x29f   : > { %5682 = vmatprep.mubr.f32.mxu1 %v2802_v20  ;;  %v3099_v20 = vld [vmem:[#allocation2 + $0x81] sm:$0xff] }
 0x2a0   : > { %6233 = vmatpush3.bf16.msra.mxu1 %v6230_v46  ;;  %v6246_v46 = vpack.c.bf16 %v3438_v5, %v3437_v37  ;;  %v3880_v37 = vld [vmem:[#allocation12 + $0x10] sm:$0xff] }
 0x2a1   : > { %6235 = vmatprep.subr.bf16.mxu1 %v6234_v4 }
 0x2a2   : > { %5683 = vmatmul.mubr.f32.gmra.mrb[0].mxu1 %v2803_v19  ;;  %v3441_v19 = vld [vmem:[#allocation10 + $0x450] sm:$0xff] }
 0x2a3   : > { %5685 = vmatprep.mubr.f32.mxu1 %v2804_v49  ;;  %v3442_v49 = vld [vmem:[#allocation10 + $0x458] sm:$0xff] }
 0x2a6   : > { %5686 = vmatmul.mubr.f32.gmra.mrb[2].mxu1 %v2805_v50  ;;  %v3100_v50 = vld [vmem:[#allocation2 + $0x91] sm:$0xff] }
 0x2a7   : > { %5688 = vmatprep.mubr.f32.mxu1 %v2806_v25  ;;  %v6254_v25 = vpack.c.bf16 %v3442_v49, %v3441_v19  ;;  %v3885_v19 = vld [vmem:[#allocation12 + $0x38] sm:$0xff] }
 0x2a8   : > { %v3115_v49 = vld [vmem:[#allocation2 + $0x141] sm:$0xff] }
 0x2aa   : > { %5689 = vmatmul.mubr.f32.gmra.mrb[4].mxu1 %v2807_v62  ;;  %v3101_v62 = vld [vmem:[#allocation2 + $0x99] sm:$0xff] }
 0x2ab   : > { %5691 = vmatprep.mubr.f32.mxu1 %v2808_v32  ;;  %v3443_v32 = vld [vmem:[#allocation10 + $0x460] sm:$0xff] }
 0x2ae   : > { %5692 = vmatmul.mubr.f32.gmra.mrb[6].mxu1 %v2809_v56  ;;  %v3444_v56 = vld [vmem:[#allocation10 + $0x468] sm:$0xff] }
 0x2af   : > { %5694 = vmatprep.mubr.f32.mxu1 %v2810_v13  ;;  %v3102_v13 = vld [vmem:[#allocation2 + $0xa9] sm:$0xff] }
 0x2b2   : > { %5695 = vmatmul.mubr.f32.gmra.mrb[8].mxu1 %v2811_v58  ;;  %v6258_v58 = vpack.c.bf16 %v3444_v56, %v3443_v32  ;;  %v3887_v32 = vld [vmem:[#allocation12 + $0x48] sm:$0xff] }
 0x2b3   : > { %5697 = vmatprep.mubr.f32.mxu1 %v2812_v3  ;;  %v3103_v3 = vld [vmem:[#allocation2 + $0xb1] sm:$0xff]  ;;  %v3117_v56 = vld [vmem:[#allocation2 + $0x159] sm:$0xff] }
 0x2b6   : > { %5698 = vmatmul.mubr.f32.gmra.mrb[10].mxu1 %v2813_v39  ;;  %v3445_v39 = vld [vmem:[#allocation10 + $0x470] sm:$0xff] }
 0x2b7   : > { %5700 = vmatprep.mubr.f32.mxu1 %v2814_v11  ;;  %v3446_v11 = vld [vmem:[#allocation10 + $0x478] sm:$0xff] }
 0x2ba   : > { %5701 = vmatmul.mubr.f32.gmra.mrb[12].mxu1 %v2815_v1  ;;  %v3104_v1 = vld [vmem:[#allocation2 + $0xc1] sm:$0xff] }
 0x2bb   : > { %5703 = vmatprep.mubr.f32.mxu1 %v6673_v9 }
 0x2be   : > { %5704 = vmatmul.mubr.f32.gmra.mrb[14].mxu1 %v6673_v9  ;;  %v6262_v9 = vpack.c.bf16 %v3446_v11, %v3445_v39  ;;  %v3889_v39 = vld [vmem:[#allocation12 + $0x58] sm:$0xff]  ;;  %v3119_v11 = vld [vmem:[#allocation2 + $0x171] sm:$0xff] }
 0x2bf   : > { %5738 = vmatprep.mubr.f32.mxu1 %v3092_v41  ;;  %v3107_v41 = vld [vmem:[#allocation2 + $0xe1] sm:$0xff] }
 0x2c2   : > { %5739 = vmatmul.mubr.f32.vlgmr.msra.gmra.mrb[16].mxu1 %v3093_v0  ;;  %v3109_v0 = vld [vmem:[#allocation2 + $0xf9] sm:$0xff] }
 0x2c3   : > { %6237 = vmatpush3.bf16.msra.mxu1 %v6234_v4  ;;  %5741 = vmatprep.mubr.f32.mxu1 %v3094_v31  ;;  %v6250_v4 = vpack.c.bf16 %v3440_v28, %v3439_v7  ;;  %v3112_v31 = vld [vmem:[#allocation2 + $0x121] sm:$0xff]  ;;  %v3883_v7 = vld [vmem:[#allocation12 + $0x28] sm:$0xff]  ;;  %v3113_v28 = vld [vmem:[#allocation2 + $0x129] sm:$0xff] }
 0x2c4   : > { %6239 = vmatprep.subr.bf16.mxu1 %v6238_v53 }
 0x2c6   : > { %5742 = vmatmul.mubr.f32.gmra.mrb[18].mxu1 %v3095_v51  ;;  %v3879_v51 = vld [vmem:[#allocation12 + $0x8] sm:$0xff] }
 0x2c7   : > { %5744 = vmatprep.mubr.f32.mxu1 %v3096_v45  ;;  %6241 = vmatpush3.bf16.msra.mxu1 %v6238_v53  ;;  %v3108_v53 = vld [vmem:[#allocation2 + $0xf1] sm:$0xff]  ;;  %v3881_v45 = vld [vmem:[#allocation12 + $0x18] sm:$0xff] }
 0x2c8   : > { %6243 = vmatprep.subr.bf16.mxu1 %v6242_v35 }
 0x2ca   : > { %5745 = vmatmul.mubr.f32.gmra.mrb[20].mxu1 %v3097_v60  ;;  %v3882_v60 = vld [vmem:[#allocation12 + $0x20] sm:$0xff] }
 0x2cb   : > { %5747 = vmatprep.mubr.f32.mxu1 %v3098_v33  ;;  %6245 = vmatpush3.bf16.msra.mxu1 %v6242_v35  ;;  %v3878_v35 = vld [vmem:[#allocation12] sm:$0xff]  ;;  %v3114_v33 = vld [vmem:[#allocation2 + $0x139] sm:$0xff] }
 0x2cc   : > { %6247 = vmatprep.subr.bf16.mxu1 %v6246_v46  ;;  %v6266_v5 = vpack.c.bf16 %v3879_v51, %v3878_v35 }
 0x2ce   : > { %5748 = vmatmul.mubr.f32.gmra.mrb[22].mxu1 %v3099_v20  ;;  %6267 = vmatprep.subr.bf16.mxu0 %v6266_v5  ;;  %v3884_v20 = vld [vmem:[#allocation12 + $0x30] sm:$0xff] }
 0x2cf   : > { %5750 = vmatprep.mubr.f32.mxu1 %v3100_v50  ;;  %6249 = vmatpush3.bf16.msra.mxu1 %v6246_v46  ;;  %v6270_v46 = vpack.c.bf16 %v3881_v45, %v3880_v37  ;;  %v3116_v50 = vld [vmem:[#allocation2 + $0x151] sm:$0xff] }
 0x2d0   : > { %6251 = vmatprep.subr.bf16.mxu1 %v6250_v4  ;;  %6269 = vmatpush3.bf16.msra.mxu0 %v6266_v5 }
 0x2d1   : > { %6271 = vmatprep.subr.bf16.mxu0 %v6270_v46 }
 0x2d2   : > { %5751 = vmatmul.mubr.f32.gmra.mrb[24].mxu1 %v3101_v62  ;;  %v3886_v62 = vld [vmem:[#allocation12 + $0x40] sm:$0xff] }
 0x2d3   : > { %5753 = vmatprep.mubr.f32.mxu1 %v3102_v13  ;;  %6253 = vmatpush3.bf16.msra.mxu1 %v6250_v4  ;;  %v6274_v4 = vpack.c.bf16 %v3883_v7, %v3882_v60  ;;  %v3118_v13 = vld [vmem:[#allocation2 + $0x169] sm:$0xff]  ;;  %v7982_v60 = vld [vmem:[%s8278_s6] ss:$0 sm:$0xff] }
 0x2d4   : > { %6255 = vmatprep.subr.bf16.mxu1 %v6254_v25  ;;  %6273 = vmatpush3.bf16.msra.mxu0 %v6270_v46 }
 0x2d5   : > { %6275 = vmatprep.subr.bf16.mxu0 %v6274_v4 }
 0x2d6   : > { %5754 = vmatmul.mubr.f32.gmra.mrb[26].mxu1 %v3103_v3  ;;  %v3888_v3 = vld [vmem:[#allocation12 + $0x50] sm:$0xff] }
 0x2d7   : > { %5756 = vmatprep.mubr.f32.mxu1 %v3104_v1  ;;  %6257 = vmatpush3.bf16.msra.mxu1 %v6254_v25  ;;  %v6278_v25 = vpack.c.bf16 %v3885_v19, %v3884_v20  ;;  %v3120_v1 = vld [vmem:[#allocation2 + $0x181] sm:$0xff] }
 0x2d8   : > { %6259 = vmatprep.subr.bf16.mxu1 %v6258_v58  ;;  %6277 = vmatpush3.bf16.msra.mxu0 %v6274_v4 }
 0x2d9   : > { %6279 = vmatprep.subr.bf16.mxu0 %v6278_v25 }
 0x2da   : > { %5757 = vmatmul.mubr.f32.gmra.mrb[28].mxu1 %v3105_v55  ;;  %v3122_v55 = vld [vmem:[#allocation2 + $0x199] sm:$0xff] }
 0x2db   : > { %5759 = vmatprep.mubr.f32.mxu1 %v3106_v17  ;;  %6261 = vmatpush3.bf16.msra.mxu1 %v6258_v58  ;;  %v6282_v58 = vpack.c.bf16 %v3887_v32, %v3886_v62  ;;  %v3121_v17 = vld [vmem:[#allocation2 + $0x189] sm:$0xff] }
 0x2dc   : > { %6263 = vmatprep.subr.bf16.mxu1 %v6262_v9  ;;  %6281 = vmatpush3.bf16.msra.mxu0 %v6278_v25 }
 0x2dd   : > { %6283 = vmatprep.subr.bf16.mxu0 %v6282_v58 }
 0x2de   : > { %5760 = vmatmul.mubr.f32.gmra.mrb[30].mxu1 %v3107_v41  ;;  %v3123_v41 = vld [vmem:[#allocation2 + $0x1a1] sm:$0xff] }
 0x2df   : > { %5762 = vmatprep.mubr.f32.mxu1 %v3108_v53  ;;  %6265 = vmatpush3.bf16.msra.mxu1 %v6262_v9  ;;  %v6286_v9 = vpack.c.bf16 %v3889_v39, %v3888_v3 }
 0x2e0   : > { %6285 = vmatpush3.bf16.msra.mxu0 %v6282_v58 }
 0x2e1   : > { %6287 = vmatprep.subr.bf16.mxu0 %v6286_v9 }
 0x2e2   : > { %5763 = vmatmul.mubr.f32.gmra.mrb[0].mxu1 %v3109_v0  ;;  %v3892_v0 = vld [vmem:[#allocation12 + $0x70] sm:$0xff] }
 0x2e3   : > { %5765 = vmatprep.mubr.f32.mxu1 %v3110_v23  ;;  %v3893_v23 = vld [vmem:[#allocation12 + $0x78] sm:$0xff] }
 0x2e4   : > { %6289 = vmatpush3.bf16.msra.mxu0 %v6286_v9 }
 0x2e6   : > { %5766 = vmatmul.mubr.f32.gmra.mrb[2].mxu1 %v3111_v59 }
 0x2e7   : > { %5768 = vmatprep.mubr.f32.mxu1 %v3112_v31  ;;  %v6294_v31 = vpack.c.bf16 %v3893_v23, %v3892_v0 }
 0x2ea   : > { %5769 = vmatmul.mubr.f32.gmra.mrb[4].mxu1 %v3113_v28 }
 0x2eb   : > { %5771 = vmatprep.mubr.f32.mxu1 %v3114_v33  ;;  %v7987_v33 = vld [vmem:[%s8365_s16] ss:$0 sm:$0xff]  ;;  %s6922_s16 = smov [#allocation13]  }
 0x2ec   : > { %s6822_s17 = sshll.u32 %s6922_s16, 4  ;;  %s6823_s17 = int_to_ptr.vmem [resolvable:$false] %s6822_s17 }
 0x2ed   : > { %s6824_s13 = scalar_lea.vmem %s6823_s17, 8192  ;;  %p6825_p13 = scmp.lt.s32.totalorder %s8221_s25, %s6823_s17 }
 0x2ee   : > { %5772 = vmatmul.mubr.f32.gmra.mrb[6].mxu1 %v3115_v49  ;;  %p6826_p3 = scmp.lt.s32.totalorder %s6824_s13, %s6818_s15 }
 0x2ef   : > { %5774 = vmatprep.mubr.f32.mxu1 %v3116_v50 }
 0x2f0   : > { %p6827_p5 = por %p6826_p3, %p6825_p13 }
 0x2f2   : > { %5775 = vmatmul.mubr.f32.gmra.mrb[8].mxu1 %v3117_v56  ;;  %p6828_p7 = pnand %p6827_p5, %p6821_p1 }
 0x2f3   : > { %5777 = vmatprep.mubr.f32.mxu1 %v3118_v13 }
 0x2f6   : > { %5778 = vmatmul.mubr.f32.gmra.mrb[10].mxu1 %v3119_v11 }
 0x2f7   : > { %5780 = vmatprep.mubr.f32.mxu1 %v3120_v1 }
 0x2fa   : > { %5781 = vmatmul.mubr.f32.gmra.mrb[12].mxu1 %v3121_v17 }
 0x2fb   : > { %5783 = vmatprep.mubr.f32.mxu1 %v3122_v55 }
 0x2fe   : > { %5784 = vmatmul.mubr.f32.gmra.mrb[14].mxu1 %v3123_v41 }
 0x2ff   : > { %5818 = vmatprep.mubr.f32.mxu1 %v7740_v44 }
 0x302   : > { %5819 = vmatmul.mubr.f32.vlgmr.msra.gmra.mrb[16].mxu1 %v7746_v57 }
 0x303   : > { %5821 = vmatprep.mubr.f32.mxu1 %v7752_v18 }
 0x306   : > { %5822 = vmatmul.mubr.f32.gmra.mrb[18].mxu1 %v7756_v24 }
 0x307   : > { %5824 = vmatprep.mubr.f32.mxu1 %v7761_v52 }
 0x30a   : > { %5825 = vmatmul.mubr.f32.gmra.mrb[20].mxu1 %v7764_v2 }
 0x30b   : > { %5827 = vmatprep.mubr.f32.mxu1 %v7770_v12 }
 0x30e   : > { %5828 = vmatmul.mubr.f32.gmra.mrb[22].mxu1 %v7773_v40 }
 0x30f   : > { %5830 = vmatprep.mubr.f32.mxu1 %v7779_v26  ;;  %v3428_v26 = vld [vmem:[#allocation2 + $0x19a] sm:$0xff] }
 0x312   : > { %5831 = vmatmul.mubr.f32.gmra.mrb[24].mxu1 %v7782_v34 }
 0x313   : > { %5833 = vmatprep.mubr.f32.mxu1 %v7787_v47 }
 0x316   : > { %5834 = vmatmul.mubr.f32.gmra.mrb[26].mxu1 %v7792_v15  ;;  %v3429_v15 = vld [vmem:[#allocation2 + $0x1a2] sm:$0xff] }
 0x317   : > { %5836 = vmatprep.mubr.f32.mxu1 %v7797_v54 }
 0x31a   : > { %5837 = vmatmul.mubr.f32.gmra.mrb[28].mxu1 %v7802_v30 }
 0x31b   : > { %5839 = vmatprep.mubr.f32.mxu1 %v7807_v63 }
 0x31e   : > { %5840 = vmatmul.mubr.f32.gmra.mrb[30].mxu1 %v7812_v8 }
 0x31f   : > { %5842 = vmatprep.mubr.f32.mxu1 %v7817_v43 }
 0x322   : > { %5843 = vmatmul.mubr.f32.gmra.mrb[0].mxu1 %v7821_v16 }
 0x323   : > { %5845 = vmatprep.mubr.f32.mxu1 %v7825_v29 }
 0x326   : > { %5846 = vmatmul.mubr.f32.gmra.mrb[2].mxu1 %v7829_v36 }
 0x327   : > { %5848 = vmatprep.mubr.f32.mxu1 %v7833_v48 }
 0x329   : > { %v7926_v44 = vpop.f32.mrb[48].mxu0 }
 0x32a   : > { %5849 = vmatmul.mubr.f32.gmra.mrb[4].mxu1 %v7837_v61  ;;  %v7929_v57 = vpop.f32.mrb[49].mxu0 }
 0x32b   : > { %5851 = vmatprep.mubr.f32.mxu1 %v7841_v6 }
 0x32d   : > { %v7932_v18 = vpop.f32.mrb[50].mxu0 }
 0x32e   : > { %5852 = vmatmul.mubr.f32.gmra.mrb[6].mxu1 %v7845_v21  ;;  %v7935_v24 = vpop.f32.mrb[51].mxu0 }
 0x32f   : > { %5854 = vmatprep.mubr.f32.mxu1 %v7849_v14 }
 0x331   : > { %v7938_v52 = vpop.f32.mrb[52].mxu0 }
 0x332   : > { %5855 = vmatmul.mubr.f32.gmra.mrb[8].mxu1 %v7853_v22  ;;  %v7941_v2 = vpop.f32.mrb[53].mxu0 }
 0x333   : > { %5857 = vmatprep.mubr.f32.mxu1 %v7857_v38  ;;  %v3890_v38 = vld [vmem:[#allocation12 + $0x60] sm:$0xff] }
 0x335   : > { %v7944_v12 = vpop.f32.mrb[54].mxu0 }
 0x336   : > { %5858 = vmatmul.mubr.f32.gmra.mrb[10].mxu1 %v7861_v42  ;;  %v7947_v40 = vpop.f32.mrb[55].mxu0  ;;  %v3891_v42 = vld [vmem:[#allocation12 + $0x68] sm:$0xff] }
 0x337   : > { %5860 = vmatprep.mubr.f32.mxu1 %v7872_v27 }
 0x339   : > { %v7950_v34 = vpop.f32.mrb[56].mxu0 }
 0x33a   : > { %5861 = vmatmul.mubr.f32.gmra.mrb[12].mxu1 %v7877_v10  ;;  %v7953_v47 = vpop.f32.mrb[57].mxu0  ;;  %v6290_v10 = vpack.c.bf16 %v3891_v42, %v3890_v38 }
 0x33b   : > { %5863 = vmatprep.mubr.f32.mxu1 %v3428_v26 }
 0x33c   : > { %6291 = vmatprep.subr.bf16.mxu0 %v6290_v10 }
 0x33d   : > { %v7955_v54 = vpop.f32.mrb[58].mxu0  ;;  %6293 = vmatpush3.bf16.msra.mxu0 %v6290_v10 }
 0x33e   : > { %5864 = vmatmul.mubr.f32.gmra.mrb[14].mxu1 %v3429_v15  ;;  %v7957_v30 = vpop.f32.mrb[59].mxu0  ;;  %6295 = vmatprep.subr.bf16.mxu0 %v6294_v31 }
 0x341   : > { %v7959_v63 = vpop.f32.mrb[60].mxu0  ;;  %6297 = vmatpush3.bf16.msra.mxu0 %v6294_v31 }
 0x342   : > { %v7961_v8 = vpop.f32.mrb[61].mxu0 }
 0x345   : > { %v7963_v43 = vpop.f32.mrb[62].mxu0 }
 0x346   : > { %v7965_v16 = vpop.f32.mrb[63].mxu0 }
 0x349   : > { %v5420_v29 = vpop.f32.mrb[32].mxu0 }
 0x34a   : > { %v1982_v36 = vpop.f32.mrb[33].mxu0 }
 0x34d   : > { %v5423_v48 = vpop.f32.mrb[34].mxu0 }
 0x34e   : > { %v1992_v61 = vpop.f32.mrb[35].mxu0 }
 0x351   : > { %v5426_v6 = vpop.f32.mrb[36].mxu0 }
 0x352   : > { %v2002_v21 = vpop.f32.mrb[37].mxu0 }
 0x355   : > { %v5429_v14 = vpop.f32.mrb[38].mxu0 }
 0x356   : > { %v2012_v22 = vpop.f32.mrb[39].mxu0 }
 0x359   : > { %v5432_v27 = vpop.f32.mrb[40].mxu0 }
 0x35a   : > { %v2022_v53 = vpop.f32.mrb[41].mxu0 }
 0x35d   : > { %v7967_v59 = vpop.f32.mrb[42].mxu0 }
 0x35e   : > { %v7969_v35 = vpop.f32.mrb[43].mxu0 }
 0x361   : > { %v7971_v51 = vpop.f32.mrb[44].mxu0 }
 0x362   : > { %v7973_v37 = vpop.f32.mrb[45].mxu0 }
 0x365   : > { %v7975_v5 = vpop.f32.mrb[46].mxu0 }
 0x366   : > { %v7977_v45 = vpop.f32.mrb[47].mxu0 }
 0x3d5   : > { %v5820_v46 = vpop.f32.mrb[16].mxu1 }
 0x3d6   : > { %v6314_v7 = vadd.f32 %v5820_v46, %v5420_v29  ;;  %v3513_v28 = vpop.f32.mrb[17].mxu1 }
 0x3d7   : > { %v6315_v4 = vadd.f32 %v3513_v28, %v1982_v36 }
 0x3d8   : > { %v3712_v20 = vmul.f32 %v6314_v7, %v7982_v60 }
 0x3d9   : > { %v3711_v19 = vmul.f32 %v6315_v4, %v7982_v60  ;;  %v5823_v49 = vpop.f32.mrb[18].mxu1 }
 0x3da   : > { %v3751_v50 = vadd.f32 %v7987_v33, %v3712_v20  ;;  %v6316_v25 = vadd.f32 %v5823_v49, %v5423_v48  ;;  %v3523_v62 = vpop.f32.mrb[19].mxu1 }
 0x3db   : > { %v6317_v32 = vadd.f32 %v3523_v62, %v1992_v61  ;;  %v3750_v56 = vadd.f32 %v7987_v33, %v3711_v19 }
 0x3dc   : > { %v3714_v13 = vmul.f32 %v6316_v25, %v7982_v60  ;;  %v3783_v11 = vmax.f32 %v3751_v50, 0.0 }
 0x3dd   : > { %v3713_v58 = vmul.f32 %v6317_v32, %v7982_v60  ;;  %v5826_v3 = vpop.f32.mrb[20].mxu1  ;;  %v3782_v39 = vmax.f32 %v3750_v56, 0.0 }
 0x3de   : > { %v6318_v1 = vadd.f32 %v5826_v3, %v5426_v6  ;;  %v3533_v9 = vpop.f32.mrb[21].mxu1  ;;  %v3753_v55 = vadd.f32 %v7987_v33, %v3714_v13 }
 0x3df   : > { %v6319_v17 = vadd.f32 %v3533_v9, %v2002_v21  ;;  %5898 = vmatprep.mubr.f32.mxu0 %v3782_v39  ;;  %v3752_v41 = vadd.f32 %v7987_v33, %v3713_v58 }
 0x3e0   : > { %v3716_v26 = vmul.f32 %v6318_v1, %v7982_v60  ;;  %5899 = vmatmul.mubr.f32.vlgmr.msra.gmra.mrb[64].mxu0 %v3783_v11  ;;  %v3785_v38 = vmax.f32 %v3753_v55, 0.0 }
 0x3e1   : > { %v3715_v15 = vmul.f32 %v6319_v17, %v7982_v60  ;;  %v5829_v29 = vpop.f32.mrb[22].mxu1  ;;  %v3784_v36 = vmax.f32 %v3752_v41, 0.0 }
 0x3e2   : > { %v6320_v48 = vadd.f32 %v5829_v29, %v5429_v14  ;;  %v3543_v61 = vpop.f32.mrb[23].mxu1  ;;  %v3755_v42 = vadd.f32 %v7987_v33, %v3716_v26 }
 0x3e3   : > { %v6321_v6 = vadd.f32 %v3543_v61, %v2012_v22  ;;  %5901 = vmatprep.mubr.f32.mxu0 %v3784_v36  ;;  %v3754_v10 = vadd.f32 %v7987_v33, %v3715_v15 }
 0x3e4   : > { %v3718_v21 = vmul.f32 %v6320_v48, %v7982_v60  ;;  %5902 = vmatmul.mubr.f32.gmra.mrb[66].mxu0 %v3785_v38  ;;  %v3787_v28 = vmax.f32 %v3755_v42, 0.0 }
 0x3e5   : > { %v3717_v0 = vmul.f32 %v6321_v6, %v7982_v60  ;;  %v5832_v23 = vpop.f32.mrb[24].mxu1  ;;  %v3786_v31 = vmax.f32 %v3754_v10, 0.0 }
 0x3e6   : > { %v6322_v46 = vadd.f32 %v5832_v23, %v5432_v27  ;;  %v3553_v7 = vpop.f32.mrb[25].mxu1  ;;  %v3757_v14 = vadd.f32 %v7987_v33, %v3718_v21 }
 0x3e7   : > { %v6323_v4 = vadd.f32 %v3553_v7, %v2022_v53  ;;  %5904 = vmatprep.mubr.f32.mxu0 %v3786_v31  ;;  %v3756_v20 = vadd.f32 %v7987_v33, %v3717_v0 }
 0x3e8   : > { %v3720_v22 = vmul.f32 %v6322_v46, %v7982_v60  ;;  %5905 = vmatmul.mubr.f32.gmra.mrb[68].mxu0 %v3787_v28  ;;  %v3789_v32 = vmax.f32 %v3757_v14, 0.0 }
 0x3e9   : > { %v3719_v19 = vmul.f32 %v6323_v4, %v7982_v60  ;;  %v5835_v49 = vpop.f32.mrb[26].mxu1  ;;  %v3788_v50 = vmax.f32 %v3756_v20, 0.0 }
 0x3ea   : > { %v6324_v25 = vadd.f32 %v5835_v49, %v7967_v59  ;;  %v3563_v62 = vpop.f32.mrb[27].mxu1  ;;  %v3759_v27 = vadd.f32 %v7987_v33, %v3720_v22 }
 0x3eb   : > { %v6325_v56 = vadd.f32 %v3563_v62, %v7969_v35  ;;  %5907 = vmatprep.mubr.f32.mxu0 %v3788_v50  ;;  %v3758_v53 = vadd.f32 %v7987_v33, %v3719_v19 }
 0x3ec   : > { %v3722_v13 = vmul.f32 %v6324_v25, %v7982_v60  ;;  %5908 = vmatmul.mubr.f32.gmra.mrb[70].mxu0 %v3789_v32  ;;  %v3791_v59 = vmax.f32 %v3759_v27, 0.0 }
 0x3ed   : > { %v3721_v58 = vmul.f32 %v6325_v56, %v7982_v60  ;;  %v5838_v3 = vpop.f32.mrb[28].mxu1  ;;  %v3790_v39 = vmax.f32 %v3758_v53, 0.0 }
 0x3ee   : > { %v6326_v11 = vadd.f32 %v5838_v3, %v7971_v51  ;;  %v3573_v1 = vpop.f32.mrb[29].mxu1  ;;  %v3761_v9 = vadd.f32 %v7987_v33, %v3722_v13 }
 0x3ef   : > { %v6327_v55 = vadd.f32 %v3573_v1, %v7973_v37  ;;  %5910 = vmatprep.mubr.f32.mxu0 %v3790_v39  ;;  %v3760_v35 = vadd.f32 %v7987_v33, %v3721_v58 }
 0x3f0   : > { %v3724_v17 = vmul.f32 %v6326_v11, %v7982_v60  ;;  %5911 = vmatmul.mubr.f32.gmra.mrb[72].mxu0 %v3791_v59  ;;  %v3793_v51 = vmax.f32 %v3761_v9, 0.0 }
 0x3f1   : > { %v3723_v41 = vmul.f32 %v6327_v55, %v7982_v60  ;;  %v5841_v26 = vpop.f32.mrb[30].mxu1  ;;  %v3792_v15 = vmax.f32 %v3760_v35, 0.0 }
 0x3f2   : > { %v6328_v29 = vadd.f32 %v5841_v26, %v7975_v5  ;;  %v3583_v36 = vpop.f32.mrb[31].mxu1  ;;  %v3763_v48 = vadd.f32 %v7987_v33, %v3724_v17 }
 0x3f3   : > { %v6329_v61 = vadd.f32 %v3583_v36, %v7977_v45  ;;  %5913 = vmatprep.mubr.f32.mxu0 %v3792_v15  ;;  %v3762_v37 = vadd.f32 %v7987_v33, %v3723_v41 }
 0x3f4   : > { %v3726_v38 = vmul.f32 %v6328_v29, %v7982_v60  ;;  %5914 = vmatmul.mubr.f32.gmra.mrb[74].mxu0 %v3793_v51  ;;  %v3795_v5 = vmax.f32 %v3763_v48, 0.0 }
 0x3f5   : > { %v3725_v42 = vmul.f32 %v6329_v61, %v7982_v60  ;;  %v5844_v6 = vpop.f32.mrb[0].mxu1  ;;  %v3794_v10 = vmax.f32 %v3762_v37, 0.0 }
 0x3f6   : > { %v6330_v21 = vadd.f32 %v5844_v6, %v7926_v44  ;;  %v3593_v0 = vpop.f32.mrb[1].mxu1  ;;  %v3765_v23 = vadd.f32 %v7987_v33, %v3726_v38 }
 0x3f7   : > { %v6331_v31 = vadd.f32 %v3593_v0, %v7929_v57  ;;  %5916 = vmatprep.mubr.f32.mxu0 %v3794_v10  ;;  %v3764_v45 = vadd.f32 %v7987_v33, %v3725_v42 }
 0x3f8   : > { %v3728_v46 = vmul.f32 %v6330_v21, %v7982_v60  ;;  %5917 = vmatmul.mubr.f32.gmra.mrb[76].mxu0 %v3795_v5  ;;  %v3797_v44 = vmax.f32 %v3765_v23, 0.0 }
 0x3f9   : > { %v3727_v7 = vmul.f32 %v6331_v31, %v7982_v60  ;;  %v5847_v28 = vpop.f32.mrb[2].mxu1  ;;  %v3796_v14 = vmax.f32 %v3764_v45, 0.0 }
 0x3fa   : > { %v6332_v4 = vadd.f32 %v5847_v28, %v7932_v18  ;;  %v3603_v20 = vpop.f32.mrb[3].mxu1  ;;  %v3767_v22 = vadd.f32 %v7987_v33, %v3728_v46 }
 0x3fb   : > { %v6333_v19 = vadd.f32 %v3603_v20, %v7935_v24  ;;  %5919 = vmatprep.mubr.f32.mxu0 %v3796_v14  ;;  %v3766_v57 = vadd.f32 %v7987_v33, %v3727_v7 }
 0x3fc   : > { %v3730_v49 = vmul.f32 %v6332_v4, %v7982_v60  ;;  %5920 = vmatmul.mubr.f32.gmra.mrb[78].mxu0 %v3797_v44  ;;  %v3799_v18 = vmax.f32 %v3767_v22, 0.0 }
 0x3fd   : > { %v3729_v50 = vmul.f32 %v6333_v19, %v7982_v60  ;;  %v5850_v25 = vpop.f32.mrb[4].mxu1  ;;  %v3798_v62 = vmax.f32 %v3766_v57, 0.0 }
 0x3fe   : > { %v6334_v32 = vadd.f32 %v5850_v25, %v7938_v52  ;;  %v3613_v27 = vpop.f32.mrb[5].mxu1  ;;  %v3769_v56 = vadd.f32 %v7987_v33, %v3730_v49 }
 0x3ff   : > { %v6335_v53 = vadd.f32 %v3613_v27, %v7941_v2  ;;  %5922 = vmatprep.mubr.f32.mxu0 %v3798_v62  ;;  %v3768_v24 = vadd.f32 %v7987_v33, %v3729_v50 }
 0x400   : > { %v3732_v13 = vmul.f32 %v6334_v32, %v7982_v60  ;;  %5923 = vmatmul.mubr.f32.gmra.mrb[80].mxu0 %v3799_v18  ;;  %v3801_v52 = vmax.f32 %v3769_v56, 0.0  ;;  %v8078_v18 = vld [vmem:[%s8366_s0] ss:$0 sm:$0xff] }
 0x401   : > { %v3731_v58 = vmul.f32 %v6335_v53, %v7982_v60  ;;  %v5853_v3 = vpop.f32.mrb[6].mxu1  ;;  %v3800_v39 = vmax.f32 %v3768_v24, 0.0  ;;  %v8083_v56 = vld [vmem:[%s8367_s27] ss:$0 sm:$0xff]  ;;  %v4198_v24 = vld [vmem:[%s7257_s12 + $0x8] sm:$0xff] }
 0x402   : > { %v6336_v11 = vadd.f32 %v5853_v3, %v7944_v12  ;;  %v3623_v1 = vpop.f32.mrb[7].mxu1  ;;  %v3771_v59 = vadd.f32 %v7987_v33, %v3732_v13  ;;  %v4197_v3 = vld [vmem:[%s7257_s12] sm:$0xff] }
 0x403   : > { %v6337_v9 = vadd.f32 %v3623_v1, %v7947_v40  ;;  %5925 = vmatprep.mubr.f32.mxu0 %v3800_v39  ;;  %v3770_v2 = vadd.f32 %v7987_v33, %v3731_v58 }
 0x404   : > { %v3734_v55 = vmul.f32 %v6336_v11, %v7982_v60  ;;  %5926 = vmatmul.mubr.f32.gmra.mrb[82].mxu0 %v3801_v52  ;;  %v3803_v12 = vmax.f32 %v3771_v59, 0.0 }
 0x405   : > { %v3733_v35 = vmul.f32 %v6337_v9, %v7982_v60  ;;  %v5856_v17 = vpop.f32.mrb[8].mxu1  ;;  %v3802_v41 = vmax.f32 %v3770_v2, 0.0  ;;  %v4200_v2 = vld [vmem:[%s7257_s12 + $0x18] sm:$0xff] }
 0x406   : > { %v6338_v26 = vadd.f32 %v5856_v17, %v7950_v34  ;;  %v3633_v15 = vpop.f32.mrb[9].mxu1  ;;  %v3773_v29 = vadd.f32 %v7987_v33, %v3734_v55 }
 0x407   : > { %v6339_v36 = vadd.f32 %v3633_v15, %v7953_v47  ;;  %5928 = vmatprep.mubr.f32.mxu0 %v3802_v41  ;;  %v3772_v40 = vadd.f32 %v7987_v33, %v3733_v35  ;;  %v4199_v41 = vld [vmem:[%s7257_s12 + $0x10] sm:$0xff] }
 0x408   : > { %v3736_v51 = vmul.f32 %v6338_v26, %v7982_v60  ;;  %5929 = vmatmul.mubr.f32.gmra.mrb[84].mxu0 %v3803_v12  ;;  %v3805_v34 = vmax.f32 %v3773_v29, 0.0 }
 0x409   : > { %v3735_v48 = vmul.f32 %v6339_v36, %v7982_v60  ;;  %v5859_v61 = vpop.f32.mrb[10].mxu1  ;;  %v3804_v37 = vmax.f32 %v3772_v40, 0.0 }
 0x40a   : > { %v6340_v38 = vadd.f32 %v5859_v61, %v7955_v54  ;;  %v3643_v42 = vpop.f32.mrb[11].mxu1  ;;  %v3775_v6 = vadd.f32 %v7987_v33, %v3736_v51 }
 0x40b   : > { %v6341_v10 = vadd.f32 %v3643_v42, %v7957_v30  ;;  %5931 = vmatprep.mubr.f32.mxu0 %v3804_v37  ;;  %v3774_v47 = vadd.f32 %v7987_v33, %v3735_v48  ;;  %v4202_v48 = vld [vmem:[%s7257_s12 + $0x28] sm:$0xff]  ;;  %v4201_v42 = vld [vmem:[%s7257_s12 + $0x20] sm:$0xff] }
 0x40c   : > { %v3738_v21 = vmul.f32 %v6340_v38, %v7982_v60  ;;  %5932 = vmatmul.mubr.f32.gmra.mrb[86].mxu0 %v3805_v34  ;;  %v3807_v54 = vmax.f32 %v3775_v6, 0.0 }
 0x40d   : > { %v3737_v0 = vmul.f32 %v6341_v10, %v7982_v60  ;;  %v5862_v5 = vpop.f32.mrb[12].mxu1  ;;  %v3806_v23 = vmax.f32 %v3774_v47, 0.0 }
 0x40e   : > { %v6342_v31 = vadd.f32 %v5862_v5, %v7959_v63  ;;  %v3653_v45 = vpop.f32.mrb[13].mxu1  ;;  %v3777_v46 = vadd.f32 %v7987_v33, %v3738_v21 }
 0x40f   : > { %v6343_v7 = vadd.f32 %v3653_v45, %v7961_v8  ;;  %5934 = vmatprep.mubr.f32.mxu0 %v3806_v23  ;;  %v3776_v30 = vadd.f32 %v7987_v33, %v3737_v0  ;;  %v4204_v23 = vld [vmem:[%s7257_s12 + $0x38] sm:$0xff] }
 0x410   : > { %v3740_v28 = vmul.f32 %v6342_v31, %v7982_v60  ;;  %5935 = vmatmul.mubr.f32.gmra.mrb[88].mxu0 %v3807_v54  ;;  %v3809_v63 = vmax.f32 %v3777_v46, 0.0  ;;  %v4203_v46 = vld [vmem:[%s7257_s12 + $0x30] sm:$0xff] }
 0x411   : > { %v3739_v14 = vmul.f32 %v6343_v7, %v7982_v60  ;;  %v5865_v4 = vpop.f32.mrb[14].mxu1  ;;  %v3808_v20 = vmax.f32 %v3776_v30, 0.0 }
 0x412   : > { %v6344_v44 = vadd.f32 %v5865_v4, %v7963_v43  ;;  %v3663_v22 = vpop.f32.mrb[15].mxu1  ;;  %v3779_v19 = vadd.f32 %v7987_v33, %v3740_v28 }
 0x413   : > { %v6345_v57 = vadd.f32 %v3663_v22, %v7965_v16  ;;  %5937 = vmatprep.mubr.f32.mxu0 %v3808_v20  ;;  %v3778_v8 = vadd.f32 %v7987_v33, %v3739_v14  ;;  %v4206_v22 = vld [vmem:[%s7257_s12 + $0x48] sm:$0xff] }
 0x414   : > { %v3742_v49 = vmul.f32 %v6344_v44, %v7982_v60  ;;  %5938 = vmatmul.mubr.f32.gmra.mrb[90].mxu0 %v3809_v63  ;;  %v3811_v62 = vmax.f32 %v3779_v19, 0.0 }
 0x415   : > { %v3741_v50 = vmul.f32 %v6345_v57, %v7982_v60  ;;  %v3810_v25 = vmax.f32 %v3778_v8, 0.0  ;;  %v4205_v8 = vld [vmem:[%s7257_s12 + $0x40] sm:$0xff] }
 0x416   : > { %v3781_v32 = vadd.f32 %v7987_v33, %v3742_v49 }
 0x417   : > { %5940 = vmatprep.mubr.f32.mxu0 %v3810_v25  ;;  %v3780_v43 = vadd.f32 %v7987_v33, %v3741_v50 }
 0x418   : > { %5941 = vmatmul.mubr.f32.gmra.mrb[92].mxu0 %v3811_v62  ;;  %v3813_v16 = vmax.f32 %v3781_v32, 0.0 }
 0x419   : > { %v3812_v27 = vmax.f32 %v3780_v43, 0.0 }
 0x41b   : > { %5943 = vmatprep.mubr.f32.mxu0 %v3812_v27 }
 0x41c   : > { %5944 = vmatmul.mubr.f32.gmra.mrb[94].mxu0 %v3813_v16  ;;  %v4208_v16 = vld [vmem:[%s7257_s12 + $0x58] sm:$0xff] }
 0x4b3   : > { %v5900_v60 = vpop.f32.mrb[64].mxu0 }
 0x4b4   : > { %v4127_v53 = vmul.f32 %v5900_v60, %v8078_v18  ;;  %v3960_v33 = vpop.f32.mrb[65].mxu0 }
 0x4b5   : > { %v4126_v13 = vmul.f32 %v8078_v18, %v3960_v33 }
 0x4b6   : > { %v4166_v58 = vadd.f32 %v8083_v56, %v4127_v53 }
 0x4b7   : > { %v4165_v39 = vadd.f32 %v8083_v56, %v4126_v13  ;;  %v5903_v11 = vpop.f32.mrb[66].mxu0 }
 0x4b8   : > { %v4230_v1 = vadd.f32 %v4198_v24, %v4166_v58  ;;  %v4129_v52 = vmul.f32 %v5903_v11, %v8078_v18  ;;  %v3970_v59 = vpop.f32.mrb[67].mxu0  ;;  %v4207_v24 = vld [vmem:[%s7257_s12 + $0x50] sm:$0xff] }
 0x4b9   : > { %v4229_v9 = vadd.f32 %v4197_v3, %v4165_v39  ;;  %v4128_v55 = vmul.f32 %v8078_v18, %v3970_v59  ;;  %v4210_v59 = vld [vmem:[%s7257_s12 + $0x68] sm:$0xff] }
 0x4ba   : > { %v4262_v35 = vmax.f32 %v4230_v1, 0.0  ;;  %v4168_v17 = vadd.f32 %v8083_v56, %v4129_v52 }
 0x4bb   : > { %v4261_v26 = vmax.f32 %v4229_v9, 0.0  ;;  %v4167_v15 = vadd.f32 %v8083_v56, %v4128_v55  ;;  %v5906_v12 = vpop.f32.mrb[68].mxu0 }
 0x4bc   : > { %4294 = vst [vmem:[%s8098_s26 + $0x8] sm:$0xff] %v4262_v35  ;;  %v4232_v29 = vadd.f32 %v4200_v2, %v4168_v17  ;;  %v4131_v36 = vmul.f32 %v5906_v12, %v8078_v18  ;;  %v3980_v40 = vpop.f32.mrb[69].mxu0  ;;  %v4209_v35 = vld [vmem:[%s7257_s12 + $0x60] sm:$0xff] }
 0x4bd   : > { %4293 = vst [vmem:[%s8098_s26] sm:$0xff] %v4261_v26  ;;  %v4231_v51 = vadd.f32 %v4199_v41, %v4167_v15  ;;  %v4130_v61 = vmul.f32 %v8078_v18, %v3980_v40  ;;  %v4212_v40 = vld [vmem:[%s7257_s12 + $0x78] sm:$0xff] }
 0x4be   : > { %v4264_v37 = vmax.f32 %v4232_v29, 0.0  ;;  %v4170_v38 = vadd.f32 %v8083_v56, %v4131_v36 }
 0x4bf   : > { %v4263_v34 = vmax.f32 %v4231_v51, 0.0  ;;  %v4169_v6 = vadd.f32 %v8083_v56, %v4130_v61  ;;  %v5909_v10 = vpop.f32.mrb[70].mxu0 }
 0x4c0   : > { %4296 = vst [vmem:[%s8098_s26 + $0x18] sm:$0xff] %v4264_v37  ;;  %v4234_v47 = vadd.f32 %v4202_v48, %v4170_v38  ;;  %v4133_v21 = vmul.f32 %v5909_v10, %v8078_v18  ;;  %v3990_v0 = vpop.f32.mrb[71].mxu0  ;;  %v4211_v37 = vld [vmem:[%s7257_s12 + $0x70] sm:$0xff] }
 0x4c1   : > { %4295 = vst [vmem:[%s8098_s26 + $0x10] sm:$0xff] %v4263_v34  ;;  %v4233_v5 = vadd.f32 %v4201_v42, %v4169_v6  ;;  %v4132_v31 = vmul.f32 %v8078_v18, %v3990_v0  ;;  %v4214_v0 = vld [vmem:[%s7257_s12 + $0x88] sm:$0xff] }
 0x4c2   : > { %v4266_v45 = vmax.f32 %v4234_v47, 0.0  ;;  %v4172_v54 = vadd.f32 %v8083_v56, %v4133_v21 }
 0x4c3   : > { %v4265_v7 = vmax.f32 %v4233_v5, 0.0  ;;  %v4171_v30 = vadd.f32 %v8083_v56, %v4132_v31  ;;  %v5912_v28 = vpop.f32.mrb[72].mxu0 }
 0x4c4   : > { %4298 = vst [vmem:[%s8098_s26 + $0x28] sm:$0xff] %v4266_v45  ;;  %v4236_v14 = vadd.f32 %v4204_v23, %v4172_v54  ;;  %v4135_v4 = vmul.f32 %v5912_v28, %v8078_v18  ;;  %v4000_v20 = vpop.f32.mrb[73].mxu0  ;;  %v4213_v45 = vld [vmem:[%s7257_s12 + $0x80] sm:$0xff] }
 0x4c5   : > { %4297 = vst [vmem:[%s8098_s26 + $0x20] sm:$0xff] %v4265_v7  ;;  %v4235_v44 = vadd.f32 %v4203_v46, %v4171_v30  ;;  %v4134_v63 = vmul.f32 %v8078_v18, %v4000_v20  ;;  %v4216_v20 = vld [vmem:[%s7257_s12 + $0x98] sm:$0xff] }
 0x4c6   : > { %v4268_v19 = vmax.f32 %v4236_v14, 0.0  ;;  %v4174_v57 = vadd.f32 %v8083_v56, %v4135_v4 }
 0x4c7   : > { %v4267_v49 = vmax.f32 %v4235_v44, 0.0  ;;  %v4173_v50 = vadd.f32 %v8083_v56, %v4134_v63  ;;  %v5915_v25 = vpop.f32.mrb[74].mxu0 }
 0x4c8   : > { %4300 = vst [vmem:[%s8098_s26 + $0x38] sm:$0xff] %v4268_v19  ;;  %v4238_v62 = vadd.f32 %v4206_v22, %v4174_v57  ;;  %v4137_v32 = vmul.f32 %v5915_v25, %v8078_v18  ;;  %v4010_v43 = vpop.f32.mrb[75].mxu0  ;;  %v4215_v19 = vld [vmem:[%s7257_s12 + $0x90] sm:$0xff] }
 0x4c9   : > { %4299 = vst [vmem:[%s8098_s26 + $0x30] sm:$0xff] %v4267_v49  ;;  %v4237_v27 = vadd.f32 %v4205_v8, %v4173_v50  ;;  %v4136_v60 = vmul.f32 %v8078_v18, %v4010_v43  ;;  %v4218_v43 = vld [vmem:[%s7257_s12 + $0xa8] sm:$0xff] }
 0x4ca   : > { %v4270_v53 = vmax.f32 %v4238_v62, 0.0  ;;  %v4176_v33 = vadd.f32 %v8083_v56, %v4137_v32 }
 0x4cb   : > { %v4269_v13 = vmax.f32 %v4237_v27, 0.0  ;;  %v4175_v58 = vadd.f32 %v8083_v56, %v4136_v60  ;;  %v5918_v3 = vpop.f32.mrb[76].mxu0 }
 0x4cc   : > { %4302 = vst [vmem:[%s8098_s26 + $0x48] sm:$0xff] %v4270_v53  ;;  %v4240_v39 = vadd.f32 %v4208_v16, %v4176_v33  ;;  %v4139_v11 = vmul.f32 %v5918_v3, %v8078_v18  ;;  %v4020_v1 = vpop.f32.mrb[77].mxu0  ;;  %v4217_v53 = vld [vmem:[%s7257_s12 + $0xa0] sm:$0xff] }
 0x4cd   : > { %4301 = vst [vmem:[%s8098_s26 + $0x40] sm:$0xff] %v4269_v13  ;;  %v4239_v52 = vadd.f32 %v4207_v24, %v4175_v58  ;;  %v4138_v9 = vmul.f32 %v8078_v18, %v4020_v1  ;;  %v4220_v1 = vld [vmem:[%s7257_s12 + $0xb8] sm:$0xff] }
 0x4ce   : > { %v4272_v2 = vmax.f32 %v4240_v39, 0.0  ;;  %v4178_v55 = vadd.f32 %v8083_v56, %v4139_v11 }
 0x4cf   : > { %v4271_v17 = vmax.f32 %v4239_v52, 0.0  ;;  %v4177_v41 = vadd.f32 %v8083_v56, %v4138_v9  ;;  %v5921_v26 = vpop.f32.mrb[78].mxu0 }
 0x4d0   : > { %4304 = vst [vmem:[%s8098_s26 + $0x58] sm:$0xff] %v4272_v2  ;;  %v4242_v15 = vadd.f32 %v4210_v59, %v4178_v55  ;;  %v4141_v12 = vmul.f32 %v5921_v26, %v8078_v18  ;;  %v4030_v29 = vpop.f32.mrb[79].mxu0  ;;  %v4219_v2 = vld [vmem:[%s7257_s12 + $0xb0] sm:$0xff] }
 0x4d1   : > { %4303 = vst [vmem:[%s8098_s26 + $0x50] sm:$0xff] %v4271_v17  ;;  %v4241_v36 = vadd.f32 %v4209_v35, %v4177_v41  ;;  %v4140_v51 = vmul.f32 %v8078_v18, %v4030_v29  ;;  %v4222_v29 = vld [vmem:[%s7257_s12 + $0xc8] sm:$0xff] }
 0x4d2   : > { %v4274_v48 = vmax.f32 %v4242_v15, 0.0  ;;  %v4180_v61 = vadd.f32 %v8083_v56, %v4141_v12 }
 0x4d3   : > { %v4273_v38 = vmax.f32 %v4241_v36, 0.0  ;;  %v4179_v42 = vadd.f32 %v8083_v56, %v4140_v51  ;;  %v5924_v34 = vpop.f32.mrb[80].mxu0 }
 0x4d4   : > { %4306 = vst [vmem:[%s8098_s26 + $0x68] sm:$0xff] %v4274_v48  ;;  %v4244_v6 = vadd.f32 %v4212_v40, %v4180_v61  ;;  %v4143_v10 = vmul.f32 %v5924_v34, %v8078_v18  ;;  %v4040_v47 = vpop.f32.mrb[81].mxu0  ;;  %v4221_v48 = vld [vmem:[%s7257_s12 + $0xc0] sm:$0xff] }
 0x4d5   : > { %4305 = vst [vmem:[%s8098_s26 + $0x60] sm:$0xff] %v4273_v38  ;;  %v4243_v21 = vadd.f32 %v4211_v37, %v4179_v42  ;;  %v4142_v5 = vmul.f32 %v8078_v18, %v4040_v47  ;;  %v4224_v47 = vld [vmem:[%s7257_s12 + $0xd8] sm:$0xff] }
 0x4d6   : > { %v4276_v23 = vmax.f32 %v4244_v6, 0.0  ;;  %v4182_v31 = vadd.f32 %v8083_v56, %v4143_v10 }
 0x4d7   : > { %v4275_v54 = vmax.f32 %v4243_v21, 0.0  ;;  %v4181_v46 = vadd.f32 %v8083_v56, %v4142_v5  ;;  %v5927_v7 = vpop.f32.mrb[82].mxu0 }
 0x4d8   : > { %4308 = vst [vmem:[%s8098_s26 + $0x78] sm:$0xff] %v4276_v23  ;;  %v4246_v30 = vadd.f32 %v4214_v0, %v4182_v31  ;;  %v4145_v28 = vmul.f32 %v5927_v7, %v8078_v18  ;;  %v4050_v14 = vpop.f32.mrb[83].mxu0  ;;  %v4223_v23 = vld [vmem:[%s7257_s12 + $0xd0] sm:$0xff] }
 0x4d9   : > { %4307 = vst [vmem:[%s8098_s26 + $0x70] sm:$0xff] %v4275_v54  ;;  %v4245_v4 = vadd.f32 %v4213_v45, %v4181_v46  ;;  %v4144_v44 = vmul.f32 %v8078_v18, %v4050_v14  ;;  %v4226_v14 = vld [vmem:[%s7257_s12 + $0xe8] sm:$0xff] }
 0x4da   : > { %v4278_v22 = vmax.f32 %v4246_v30, 0.0  ;;  %v4184_v63 = vadd.f32 %v8083_v56, %v4145_v28 }
 0x4db   : > { %v4277_v57 = vmax.f32 %v4245_v4, 0.0  ;;  %v4183_v8 = vadd.f32 %v8083_v56, %v4144_v44  ;;  %v5930_v49 = vpop.f32.mrb[84].mxu0 }
 0x4dc   : > { %4310 = vst [vmem:[%s8098_s26 + $0x88] sm:$0xff] %v4278_v22  ;;  %v4248_v50 = vadd.f32 %v4216_v20, %v4184_v63  ;;  %v4147_v25 = vmul.f32 %v5930_v49, %v8078_v18  ;;  %v4060_v62 = vpop.f32.mrb[85].mxu0  ;;  %v4225_v22 = vld [vmem:[%s7257_s12 + $0xe0] sm:$0xff] }
 0x4dd   : > { %4309 = vst [vmem:[%s8098_s26 + $0x80] sm:$0xff] %v4277_v57  ;;  %v4247_v32 = vadd.f32 %v4215_v19, %v4183_v8  ;;  %v4146_v27 = vmul.f32 %v8078_v18, %v4060_v62  ;;  %v4228_v62 = vld [vmem:[%s7257_s12 + $0xf8] sm:$0xff] }
 0x4de   : > { %v4280_v16 = vmax.f32 %v4248_v50, 0.0  ;;  %v4186_v60 = vadd.f32 %v8083_v56, %v4147_v25 }
 0x4df   : > { %v4279_v33 = vmax.f32 %v4247_v32, 0.0  ;;  %v4185_v24 = vadd.f32 %v8083_v56, %v4146_v27  ;;  %v5933_v13 = vpop.f32.mrb[86].mxu0 }
 0x4e0   : > { %4312 = vst [vmem:[%s8098_s26 + $0x98] sm:$0xff] %v4280_v16  ;;  %v4250_v58 = vadd.f32 %v4218_v43, %v4186_v60  ;;  %v4149_v3 = vmul.f32 %v5933_v13, %v8078_v18  ;;  %v4070_v39 = vpop.f32.mrb[87].mxu0  ;;  %v4227_v16 = vld [vmem:[%s7257_s12 + $0xf0] sm:$0xff]  ;;  %s4326_s12 = scalar_lea.sflag [#allocation6], %s7242_s11 }
 0x4e1   : > { %4311 = vst [vmem:[%s8098_s26 + $0x90] sm:$0xff] %v4279_v33  ;;  %v4249_v11 = vadd.f32 %v4217_v53, %v4185_v24  ;;  %v4148_v52 = vmul.f32 %v8078_v18, %v4070_v39 }
 0x4e2   : > { %v4282_v59 = vmax.f32 %v4250_v58, 0.0  ;;  %v4188_v9 = vadd.f32 %v8083_v56, %v4149_v3 }
 0x4e3   : > { %v4281_v55 = vmax.f32 %v4249_v11, 0.0  ;;  %v4187_v35 = vadd.f32 %v8083_v56, %v4148_v52  ;;  %v5936_v17 = vpop.f32.mrb[88].mxu0 }
 0x4e4   : > { %4314 = vst [vmem:[%s8098_s26 + $0xa8] sm:$0xff] %v4282_v59  ;;  %v4252_v41 = vadd.f32 %v4220_v1, %v4188_v9  ;;  %v4151_v26 = vmul.f32 %v5936_v17, %v8078_v18  ;;  %v4080_v15 = vpop.f32.mrb[89].mxu0 }
 0x4e5   : > { %4313 = vst [vmem:[%s8098_s26 + $0xa0] sm:$0xff] %v4281_v55  ;;  %v4251_v12 = vadd.f32 %v4219_v2, %v4187_v35  ;;  %v4150_v36 = vmul.f32 %v8078_v18, %v4080_v15 }
 0x4e6   : > { %v4284_v40 = vmax.f32 %v4252_v41, 0.0  ;;  %v4190_v51 = vadd.f32 %v8083_v56, %v4151_v26 }
 0x4e7   : > { %v4283_v61 = vmax.f32 %v4251_v12, 0.0  ;;  %v4189_v37 = vadd.f32 %v8083_v56, %v4150_v36  ;;  %v5939_v38 = vpop.f32.mrb[90].mxu0 }
 0x4e8   : > { %4316 = vst [vmem:[%s8098_s26 + $0xb8] sm:$0xff] %v4284_v40  ;;  %v4254_v42 = vadd.f32 %v4222_v29, %v4190_v51  ;;  %v4153_v34 = vmul.f32 %v5939_v38, %v8078_v18  ;;  %v4090_v6 = vpop.f32.mrb[91].mxu0 }
 0x4e9   : > { %4315 = vst [vmem:[%s8098_s26 + $0xb0] sm:$0xff] %v4283_v61  ;;  %v4253_v10 = vadd.f32 %v4221_v48, %v4189_v37  ;;  %v4152_v21 = vmul.f32 %v8078_v18, %v4090_v6 }
 0x4ea   : > { %v4286_v0 = vmax.f32 %v4254_v42, 0.0  ;;  %v4192_v5 = vadd.f32 %v8083_v56, %v4153_v34 }
 0x4eb   : > { %v4285_v31 = vmax.f32 %v4253_v10, 0.0  ;;  %v4191_v45 = vadd.f32 %v8083_v56, %v4152_v21  ;;  %v5942_v54 = vpop.f32.mrb[92].mxu0 }
 0x4ec   : > { %4318 = vst [vmem:[%s8098_s26 + $0xc8] sm:$0xff] %v4286_v0  ;;  %v4256_v46 = vadd.f32 %v4224_v47, %v4192_v5  ;;  %v4155_v7 = vmul.f32 %v5942_v54, %v8078_v18  ;;  %v4100_v30 = vpop.f32.mrb[93].mxu0 }
 0x4ed   : > { %4317 = vst [vmem:[%s8098_s26 + $0xc0] sm:$0xff] %v4285_v31  ;;  %v4255_v28 = vadd.f32 %v4223_v23, %v4191_v45  ;;  %v4154_v4 = vmul.f32 %v8078_v18, %v4100_v30 }
 0x4ee   : > { %v4288_v20 = vmax.f32 %v4256_v46, 0.0  ;;  %v4194_v44 = vadd.f32 %v8083_v56, %v4155_v7 }
 0x4ef   : > { %v4287_v63 = vmax.f32 %v4255_v28, 0.0  ;;  %v4193_v19 = vadd.f32 %v8083_v56, %v4154_v4  ;;  %v5945_v57 = vpop.f32.mrb[94].mxu0 }
 0x4f0   : > { %4320 = vst [vmem:[%s8098_s26 + $0xd8] sm:$0xff] %v4288_v20  ;;  %v4258_v8 = vadd.f32 %v4226_v14, %v4194_v44  ;;  %v4157_v49 = vmul.f32 %v5945_v57, %v8078_v18  ;;  %v4110_v50 = vpop.f32.mrb[95].mxu0 }
 0x4f1   : > { %4319 = vst [vmem:[%s8098_s26 + $0xd0] sm:$0xff] %v4287_v63  ;;  %v4257_v25 = vadd.f32 %v4225_v22, %v4193_v19  ;;  %v4156_v32 = vmul.f32 %v8078_v18, %v4110_v50 }
 0x4f2   : > { %v4290_v43 = vmax.f32 %v4258_v8, 0.0  ;;  %v4196_v27 = vadd.f32 %v8083_v56, %v4157_v49 }
 0x4f3   : > { %v4289_v60 = vmax.f32 %v4257_v25, 0.0  ;;  %v4195_v53 = vadd.f32 %v8083_v56, %v4156_v32 }
 0x4f4   : > { %4322 = vst [vmem:[%s8098_s26 + $0xe8] sm:$0xff] %v4290_v43  ;;  %v4260_v33 = vadd.f32 %v4228_v62, %v4196_v27 }
 0x4f5   : > { %4321 = vst [vmem:[%s8098_s26 + $0xe0] sm:$0xff] %v4289_v60  ;;  %v4259_v24 = vadd.f32 %v4227_v16, %v4195_v53 }
 0x4f6   : > { %v4292_v13 = vmax.f32 %v4260_v33, 0.0 }
 0x4f7   : > { %v4291_v18 = vmax.f32 %v4259_v24, 0.0 }
 0x4f8   : > { %4324 = vst [vmem:[%s8098_s26 + $0xf8] sm:$0xff] %v4292_v13 }
 0x4f9   : > { %4323 = vst [vmem:[%s8098_s26 + $0xf0] sm:$0xff] %v4291_v18 }
 0x4fa   : > { %6831 = shalt.err (!%p6828_p7)
}
 0x4fb   : > { %s6832_s0 = scalar_lea.hbm %s8219_s5, 4096  ;;  %s6836_s27 = scalar_lea.hbm %s8370_s2, 8192 }
 0x4fc   : > { %p6833_p12 = scmp.ne.s32.totalorder %s8219_s5, %s6832_s0  ;;  %p6837_p9 = scmp.lt.u32.totalorder %s8219_s5, %s8370_s2 }
 0x4fd   : > { %p6838_p0 = scmp.lt.u32.totalorder %s6836_s27, %s6832_s0  ;;  %p6840_p4 = scmp.lt.u32.totalorder %s6832_s0, %s8219_s5 }
 0x4fe   : > { %p6834_p6 = pnand %p6833_p12, %p7141_p10 }
 0x4ff   : > { %p6839_p2 = por %p6838_p0, %p6837_p9 }
 0x500   : > { %p6835_p11 = pneg %p6834_p6 }
 0x501   : > { %p6841_p8 = por %p6840_p4, %p6839_p2 }
 0x503   : > { %p6842_p1 = pnand %p6841_p8, %p6835_p11 }
 0x505   : > { %6845 = shalt.err (!%p6842_p1)
}
 0x506   : > { %s6923_s23 = smov 128   ;;  %s6924_s14 = smov 8  }
 0x507   : > { %6586 = dma.vmem_to_hbm [thread:$0]  (%p7141_p10), %s8221_s25, 4096, %s8219_s5, %s4326_s12, %s6923_s23, %s6923_s23, %s6924_s14  }
 0x508 PF: > { %s8371_s29 = sld [smem:[#allocation19_spill]]  ;;  %s8372_s20 = sld [smem:[#allocation21_spill]] }
 0x509   : > { %p8374_p3 = scmp.ge.s32.totalorder %s6912_s22, 2 }
 0x50e   : > { %s4355_s15 = sand.u32 1, %s8371_s29   ;;  %p8373_p13 = scmp.ne.s32.totalorder %s8372_s20, 0 }
 0x50f   : > { %s4356_s16 = scalar_lea.sflag [#allocation6], %s4355_s15 }
 0x510   : > { %p6606_p5 = pnand %p8374_p3, %p8373_p13 }
 0x512   : > { %6887 = dma.done.wait (!%p6606_p5), %s4356_s16, 4096  }
 0x513   : > { %6889 = vsyncadd (!%p6606_p5), %s4356_s16, 4294963200  ;;  %s31_s22 = sadd.s32 1, %s6912_s22   ;;  %s8375_s17 = smov %s6896_s18 }
 0x514   : > { %p28_p7 = scmp.ge.s32.totalorder %s31_s22, 4   ;;  %s8376_s18 = smov %s6900_s19 }
 0x515   : > { %s8377_s19 = smov %s7153_s28  ;;  %s8378_s20 = smov %s6908_s21 }
 0x516   : > { %s8379_s21 = smov %s8381_s30  ;;  %30 = sbr.rel (!%p28_p7) target bundleno = 17 (0x11), region = 155 }
 0x51d   :  { %4361 = vsyncpa [#allocation5], 1 }
 0x51e   :  { %4363 = vsyncpa [#allocation5 + $0x1], 1 }
 0x51f   :  { %4364 = vsyncpa [#allocation8], 1 }
 0x520   :  { %4366 = vsyncpa [#allocation8 + $0x1], 1 }
 0x521   :  { %4367 = vsyncpa [#allocation11], 1 }
 0x522   :  { %4368 = vsyncpa [#allocation6], 1 }
 0x523   :  { %4370 = vsyncpa [#allocation6 + $0x1], 1 }

</bundles_post_ra>
